<compile_context>
chip_gen: v6e
topology: v6e:2x2x1
jax: 0.10.0
libtpu: 0.0.40
codegen_flags: <defaults>
</compile_context>

<pallas_src>
import math

import jax
import jax.numpy as jnp
from jax.experimental import pallas as pl
from jax.experimental.pallas import tpu as pltpu


_SQRT_HALF = 1.0 / math.sqrt(2.0)
_LANE = 128
_SUBLANE = 8


def _gelu_exact(x):
    # Matches torch.nn.functional.gelu default (erf-based, not tanh approx).
    return 0.5 * x * (1.0 + jax.lax.erf(x * _SQRT_HALF))


def _taa_kernel(w_ref, q_ref, k_ref, v_ref, o_ref):
    # Batch-on-lanes block (TB batch elements on the 128-wide lane axis):
    #   w_ref : (H, H)       linear weight (out_features, in_features) -- resident
    #   q_ref : (N, H, TB)   q_ref[n, h, b] = query[b, n, h]
    #   k_ref : (H, K1, TB)  k_ref[h, k, b] = key[b, k, h]
    #   v_ref : (N, K1, TB)  v_ref[n, k, b] = value[b, k, n]
    #   o_ref : (K1, TB)     o_ref[k, b]    = out[b, k]
    n_codes = q_ref.shape[0]

    w = w_ref[...]
    kvec = k_ref[...]                                   # (H, K1, TB)

    # Per context code n:
    #   proj_n = gelu(W @ q_n)                (H, TB)  lane-dense MXU matmul + gelu
    #   s_n[k, b] = sum_h kvec[h,k,b]*p[h,b]  (K1, TB) VPU multiply + add-reduce over
    #                                                  the leading H axis (no MXU,
    #                                                  no transposes, no XLU reduce)
    scores = []
    for n in range(n_codes):
        p = jnp.dot(w, q_ref[n], preferred_element_type=jnp.float32)   # (H, TB)
        p = _gelu_exact(p)
        scores.append(jnp.sum(kvec * p[:, None, :], axis=0))           # (K1, TB)

    # Numerically-stable softmax over the context-code axis, with the
    # normalization folded into the final weighted reduction.  Everything here
    # is (K1, TB): full lane occupancy for the exp (EUP) and VPU work.
    m = scores[0]
    for s in scores[1:]:
        m = jnp.maximum(m, s)
    denom = jnp.zeros_like(m)
    num = jnp.zeros_like(m)
    for n in range(n_codes):
        e = jnp.exp(scores[n] - m)                                      # (K1, TB)
        denom = denom + e
        num = num + e * v_ref[n]                                        # (K1, TB)

    # Exact reciprocal on just K1*TB values; lane-dense output store.
    o_ref[...] = (num * pl.reciprocal(denom, approx=False)).astype(o_ref.dtype)


def _round_up(x, m):
    return ((x + m - 1) // m) * m


def _vmem_bytes_per_lane(N, H, K1, itemsize):
    """(8,128)-tile-padded VMEM bytes per batch element (= per lane), including
    the in-kernel intermediates (proj, broadcast product slab, score/exp slabs)."""
    k1p = _round_up(K1, _SUBLANE)
    hp = _round_up(H, _SUBLANE)
    # Pipeline-managed blocks (double-buffered): q, k, v inputs + output.
    io = N * hp + H * k1p + N * k1p + k1p
    # In-kernel temporaries (single-buffered, rough peak):
    #   kvec*p product slab, one proj slab, score + exp slabs, softmax scalars.
    temps = H * k1p + hp + 2 * N * k1p + 4 * k1p
    return 2 * io * itemsize + temps * 4


def target_aware_attention(w, query, key, value, *, block_b=None,
                           vmem_budget_bytes=16 * 1024 * 1024):
    """w: (H, H) nn.Linear weight (out, in); query: (B, N, H);
    key: (B, K1, H); value: (B, K1, N) -> out: (B, K1)."""
    B, N, H = query.shape
    _, K1, _ = key.shape
    assert key.shape == (B, K1, H)
    assert value.shape == (B, K1, N)
    assert w.shape == (H, H)

    itemsize = jnp.dtype(query.dtype).itemsize
    per_lane = _vmem_bytes_per_lane(N, H, K1, itemsize)

    # ---- batch-block (lane) size: padded-byte accounting + v7x megacore ----
    if block_b is None:
        budget_tb = (vmem_budget_bytes // per_lane // _LANE) * _LANE
        budget_tb = int(max(_LANE, min(budget_tb, 2048)))
        if B < 2 * _LANE:
            # Too small to split into two >=128-lane blocks: one full-width
            # block (block lane dim == full array dim is always layout-legal),
            # zero padding.
            block_b = B
        else:
            # >=2 grid steps so the "parallel" batch axis feeds both v7x
            # TensorCores: ceil(B/2) rounded up to the 128-lane width.
            two_step = _LANE * ((B + 2 * _LANE - 1) // (2 * _LANE))
            block_b = min(budget_tb, two_step)
    else:
        assert block_b == B or block_b % _LANE == 0, (
            "block_b must equal B or be a multiple of 128 (lane width)")
        block_b = min(block_b, B)

    num_blocks = (B + block_b - 1) // block_b
    Bp = num_blocks * block_b
    if Bp != B:
        # Tail-only zero padding along batch.  It is emitted next to the
        # layout transposes below so XLA folds it into the same copy pass —
        # no standalone full-size HBM round trip of the inputs.
        pad = Bp - B
        query = jnp.pad(query, ((0, pad), (0, 0), (0, 0)))
        key = jnp.pad(key, ((0, pad), (0, 0), (0, 0)))
        value = jnp.pad(value, ((0, pad), (0, 0), (0, 0)))

    # One-time wrapper-side batch-on-lanes layout (the price of lane density;
    # the kernel then never relayouts or transposes anything).
    q_t = jnp.transpose(query, (1, 2, 0))    # (N, H, Bp)
    k_t = jnp.transpose(key, (2, 1, 0))      # (H, K1, Bp)
    v_t = jnp.transpose(value, (2, 1, 0))    # (N, K1, Bp)

    # Advisory cost estimate for XLA scheduling around the custom call.
    flops = (2 * Bp * N * H * H          # projection matmuls
             + 2 * Bp * K1 * N * H       # score multiply-reduce
             + 6 * Bp * K1 * N)          # softmax + weighted sum
    transcendentals = Bp * N * H + Bp * K1 * N
    bytes_accessed = itemsize * (H * H + Bp * (N * H + K1 * H + K1 * N + K1))

    out_t = pl.pallas_call(
        _taa_kernel,
        out_shape=jax.ShapeDtypeStruct((K1, Bp), query.dtype),
        grid_spec=pltpu.PrefetchScalarGridSpec(
            num_scalar_prefetch=0,
            grid=(num_blocks,),
            in_specs=[
                pl.BlockSpec((H, H), lambda b: (0, 0)),                # W (resident)
                pl.BlockSpec((N, H, block_b), lambda b: (0, 0, b)),    # query^T
                pl.BlockSpec((H, K1, block_b), lambda b: (0, 0, b)),   # key^T
                pl.BlockSpec((N, K1, block_b), lambda b: (0, 0, b)),   # value^T
            ],
            out_specs=pl.BlockSpec((K1, block_b), lambda b: (0, b)),
        ),
        compiler_params=pltpu.CompilerParams(
            dimension_semantics=("parallel",),     # batch blocks -> megacore / 2 TCs
            vmem_limit_bytes=32 * 1024 * 1024,     # safe on v5e/v6e/v7x
        ),
        cost_estimate=pl.CostEstimate(
            flops=flops,
            transcendentals=transcendentals,
            bytes_accessed=bytes_accessed,
        ),
    )(w, q_t, k_t, v_t)

    # (K1, Bp) -> (B, K1): drop the zero-padded tail, restore batch-major order.
    return jnp.transpose(out_t[:, :B], (1, 0))


def _reference(w, query, key, value):
    proj = _gelu_exact(jnp.einsum("bnh,oh->bno", query, w,
                                  precision=jax.lax.Precision.HIGHEST))
    scores = jnp.einsum("bkh,bnh->bkn", key, proj,
                        precision=jax.lax.Precision.HIGHEST)
    weights = jax.nn.softmax(scores, axis=-1)
    return jnp.sum(weights * value, axis=-1)


if __name__ == "__main__":
    # Small, module-consistent shapes:
    B = 2              # batch_size
    N = 8              # num_context_codes
    H = 32             # hidden_size
    K1 = 5             # K+1 candidates

    root = jax.random.PRNGKey(0)
    k_w, k_q, k_k, k_v = jax.random.split(root, 4)

    w = jax.random.normal(k_w, (H, H), dtype=jnp.float32) * (1.0 / math.sqrt(H))
    query = jax.random.normal(k_q, (B, N, H), dtype=jnp.float32)
    key = jax.random.normal(k_k, (B, K1, H), dtype=jnp.float32)
    value = jax.random.normal(k_v, (B, K1, N), dtype=jnp.float32)

    out = jax.block_until_ready(target_aware_attention(w, query, key, value))
    ref = _reference(w, query, key, value)
    assert out.shape == (B, K1), out.shape
    assert jnp.allclose(out, ref, atol=1e-5, rtol=1e-5), (
        f"max abs err {jnp.max(jnp.abs(out - ref))}")

    # Multi-block + ragged-tail path (B not a multiple of the 128-lane block).
    B2 = 300
    k_q2, k_k2, k_v2 = jax.random.split(jax.random.PRNGKey(1), 3)
    query2 = jax.random.normal(k_q2, (B2, N, H), dtype=jnp.float32)
    key2 = jax.random.normal(k_k2, (B2, K1, H), dtype=jnp.float32)
    value2 = jax.random.normal(k_v2, (B2, K1, N), dtype=jnp.float32)

    out2 = jax.block_until_ready(
        target_aware_attention(w, query2, key2, value2, block_b=128))
    ref2 = _reference(w, query2, key2, value2)
    assert out2.shape == (B2, K1), out2.shape
    assert jnp.allclose(out2, ref2, atol=1e-5, rtol=1e-5), (
        f"max abs err {jnp.max(jnp.abs(out2 - ref2))}")

    # Auto block-size selection path (no explicit block_b).
    out3 = jax.block_until_ready(target_aware_attention(w, query2, key2, value2))
    assert jnp.allclose(out3, ref2, atol=1e-5, rtol=1e-5), (
        f"max abs err {jnp.max(jnp.abs(out3 - ref2))}")

    print("KERNEL_OK")
</pallas_src>

<mosaic_0001>
module attributes {stable_mosaic.version = 11 : i64} {
  func.func @_taa_kernel(%arg0: i32, %arg1: memref<32x32xf32, #tpu.memory_space<vmem>>, %arg2: memref<8x32x2xf32, #tpu.memory_space<vmem>>, %arg3: memref<32x5x2xf32, #tpu.memory_space<vmem>>, %arg4: memref<8x5x2xf32, #tpu.memory_space<vmem>>, %arg5: memref<5x2xf32, #tpu.memory_space<vmem>>) attributes {dimension_semantics = [#tpu.dimension_semantics<parallel>], iteration_bounds = array<i64: 1>, scalar_prefetch = 0 : i64, scratch_operands = 0 : i64, tpu.core_type = #tpu.core_type<tc>, window_params = [{pipeline_mode = #tpu.pipeline_mode<synchronous>, transform_indices = @transform_0, window_bounds = array<i64: 32, 32>}, {transform_indices = @transform_1, window_bounds = array<i64: 8, 32, 2>}, {transform_indices = @transform_2, window_bounds = array<i64: 32, 5, 2>}, {transform_indices = @transform_3, window_bounds = array<i64: 8, 5, 2>}, {transform_indices = @transform_4, window_bounds = array<i64: 5, 2>}]} {
    %c0 = arith.constant 0 : index
    %c0_0 = arith.constant 0 : index
    %0 = vector.load %arg1[%c0, %c0_0] : memref<32x32xf32, #tpu.memory_space<vmem>>, vector<32x32xf32>
    %c0_1 = arith.constant 0 : index
    %c0_2 = arith.constant 0 : index
    %c0_3 = arith.constant 0 : index
    %1 = vector.load %arg3[%c0_1, %c0_2, %c0_3] : memref<32x5x2xf32, #tpu.memory_space<vmem>>, vector<32x5x2xf32>
    %c0_4 = arith.constant 0 : index
    %c0_5 = arith.constant 0 : index
    %c0_6 = arith.constant 0 : index
    %2 = vector.load %arg2[%c0_4, %c0_5, %c0_6] : memref<8x32x2xf32, #tpu.memory_space<vmem>>, vector<1x32x2xf32>
    %3 = vector.shape_cast %2 : vector<1x32x2xf32> to vector<32x2xf32>
    %cst = arith.constant dense<0.000000e+00> : vector<32x2xf32>
    %4 = tpu.matmul %0, %3, %cst {dimension_numbers = #tpu.dot_dimension_numbers<[1], [0], [0], [1], [0, 0, 1, 1], [], []>} : vector<32x32xf32>, vector<32x2xf32>, vector<32x2xf32> -> vector<32x2xf32>
    %cst_7 = arith.constant 5.000000e-01 : f32
    %5 = vector.broadcast %cst_7 : f32 to vector<32x2xf32>
    %6 = arith.mulf %5, %4 : vector<32x2xf32>
    %cst_8 = arith.constant 0.707106769 : f32
    %7 = vector.broadcast %cst_8 : f32 to vector<32x2xf32>
    %8 = arith.mulf %4, %7 : vector<32x2xf32>
    %9 = math.erf %8 : vector<32x2xf32>
    %cst_9 = arith.constant 1.000000e+00 : f32
    %10 = vector.broadcast %cst_9 : f32 to vector<32x2xf32>
    %11 = arith.addf %10, %9 : vector<32x2xf32>
    %12 = arith.mulf %6, %11 : vector<32x2xf32>
    %13 = vector.shape_cast %12 : vector<32x2xf32> to vector<32x1x2xf32>
    %14 = vector.broadcast %13 : vector<32x1x2xf32> to vector<32x5x2xf32>
    %15 = arith.mulf %1, %14 : vector<32x5x2xf32>
    %cst_10 = arith.constant dense<0.000000e+00> : vector<5x2xf32>
    %16 = vector.multi_reduction <add>, %15, %cst_10 [0] : vector<32x5x2xf32> to vector<5x2xf32>
    %c1 = arith.constant 1 : index
    %c0_11 = arith.constant 0 : index
    %c0_12 = arith.constant 0 : index
    %17 = vector.load %arg2[%c1, %c0_11, %c0_12] : memref<8x32x2xf32, #tpu.memory_space<vmem>>, vector<1x32x2xf32>
    %18 = vector.shape_cast %17 : vector<1x32x2xf32> to vector<32x2xf32>
    %cst_13 = arith.constant dense<0.000000e+00> : vector<32x2xf32>
    %19 = tpu.matmul %0, %18, %cst_13 {dimension_numbers = #tpu.dot_dimension_numbers<[1], [0], [0], [1], [0, 0, 1, 1], [], []>} : vector<32x32xf32>, vector<32x2xf32>, vector<32x2xf32> -> vector<32x2xf32>
    %cst_14 = arith.constant 5.000000e-01 : f32
    %20 = vector.broadcast %cst_14 : f32 to vector<32x2xf32>
    %21 = arith.mulf %20, %19 : vector<32x2xf32>
    %cst_15 = arith.constant 0.707106769 : f32
    %22 = vector.broadcast %cst_15 : f32 to vector<32x2xf32>
    %23 = arith.mulf %19, %22 : vector<32x2xf32>
    %24 = math.erf %23 : vector<32x2xf32>
    %cst_16 = arith.constant 1.000000e+00 : f32
    %25 = vector.broadcast %cst_16 : f32 to vector<32x2xf32>
    %26 = arith.addf %25, %24 : vector<32x2xf32>
    %27 = arith.mulf %21, %26 : vector<32x2xf32>
    %28 = vector.shape_cast %27 : vector<32x2xf32> to vector<32x1x2xf32>
    %29 = vector.broadcast %28 : vector<32x1x2xf32> to vector<32x5x2xf32>
    %30 = arith.mulf %1, %29 : vector<32x5x2xf32>
    %cst_17 = arith.constant dense<0.000000e+00> : vector<5x2xf32>
    %31 = vector.multi_reduction <add>, %30, %cst_17 [0] : vector<32x5x2xf32> to vector<5x2xf32>
    %c2 = arith.constant 2 : index
    %c0_18 = arith.constant 0 : index
    %c0_19 = arith.constant 0 : index
    %32 = vector.load %arg2[%c2, %c0_18, %c0_19] : memref<8x32x2xf32, #tpu.memory_space<vmem>>, vector<1x32x2xf32>
    %33 = vector.shape_cast %32 : vector<1x32x2xf32> to vector<32x2xf32>
    %cst_20 = arith.constant dense<0.000000e+00> : vector<32x2xf32>
    %34 = tpu.matmul %0, %33, %cst_20 {dimension_numbers = #tpu.dot_dimension_numbers<[1], [0], [0], [1], [0, 0, 1, 1], [], []>} : vector<32x32xf32>, vector<32x2xf32>, vector<32x2xf32> -> vector<32x2xf32>
    %cst_21 = arith.constant 5.000000e-01 : f32
    %35 = vector.broadcast %cst_21 : f32 to vector<32x2xf32>
    %36 = arith.mulf %35, %34 : vector<32x2xf32>
    %cst_22 = arith.constant 0.707106769 : f32
    %37 = vector.broadcast %cst_22 : f32 to vector<32x2xf32>
    %38 = arith.mulf %34, %37 : vector<32x2xf32>
    %39 = math.erf %38 : vector<32x2xf32>
    %cst_23 = arith.constant 1.000000e+00 : f32
    %40 = vector.broadcast %cst_23 : f32 to vector<32x2xf32>
    %41 = arith.addf %40, %39 : vector<32x2xf32>
    %42 = arith.mulf %36, %41 : vector<32x2xf32>
    %43 = vector.shape_cast %42 : vector<32x2xf32> to vector<32x1x2xf32>
    %44 = vector.broadcast %43 : vector<32x1x2xf32> to vector<32x5x2xf32>
    %45 = arith.mulf %1, %44 : vector<32x5x2xf32>
    %cst_24 = arith.constant dense<0.000000e+00> : vector<5x2xf32>
    %46 = vector.multi_reduction <add>, %45, %cst_24 [0] : vector<32x5x2xf32> to vector<5x2xf32>
    %c3 = arith.constant 3 : index
    %c0_25 = arith.constant 0 : index
    %c0_26 = arith.constant 0 : index
    %47 = vector.load %arg2[%c3, %c0_25, %c0_26] : memref<8x32x2xf32, #tpu.memory_space<vmem>>, vector<1x32x2xf32>
    %48 = vector.shape_cast %47 : vector<1x32x2xf32> to vector<32x2xf32>
    %cst_27 = arith.constant dense<0.000000e+00> : vector<32x2xf32>
    %49 = tpu.matmul %0, %48, %cst_27 {dimension_numbers = #tpu.dot_dimension_numbers<[1], [0], [0], [1], [0, 0, 1, 1], [], []>} : vector<32x32xf32>, vector<32x2xf32>, vector<32x2xf32> -> vector<32x2xf32>
    %cst_28 = arith.constant 5.000000e-01 : f32
    %50 = vector.broadcast %cst_28 : f32 to vector<32x2xf32>
    %51 = arith.mulf %50, %49 : vector<32x2xf32>
    %cst_29 = arith.constant 0.707106769 : f32
    %52 = vector.broadcast %cst_29 : f32 to vector<32x2xf32>
    %53 = arith.mulf %49, %52 : vector<32x2xf32>
    %54 = math.erf %53 : vector<32x2xf32>
    %cst_30 = arith.constant 1.000000e+00 : f32
    %55 = vector.broadcast %cst_30 : f32 to vector<32x2xf32>
    %56 = arith.addf %55, %54 : vector<32x2xf32>
    %57 = arith.mulf %51, %56 : vector<32x2xf32>
    %58 = vector.shape_cast %57 : vector<32x2xf32> to vector<32x1x2xf32>
    %59 = vector.broadcast %58 : vector<32x1x2xf32> to vector<32x5x2xf32>
    %60 = arith.mulf %1, %59 : vector<32x5x2xf32>
    %cst_31 = arith.constant dense<0.000000e+00> : vector<5x2xf32>
    %61 = vector.multi_reduction <add>, %60, %cst_31 [0] : vector<32x5x2xf32> to vector<5x2xf32>
    %c4 = arith.constant 4 : index
    %c0_32 = arith.constant 0 : index
    %c0_33 = arith.constant 0 : index
    %62 = vector.load %arg2[%c4, %c0_32, %c0_33] : memref<8x32x2xf32, #tpu.memory_space<vmem>>, vector<1x32x2xf32>
    %63 = vector.shape_cast %62 : vector<1x32x2xf32> to vector<32x2xf32>
    %cst_34 = arith.constant dense<0.000000e+00> : vector<32x2xf32>
    %64 = tpu.matmul %0, %63, %cst_34 {dimension_numbers = #tpu.dot_dimension_numbers<[1], [0], [0], [1], [0, 0, 1, 1], [], []>} : vector<32x32xf32>, vector<32x2xf32>, vector<32x2xf32> -> vector<32x2xf32>
    %cst_35 = arith.constant 5.000000e-01 : f32
    %65 = vector.broadcast %cst_35 : f32 to vector<32x2xf32>
    %66 = arith.mulf %65, %64 : vector<32x2xf32>
    %cst_36 = arith.constant 0.707106769 : f32
    %67 = vector.broadcast %cst_36 : f32 to vector<32x2xf32>
    %68 = arith.mulf %64, %67 : vector<32x2xf32>
    %69 = math.erf %68 : vector<32x2xf32>
    %cst_37 = arith.constant 1.000000e+00 : f32
    %70 = vector.broadcast %cst_37 : f32 to vector<32x2xf32>
    %71 = arith.addf %70, %69 : vector<32x2xf32>
    %72 = arith.mulf %66, %71 : vector<32x2xf32>
    %73 = vector.shape_cast %72 : vector<32x2xf32> to vector<32x1x2xf32>
    %74 = vector.broadcast %73 : vector<32x1x2xf32> to vector<32x5x2xf32>
    %75 = arith.mulf %1, %74 : vector<32x5x2xf32>
    %cst_38 = arith.constant dense<0.000000e+00> : vector<5x2xf32>
    %76 = vector.multi_reduction <add>, %75, %cst_38 [0] : vector<32x5x2xf32> to vector<5x2xf32>
    %c5 = arith.constant 5 : index
    %c0_39 = arith.constant 0 : index
    %c0_40 = arith.constant 0 : index
    %77 = vector.load %arg2[%c5, %c0_39, %c0_40] : memref<8x32x2xf32, #tpu.memory_space<vmem>>, vector<1x32x2xf32>
    %78 = vector.shape_cast %77 : vector<1x32x2xf32> to vector<32x2xf32>
    %cst_41 = arith.constant dense<0.000000e+00> : vector<32x2xf32>
    %79 = tpu.matmul %0, %78, %cst_41 {dimension_numbers = #tpu.dot_dimension_numbers<[1], [0], [0], [1], [0, 0, 1, 1], [], []>} : vector<32x32xf32>, vector<32x2xf32>, vector<32x2xf32> -> vector<32x2xf32>
    %cst_42 = arith.constant 5.000000e-01 : f32
    %80 = vector.broadcast %cst_42 : f32 to vector<32x2xf32>
    %81 = arith.mulf %80, %79 : vector<32x2xf32>
    %cst_43 = arith.constant 0.707106769 : f32
    %82 = vector.broadcast %cst_43 : f32 to vector<32x2xf32>
    %83 = arith.mulf %79, %82 : vector<32x2xf32>
    %84 = math.erf %83 : vector<32x2xf32>
    %cst_44 = arith.constant 1.000000e+00 : f32
    %85 = vector.broadcast %cst_44 : f32 to vector<32x2xf32>
    %86 = arith.addf %85, %84 : vector<32x2xf32>
    %87 = arith.mulf %81, %86 : vector<32x2xf32>
    %88 = vector.shape_cast %87 : vector<32x2xf32> to vector<32x1x2xf32>
    %89 = vector.broadcast %88 : vector<32x1x2xf32> to vector<32x5x2xf32>
    %90 = arith.mulf %1, %89 : vector<32x5x2xf32>
    %cst_45 = arith.constant dense<0.000000e+00> : vector<5x2xf32>
    %91 = vector.multi_reduction <add>, %90, %cst_45 [0] : vector<32x5x2xf32> to vector<5x2xf32>
    %c6 = arith.constant 6 : index
    %c0_46 = arith.constant 0 : index
    %c0_47 = arith.constant 0 : index
    %92 = vector.load %arg2[%c6, %c0_46, %c0_47] : memref<8x32x2xf32, #tpu.memory_space<vmem>>, vector<1x32x2xf32>
    %93 = vector.shape_cast %92 : vector<1x32x2xf32> to vector<32x2xf32>
    %cst_48 = arith.constant dense<0.000000e+00> : vector<32x2xf32>
    %94 = tpu.matmul %0, %93, %cst_48 {dimension_numbers = #tpu.dot_dimension_numbers<[1], [0], [0], [1], [0, 0, 1, 1], [], []>} : vector<32x32xf32>, vector<32x2xf32>, vector<32x2xf32> -> vector<32x2xf32>
    %cst_49 = arith.constant 5.000000e-01 : f32
    %95 = vector.broadcast %cst_49 : f32 to vector<32x2xf32>
    %96 = arith.mulf %95, %94 : vector<32x2xf32>
    %cst_50 = arith.constant 0.707106769 : f32
    %97 = vector.broadcast %cst_50 : f32 to vector<32x2xf32>
    %98 = arith.mulf %94, %97 : vector<32x2xf32>
    %99 = math.erf %98 : vector<32x2xf32>
    %cst_51 = arith.constant 1.000000e+00 : f32
    %100 = vector.broadcast %cst_51 : f32 to vector<32x2xf32>
    %101 = arith.addf %100, %99 : vector<32x2xf32>
    %102 = arith.mulf %96, %101 : vector<32x2xf32>
    %103 = vector.shape_cast %102 : vector<32x2xf32> to vector<32x1x2xf32>
    %104 = vector.broadcast %103 : vector<32x1x2xf32> to vector<32x5x2xf32>
    %105 = arith.mulf %1, %104 : vector<32x5x2xf32>
    %cst_52 = arith.constant dense<0.000000e+00> : vector<5x2xf32>
    %106 = vector.multi_reduction <add>, %105, %cst_52 [0] : vector<32x5x2xf32> to vector<5x2xf32>
    %c7 = arith.constant 7 : index
    %c0_53 = arith.constant 0 : index
    %c0_54 = arith.constant 0 : index
    %107 = vector.load %arg2[%c7, %c0_53, %c0_54] : memref<8x32x2xf32, #tpu.memory_space<vmem>>, vector<1x32x2xf32>
    %108 = vector.shape_cast %107 : vector<1x32x2xf32> to vector<32x2xf32>
    %cst_55 = arith.constant dense<0.000000e+00> : vector<32x2xf32>
    %109 = tpu.matmul %0, %108, %cst_55 {dimension_numbers = #tpu.dot_dimension_numbers<[1], [0], [0], [1], [0, 0, 1, 1], [], []>} : vector<32x32xf32>, vector<32x2xf32>, vector<32x2xf32> -> vector<32x2xf32>
    %cst_56 = arith.constant 5.000000e-01 : f32
    %110 = vector.broadcast %cst_56 : f32 to vector<32x2xf32>
    %111 = arith.mulf %110, %109 : vector<32x2xf32>
    %cst_57 = arith.constant 0.707106769 : f32
    %112 = vector.broadcast %cst_57 : f32 to vector<32x2xf32>
    %113 = arith.mulf %109, %112 : vector<32x2xf32>
    %114 = math.erf %113 : vector<32x2xf32>
    %cst_58 = arith.constant 1.000000e+00 : f32
    %115 = vector.broadcast %cst_58 : f32 to vector<32x2xf32>
    %116 = arith.addf %115, %114 : vector<32x2xf32>
    %117 = arith.mulf %111, %116 : vector<32x2xf32>
    %118 = vector.shape_cast %117 : vector<32x2xf32> to vector<32x1x2xf32>
    %119 = vector.broadcast %118 : vector<32x1x2xf32> to vector<32x5x2xf32>
    %120 = arith.mulf %1, %119 : vector<32x5x2xf32>
    %cst_59 = arith.constant dense<0.000000e+00> : vector<5x2xf32>
    %121 = vector.multi_reduction <add>, %120, %cst_59 [0] : vector<32x5x2xf32> to vector<5x2xf32>
    %122 = arith.maximumf %16, %31 : vector<5x2xf32>
    %123 = arith.maximumf %122, %46 : vector<5x2xf32>
    %124 = arith.maximumf %123, %61 : vector<5x2xf32>
    %125 = arith.maximumf %124, %76 : vector<5x2xf32>
    %126 = arith.maximumf %125, %91 : vector<5x2xf32>
    %127 = arith.maximumf %126, %106 : vector<5x2xf32>
    %128 = arith.maximumf %127, %121 : vector<5x2xf32>
    %cst_60 = arith.constant 0.000000e+00 : f32
    %129 = vector.broadcast %cst_60 : f32 to vector<5x2xf32>
    %cst_61 = arith.constant 0.000000e+00 : f32
    %130 = vector.broadcast %cst_61 : f32 to vector<5x2xf32>
    %131 = arith.subf %16, %128 : vector<5x2xf32>
    %132 = math.exp %131 : vector<5x2xf32>
    %133 = arith.addf %129, %132 : vector<5x2xf32>
    %c0_62 = arith.constant 0 : index
    %c0_63 = arith.constant 0 : index
    %c0_64 = arith.constant 0 : index
    %134 = vector.load %arg4[%c0_62, %c0_63, %c0_64] : memref<8x5x2xf32, #tpu.memory_space<vmem>>, vector<1x5x2xf32>
    %135 = vector.shape_cast %134 : vector<1x5x2xf32> to vector<5x2xf32>
    %136 = arith.mulf %132, %135 : vector<5x2xf32>
    %137 = arith.addf %130, %136 : vector<5x2xf32>
    %138 = arith.subf %31, %128 : vector<5x2xf32>
    %139 = math.exp %138 : vector<5x2xf32>
    %140 = arith.addf %133, %139 : vector<5x2xf32>
    %c1_65 = arith.constant 1 : index
    %c0_66 = arith.constant 0 : index
    %c0_67 = arith.constant 0 : index
    %141 = vector.load %arg4[%c1_65, %c0_66, %c0_67] : memref<8x5x2xf32, #tpu.memory_space<vmem>>, vector<1x5x2xf32>
    %142 = vector.shape_cast %141 : vector<1x5x2xf32> to vector<5x2xf32>
    %143 = arith.mulf %139, %142 : vector<5x2xf32>
    %144 = arith.addf %137, %143 : vector<5x2xf32>
    %145 = arith.subf %46, %128 : vector<5x2xf32>
    %146 = math.exp %145 : vector<5x2xf32>
    %147 = arith.addf %140, %146 : vector<5x2xf32>
    %c2_68 = arith.constant 2 : index
    %c0_69 = arith.constant 0 : index
    %c0_70 = arith.constant 0 : index
    %148 = vector.load %arg4[%c2_68, %c0_69, %c0_70] : memref<8x5x2xf32, #tpu.memory_space<vmem>>, vector<1x5x2xf32>
    %149 = vector.shape_cast %148 : vector<1x5x2xf32> to vector<5x2xf32>
    %150 = arith.mulf %146, %149 : vector<5x2xf32>
    %151 = arith.addf %144, %150 : vector<5x2xf32>
    %152 = arith.subf %61, %128 : vector<5x2xf32>
    %153 = math.exp %152 : vector<5x2xf32>
    %154 = arith.addf %147, %153 : vector<5x2xf32>
    %c3_71 = arith.constant 3 : index
    %c0_72 = arith.constant 0 : index
    %c0_73 = arith.constant 0 : index
    %155 = vector.load %arg4[%c3_71, %c0_72, %c0_73] : memref<8x5x2xf32, #tpu.memory_space<vmem>>, vector<1x5x2xf32>
    %156 = vector.shape_cast %155 : vector<1x5x2xf32> to vector<5x2xf32>
    %157 = arith.mulf %153, %156 : vector<5x2xf32>
    %158 = arith.addf %151, %157 : vector<5x2xf32>
    %159 = arith.subf %76, %128 : vector<5x2xf32>
    %160 = math.exp %159 : vector<5x2xf32>
    %161 = arith.addf %154, %160 : vector<5x2xf32>
    %c4_74 = arith.constant 4 : index
    %c0_75 = arith.constant 0 : index
    %c0_76 = arith.constant 0 : index
    %162 = vector.load %arg4[%c4_74, %c0_75, %c0_76] : memref<8x5x2xf32, #tpu.memory_space<vmem>>, vector<1x5x2xf32>
    %163 = vector.shape_cast %162 : vector<1x5x2xf32> to vector<5x2xf32>
    %164 = arith.mulf %160, %163 : vector<5x2xf32>
    %165 = arith.addf %158, %164 : vector<5x2xf32>
    %166 = arith.subf %91, %128 : vector<5x2xf32>
    %167 = math.exp %166 : vector<5x2xf32>
    %168 = arith.addf %161, %167 : vector<5x2xf32>
    %c5_77 = arith.constant 5 : index
    %c0_78 = arith.constant 0 : index
    %c0_79 = arith.constant 0 : index
    %169 = vector.load %arg4[%c5_77, %c0_78, %c0_79] : memref<8x5x2xf32, #tpu.memory_space<vmem>>, vector<1x5x2xf32>
    %170 = vector.shape_cast %169 : vector<1x5x2xf32> to vector<5x2xf32>
    %171 = arith.mulf %167, %170 : vector<5x2xf32>
    %172 = arith.addf %165, %171 : vector<5x2xf32>
    %173 = arith.subf %106, %128 : vector<5x2xf32>
    %174 = math.exp %173 : vector<5x2xf32>
    %175 = arith.addf %168, %174 : vector<5x2xf32>
    %c6_80 = arith.constant 6 : index
    %c0_81 = arith.constant 0 : index
    %c0_82 = arith.constant 0 : index
    %176 = vector.load %arg4[%c6_80, %c0_81, %c0_82] : memref<8x5x2xf32, #tpu.memory_space<vmem>>, vector<1x5x2xf32>
    %177 = vector.shape_cast %176 : vector<1x5x2xf32> to vector<5x2xf32>
    %178 = arith.mulf %174, %177 : vector<5x2xf32>
    %179 = arith.addf %172, %178 : vector<5x2xf32>
    %180 = arith.subf %121, %128 : vector<5x2xf32>
    %181 = math.exp %180 : vector<5x2xf32>
    %182 = arith.addf %175, %181 : vector<5x2xf32>
    %c7_83 = arith.constant 7 : index
    %c0_84 = arith.constant 0 : index
    %c0_85 = arith.constant 0 : index
    %183 = vector.load %arg4[%c7_83, %c0_84, %c0_85] : memref<8x5x2xf32, #tpu.memory_space<vmem>>, vector<1x5x2xf32>
    %184 = vector.shape_cast %183 : vector<1x5x2xf32> to vector<5x2xf32>
    %185 = arith.mulf %181, %184 : vector<5x2xf32>
    %186 = arith.addf %179, %185 : vector<5x2xf32>
    %187 = tpu.reciprocal %182 : vector<5x2xf32> -> vector<5x2xf32>
    %188 = arith.mulf %186, %187 : vector<5x2xf32>
    %c0_86 = arith.constant 0 : index
    %c0_87 = arith.constant 0 : index
    %189 = vector.load %arg5[%c0_86, %c0_87] : memref<5x2xf32, #tpu.memory_space<vmem>>, vector<5x2xf32>
    tpu.vector_store %arg5[%c0_86, %c0_87], %188 {strides = array<i32>} : memref<5x2xf32, #tpu.memory_space<vmem>>, vector<5x2xf32>,
    return
  }
  func.func @transform_0(%arg0: i32) -> (i32, i32) {
    %c0_i32 = arith.constant 0 : i32
    %c0_i32_0 = arith.constant 0 : i32
    %c0_i32_1 = arith.constant 0 : i32
    return %c0_i32, %c0_i32_0 : i32, i32
  }
  func.func @transform_1(%arg0: i32) -> (i32, i32, i32) {
    %c0_i32 = arith.constant 0 : i32
    %c0_i32_0 = arith.constant 0 : i32
    %c0_i32_1 = arith.constant 0 : i32
    return %c0_i32, %c0_i32_0, %arg0 : i32, i32, i32
  }
  func.func @transform_2(%arg0: i32) -> (i32, i32, i32) {
    %c0_i32 = arith.constant 0 : i32
    %c0_i32_0 = arith.constant 0 : i32
    %c0_i32_1 = arith.constant 0 : i32
    return %c0_i32, %c0_i32_0, %arg0 : i32, i32, i32
  }
  func.func @transform_3(%arg0: i32) -> (i32, i32, i32) {
    %c0_i32 = arith.constant 0 : i32
    %c0_i32_0 = arith.constant 0 : i32
    %c0_i32_1 = arith.constant 0 : i32
    return %c0_i32, %c0_i32_0, %arg0 : i32, i32, i32
  }
  func.func @transform_4(%arg0: i32) -> (i32, i32) {
    %c0_i32 = arith.constant 0 : i32
    %c0_i32_0 = arith.constant 0 : i32
    return %c0_i32, %arg0 : i32, i32
  }
}

</mosaic_0001>

<bundles_post_ra>
// kernel: tpu_custom_call.1
= control target key start
LH: loop header
LB: loop body
LE: loop exit
PB: predicated region body
PF: predicated region fallthrough
CT: control target
= control target key end

     0   :  { %vm57_vm0 = vcmask 261120   ;;  %v5035_v46 = vmov 1966171168   ;;  %v183_v48 = vlaneseq  ;;  %vm567_vm1 = vcmask 12288   ;;  %s7108_s1 = inlined_call_operand.vmem [shape: f32[8,32,2], index: 1, kind: input, shape index: {}]   ;;  %s7109_s0 = inlined_call_operand.vmem [shape: f32[32,32], index: 0, kind: input, shape index: {}]   ;;  %s7110_s2 = inlined_call_operand.vmem [shape: f32[32,5,2], index: 2, kind: input, shape index: {}]   ;;  %s7111_s3 = inlined_call_operand.vmem [shape: f32[8,5,2], index: 3, kind: input, shape index: {}]   ;;  %s7112_s4 = inlined_call_operand.vmem [shape: f32[5,2], index: 4, kind: output, shape index: {}]  }
   0x1   :  { %v56_v0 = vld [vmem:[%s7108_s1 + $0x18] sm:$0xff]  ;;  %v55_v2 = vld [vmem:[%s7108_s1 + $0x10] sm:$0xff]  ;;  %v54_v4 = vld [vmem:[%s7108_s1 + $0x8] sm:$0xff]  ;;  %v181_v47 = vunpack.c.l.s4 %v5035_v46 }
   0x2   :  { %v4670_v1 = vld [vmem:[%s7108_s1 + $0x38] sm:$0xff]  ;;  %4794 = vmatprep.subr.mxu0 %v56_v0  ;;  %v4669_v3 = vld [vmem:[%s7108_s1 + $0x30] sm:$0xff]  ;;  %v4668_v5 = vld [vmem:[%s7108_s1 + $0x28] sm:$0xff]  ;;  %v184_v53 = vshrl.u32 %v183_v48, 7 }
   0x3   :  { %4808 = vmatprep.subr.mxu1 %v4670_v1  ;;  %4795 = vmatpush3.msra.mxu0 %v56_v0  ;;  %v53_v6 = vld [vmem:[%s7108_s1] sm:$0xff]  ;;  %v5093_v9 = vld [vmem:[%s7109_s0 + $0x8] sm:$0xff]  ;;  %v4678_v10 = vld [vmem:[%s7108_s1 + $0x58] sm:$0xff]  ;;  %v182_v52 = vunpack.c.0.s8 %v181_v47 }
   0x4   :  { %4809 = vmatpush3.msra.mxu1 %v4670_v1  ;;  %4796 = vmatprep.subr.mxu0 %v55_v2  ;;  %v4667_v7 = vld [vmem:[%s7108_s1 + $0x20] sm:$0xff]  ;;  %v4686_v11 = vld [vmem:[%s7108_s1 + $0x78] sm:$0xff]  ;;  %v4677_v12 = vld [vmem:[%s7108_s1 + $0x50] sm:$0xff]  ;;  %v5243_v0 = vsub.s32 0, %v184_v53 }
   0x5   :  { %4810 = vmatprep.subr.mxu1 %v4669_v3  ;;  %4797 = vmatpush3.msra.mxu0 %v55_v2  ;;  %v5088_v8 = vld [vmem:[%s7109_s0] sm:$0xff]  ;;  %v4685_v13 = vld [vmem:[%s7108_s1 + $0x70] sm:$0xff]  ;;  %v5123_v15 = vld [vmem:[%s7109_s0 + $0x18] sm:$0xff]  ;;  %v5241_v63 = vsub.s32 %v182_v52, %v184_v53 }
   0x6   :  { %4811 = vmatpush3.msra.mxu1 %v4669_v3  ;;  %4798 = vmatprep.subr.mxu0 %v54_v4  ;;  %v5118_v14 = vld [vmem:[%s7109_s0 + $0x10] sm:$0xff]  ;;  %v4676_v16 = vld [vmem:[%s7108_s1 + $0x48] sm:$0xff]  ;;  %v4675_v18 = vld [vmem:[%s7108_s1 + $0x40] sm:$0xff] }
   0x7   :  { %4812 = vmatprep.subr.mxu1 %v4668_v5  ;;  %4799 = vmatpush3.msra.mxu0 %v54_v4  ;;  %v4684_v17 = vld [vmem:[%s7108_s1 + $0x68] sm:$0xff]  ;;  %v4683_v19 = vld [vmem:[%s7108_s1 + $0x60] sm:$0xff]  ;;  %v4694_v20 = vld [vmem:[%s7108_s1 + $0x98] sm:$0xff] }
   0x8   :  { %4813 = vmatpush3.msra.mxu1 %v4668_v5  ;;  %4800 = vmatprep.subr.mxu0 %v53_v6  ;;  %v4702_v21 = vld [vmem:[%s7108_s1 + $0xb8] sm:$0xff]  ;;  %v4693_v22 = vld [vmem:[%s7108_s1 + $0x90] sm:$0xff]  ;;  %v4692_v24 = vld [vmem:[%s7108_s1 + $0x88] sm:$0xff] }
   0x9   :  { %4814 = vmatprep.subr.mxu1 %v4667_v7  ;;  %4801 = vmatpush3.msra.mxu0 %v53_v6  ;;  %v4701_v23 = vld [vmem:[%s7108_s1 + $0xb0] sm:$0xff]  ;;  %v4700_v25 = vld [vmem:[%s7108_s1 + $0xa8] sm:$0xff]  ;;  %v4691_v26 = vld [vmem:[%s7108_s1 + $0x80] sm:$0xff] }
   0xa   :  { %4802 = vmatprep.mubr.msk.f32.mxu0 %vm57_vm0, %v5088_v8  ;;  %4815 = vmatpush3.msra.mxu1 %v4667_v7  ;;  %v4699_v27 = vld [vmem:[%s7108_s1 + $0xa0] sm:$0xff]  ;;  %v4710_v28 = vld [vmem:[%s7108_s1 + $0xd8] sm:$0xff]  ;;  %v4709_v30 = vld [vmem:[%s7108_s1 + $0xd0] sm:$0xff] }
   0xb   :  { %4816 = vmatprep.mubr.msk.f32.mxu1 %vm57_vm0, %v5088_v8  ;;  %4803 = vmatmul.mubr.msk.f32.vlgmr.msra.gmra.mxu0 %vm57_vm0, %v5093_v9  ;;  %v4718_v29 = vld [vmem:[%s7108_s1 + $0xf8] sm:$0xff]  ;;  %v4717_v31 = vld [vmem:[%s7108_s1 + $0xf0] sm:$0xff]  ;;  %v4708_v32 = vld [vmem:[%s7108_s1 + $0xc8] sm:$0xff] }
   0xc   :  { %4817 = vmatmul.mubr.msk.f32.vlgmr.msra.gmra.mxu1 %vm57_vm0, %v5093_v9  ;;  %4822 = vmatprep.subr.mxu0 %v4678_v10  ;;  %v4716_v33 = vld [vmem:[%s7108_s1 + $0xe8] sm:$0xff]  ;;  %v4707_v34 = vld [vmem:[%s7108_s1 + $0xc0] sm:$0xff] }
   0xd   :  { %4836 = vmatprep.subr.mxu1 %v4686_v11  ;;  %4823 = vmatpush3.msra.mxu0 %v4678_v10  ;;  %v4715_v35 = vld [vmem:[%s7108_s1 + $0xe0] sm:$0xff]  ;;  %v5289_v48 = vld [vmem:[%s7110_s2 + $0x8] sm:$0x1f] }
   0xe   :  { %4837 = vmatpush3.msra.mxu1 %v4686_v11  ;;  %4824 = vmatprep.subr.mxu0 %v4677_v12  ;;  %7154 = vst [vmem:[#allocation4_spill] sm:$0xff] %v5289_v48 }
   0xf   :  { %4838 = vmatprep.subr.mxu1 %v4685_v13  ;;  %4805 = vmatprep.mubr.msk.f32.mxu0 %vm57_vm0, %v5118_v14 }
  0x10   :  { %4819 = vmatprep.mubr.msk.f32.mxu1 %vm57_vm0, %v5118_v14  ;;  %4825 = vmatpush3.msra.mxu0 %v4677_v12 }
  0x11   :  { %4839 = vmatpush3.msra.mxu1 %v4685_v13  ;;  %4806 = vmatmul.mubr.msk.f32.gmra.mxu0 %vm57_vm0, %v5123_v15 }
  0x12   :  { %4820 = vmatmul.mubr.msk.f32.gmra.mxu1 %vm57_vm0, %v5123_v15  ;;  %4826 = vmatprep.subr.mxu0 %v4676_v16 }
  0x13   :  { %4840 = vmatprep.subr.mxu1 %v4684_v17  ;;  %4827 = vmatpush3.msra.mxu0 %v4676_v16 }
  0x14   :  { %4841 = vmatpush3.msra.mxu1 %v4684_v17  ;;  %4828 = vmatprep.subr.mxu0 %v4675_v18 }
  0x15   :  { %4842 = vmatprep.subr.mxu1 %v4683_v19  ;;  %4829 = vmatpush3.msra.mxu0 %v4675_v18 }
  0x16   :  { %4830 = vmatprep.mubr.msk.f32.mxu0 %vm57_vm0, %v5088_v8  ;;  %4843 = vmatpush3.msra.mxu1 %v4683_v19 }
  0x17   :  { %4844 = vmatprep.mubr.msk.f32.mxu1 %vm57_vm0, %v5088_v8  ;;  %4831 = vmatmul.mubr.msk.f32.vlgmr.msra.gmra.mxu0 %vm57_vm0, %v5093_v9 }
  0x18   :  { %4845 = vmatmul.mubr.msk.f32.vlgmr.msra.gmra.mxu1 %vm57_vm0, %v5093_v9  ;;  %4850 = vmatprep.subr.mxu0 %v4694_v20 }
  0x19   :  { %4864 = vmatprep.subr.mxu1 %v4702_v21  ;;  %4851 = vmatpush3.msra.mxu0 %v4694_v20 }
  0x1a   :  { %4865 = vmatpush3.msra.mxu1 %v4702_v21  ;;  %4852 = vmatprep.subr.mxu0 %v4693_v22 }
  0x1b   :  { %4866 = vmatprep.subr.mxu1 %v4701_v23  ;;  %4833 = vmatprep.mubr.msk.f32.mxu0 %vm57_vm0, %v5118_v14 }
  0x1c   :  { %4847 = vmatprep.mubr.msk.f32.mxu1 %vm57_vm0, %v5118_v14  ;;  %4853 = vmatpush3.msra.mxu0 %v4693_v22 }
  0x1d   :  { %4867 = vmatpush3.msra.mxu1 %v4701_v23  ;;  %4834 = vmatmul.mubr.msk.f32.gmra.mxu0 %vm57_vm0, %v5123_v15 }
  0x1e   :  { %4848 = vmatmul.mubr.msk.f32.gmra.mxu1 %vm57_vm0, %v5123_v15  ;;  %4854 = vmatprep.subr.mxu0 %v4692_v24 }
  0x1f   :  { %4868 = vmatprep.subr.mxu1 %v4700_v25  ;;  %4855 = vmatpush3.msra.mxu0 %v4692_v24 }
  0x20   :  { %4869 = vmatpush3.msra.mxu1 %v4700_v25  ;;  %4856 = vmatprep.subr.mxu0 %v4691_v26 }
  0x21   :  { %4870 = vmatprep.subr.mxu1 %v4699_v27  ;;  %4857 = vmatpush3.msra.mxu0 %v4691_v26 }
  0x22   :  { %4858 = vmatprep.mubr.msk.f32.mxu0 %vm57_vm0, %v5088_v8  ;;  %4871 = vmatpush3.msra.mxu1 %v4699_v27 }
  0x23   :  { %4872 = vmatprep.mubr.msk.f32.mxu1 %vm57_vm0, %v5088_v8  ;;  %4859 = vmatmul.mubr.msk.f32.vlgmr.msra.gmra.mxu0 %vm57_vm0, %v5093_v9 }
  0x24   :  { %4873 = vmatmul.mubr.msk.f32.vlgmr.msra.gmra.mxu1 %vm57_vm0, %v5093_v9  ;;  %4878 = vmatprep.subr.mxu0 %v4710_v28 }
  0x25   :  { %4892 = vmatprep.subr.mxu1 %v4718_v29  ;;  %4879 = vmatpush3.msra.mxu0 %v4710_v28 }
  0x26   :  { %4893 = vmatpush3.msra.mxu1 %v4718_v29  ;;  %4880 = vmatprep.subr.mxu0 %v4709_v30 }
  0x27   :  { %4894 = vmatprep.subr.mxu1 %v4717_v31  ;;  %4861 = vmatprep.mubr.msk.f32.mxu0 %vm57_vm0, %v5118_v14 }
  0x28   :  { %4875 = vmatprep.mubr.msk.f32.mxu1 %vm57_vm0, %v5118_v14  ;;  %4881 = vmatpush3.msra.mxu0 %v4709_v30 }
  0x29   :  { %4895 = vmatpush3.msra.mxu1 %v4717_v31  ;;  %4862 = vmatmul.mubr.msk.f32.gmra.mxu0 %vm57_vm0, %v5123_v15 }
  0x2a   :  { %4876 = vmatmul.mubr.msk.f32.gmra.mxu1 %vm57_vm0, %v5123_v15  ;;  %4882 = vmatprep.subr.mxu0 %v4708_v32 }
  0x2b   :  { %4896 = vmatprep.subr.mxu1 %v4716_v33  ;;  %4883 = vmatpush3.msra.mxu0 %v4708_v32 }
  0x2c   :  { %4897 = vmatpush3.msra.mxu1 %v4716_v33  ;;  %4884 = vmatprep.subr.mxu0 %v4707_v34 }
  0x2d   :  { %4898 = vmatprep.subr.mxu1 %v4715_v35  ;;  %4885 = vmatpush3.msra.mxu0 %v4707_v34 }
  0x2e   :  { %4886 = vmatprep.mubr.msk.f32.mxu0 %vm57_vm0, %v5088_v8  ;;  %4899 = vmatpush3.msra.mxu1 %v4715_v35 }
  0x2f   :  { %4900 = vmatprep.mubr.msk.f32.mxu1 %vm57_vm0, %v5088_v8  ;;  %4887 = vmatmul.mubr.msk.f32.vlgmr.msra.gmra.mxu0 %vm57_vm0, %v5093_v9 }
  0x30   :  { %4901 = vmatmul.mubr.msk.f32.vlgmr.msra.gmra.mxu1 %vm57_vm0, %v5093_v9  ;;  %4889 = vmatprep.mubr.msk.f32.mxu0 %vm57_vm0, %v5118_v14 }
  0x31   :  { %4903 = vmatprep.mubr.msk.f32.mxu1 %vm57_vm0, %v5118_v14 }
  0x33   :  { %4890 = vmatmul.mubr.msk.f32.gmra.mxu0 %vm57_vm0, %v5123_v15 }
  0x34   :  { %4904 = vmatmul.mubr.msk.f32.gmra.mxu1 %vm57_vm0, %v5123_v15 }
  0xcb   :  { %v4804_v36 = vpop.f32.mrf.mxu0 }
  0xcc   :  { %v4818_v38 = vpop.f32.mrf.mxu1  ;;  %v160_v40 = vmul.f32 0.70710677, %v4804_v36  ;;  %v156_v4 = vmul.f32 0.5, %v4804_v36 }
  0xcd   :  { %v136_v37 = vpop.f32.mrf.mxu0  ;;  %v726_v42 = vmul.f32 0.70710677, %v4818_v38  ;;  %v722_v7 = vmul.f32 0.5, %v4818_v38 }
  0xce   :  { %v159_v39 = vmul.f32 0.70710677, %v136_v37  ;;  %v702_v41 = vpop.f32.mrf.mxu1  ;;  %v155_v60 = vmul.f32 0.5, %v136_v37 }
  0xcf   :  { %v725_v43 = vmul.f32 0.70710677, %v702_v41  ;;  %v721_v8 = vmul.f32 0.5, %v702_v41  ;;  %v5274_v41 = vld [vmem:[%s7110_s2] sm:$0x1f] }
  0xd0   :  { %4907 = verf.f32 %v159_v39 }
  0xd1   :  { %4909 = verf.f32 %v160_v40  ;;  %v4807_v44 = vpop.f32.mrf.mxu0 }
  0xd2   :  { %4911 = verf.f32 %v726_v42  ;;  %v4821_v45 = vpop.f32.mrf.mxu1  ;;  %v162_v56 = vmul.f32 0.70710677, %v4807_v44  ;;  %v5245_v12 = vmul.f32 0.5, %v4807_v44 }
  0xd3   :  { %4913 = verf.f32 %v725_v43  ;;  %v146_v49 = vpop.f32.mrf.mxu0  ;;  %v728_v58 = vmul.f32 0.70710677, %v4821_v45  ;;  %v5247_v15 = vmul.f32 0.5, %v4821_v45 }
  0xd4   :  { %v712_v51 = vpop.f32.mrf.mxu1  ;;  %v161_v61 = vmul.f32 0.70710677, %v146_v49  ;;  %4915 = verf.f32 %v162_v56  ;;  %v5250_v22 = vmul.f32 0.5, %v146_v49  ;;  %v5294_v49 = vld [vmem:[%s7110_s2 + $0x10] sm:$0x1f] }
  0xd5   :  { %v727_v1 = vmul.f32 0.70710677, %v712_v51  ;;  %4917 = verf.f32 %v728_v58  ;;  %v5252_v23 = vmul.f32 0.5, %v712_v51  ;;  %7155 = vst [vmem:[#allocation5_spill] sm:$0xff] %v5294_v49 }
  0xd6   :  { %4919 = verf.f32 %v161_v61 }
  0xd7   :  { %v4832_v54 = vpop.f32.mrf.mxu0  ;;  %4921 = verf.f32 %v727_v1 }
  0xd8   :  { %v4846_v59 = vpop.f32.mrf.mxu1  ;;  %v1291_v9 = vmul.f32 0.70710677, %v4832_v54  ;;  %v5254_v24 = vmul.f32 0.5, %v4832_v54 }
  0xd9   :  { %v1267_v2 = vpop.f32.mrf.mxu0  ;;  %v1856_v13 = vmul.f32 0.70710677, %v4846_v59  ;;  %v5256_v26 = vmul.f32 0.5, %v4846_v59 }
  0xda   :  { %v1832_v10 = vpop.f32.mrf.mxu1  ;;  %v1290_v16 = vmul.f32 0.70710677, %v1267_v2  ;;  %4923 = verf.f32 %v1291_v9  ;;  %v5260_v30 = vmul.f32 0.5, %v1267_v2  ;;  %v5318_v2 = vld [vmem:[%s7110_s2 + $0x18] sm:$0x1f] }
  0xdb   :  { %v1855_v21 = vmul.f32 0.70710677, %v1832_v10  ;;  %4925 = verf.f32 %v1856_v13  ;;  %v5262_v31 = vmul.f32 0.5, %v1832_v10  ;;  %7156 = vst [vmem:[#allocation6_spill] sm:$0xff] %v5318_v2 }
  0xdc   :  { %4927 = verf.f32 %v1290_v16 }
  0xdd   :  { %v4908_v50 = vpop.eup %4907  ;;  %v4835_v17 = vpop.f32.mrf.mxu0  ;;  %4929 = verf.f32 %v1855_v21 }
  0xde   :  { %v167_v55 = vadd.f32 1.0, %v4908_v50  ;;  %v4910_v57 = vpop.eup %4909  ;;  %v1293_v27 = vmul.f32 0.70710677, %v4835_v17  ;;  %v4849_v28 = vpop.f32.mrf.mxu1  ;;  %v5266_v36 = vmul.f32 0.5, %v4835_v17 }
  0xdf   :  { %v4912_v62 = vpop.eup %4911  ;;  %v168_v5 = vadd.f32 1.0, %v4910_v57  ;;  %v5268_v37 = vmul.f32 0.5, %v4849_v28  ;;  %v1858_v38 = vmul.f32 0.70710677, %v4849_v28 }
  0xe0   :  { %v4914_v3 = vpop.eup %4913  ;;  %v171_v6 = vmul.f32 %v167_v55, %v155_v60  ;;  %v734_v11 = vadd.f32 1.0, %v4912_v62  ;;  %7152 = vst [vmem:[#allocation2_spill] sm:$0xff] %v5266_v36  ;;  %4931 = verf.f32 %v1293_v27 }
  0xe1   :  { %v733_v14 = vadd.f32 1.0, %v4914_v3  ;;  %v172_v18 = vmul.f32 %v168_v5, %v156_v4  ;;  %7153 = vst [vmem:[#allocation3_spill] sm:$0xff] %v5268_v37  ;;  %v5297_v53 = vpop.eup %4915  ;;  %4933 = verf.f32 %v1858_v38 }
  0xe2   :  { %v179_v19 = vcombine.high %v171_v6, %v171_v6  ;;  %v186_v20 = vrot.slane %v171_v6, %v5241_v63  ;;  %v738_v25 = vmul.f32 %v734_v11, %v722_v7  ;;  %v5302_v57 = vpop.eup %4917 }
  0xe3   :  { %v5258_v29 = vmul.f32 %v733_v14, %v721_v8  ;;  %v228_v32 = vcombine.high %v172_v18, %v172_v18  ;;  %v235_v39 = vrot.slane %v172_v18, %v5241_v63  ;;  %v5311_v62 = vpop.eup %4919 }
  0xe4   :  { %v193_v33 = vrot.slane %v179_v19, %v5241_v63  ;;  %v194_v34 = vcombine.high %v186_v20, %v186_v20  ;;  %v202_v35 = vrot.slane %v186_v20, %v5241_v63  ;;  %v794_v40 = vcombine.high %v738_v25, %v738_v25  ;;  %v5322_v6 = vpop.eup %4921  ;;  %v5351_v20 = vld [vmem:[%s7110_s2 + $0x20] sm:$0x1f] }
  0xe5   :  { %v5278_v43 = vrot.slane %v738_v25, %v5241_v63  ;;  %v752_v46 = vrot.slane %v5258_v29, %v5241_v63  ;;  %v5284_v47 = vrot.slane %v228_v32, %v5241_v63  ;;  %v243_v58 = vcombine.high %v235_v39, %v235_v39 }
  0xe6   :  { %v216_v42 = vrot.slane %v194_v34, %v5241_v63  ;;  %v224_v44 = vcombine.high %v202_v35, %v202_v35  ;;  %v378_v45 = vrot.slane %v202_v35, %v5243_v0  ;;  %v195_v50 = vcombine.high %v193_v33, %v193_v33 }
  0xe7   :  { %v209_v54 = vrot.slane %v193_v33, %v5241_v63  ;;  %v5305_v59 = vrot.slane %v235_v39, %v5241_v63  ;;  %v5308_v60 = vrot.slane %v794_v40, %v5241_v63  ;;  %v809_v1 = vcombine.high %v5278_v43, %v5278_v43  ;;  %v5339_v17 = vpop.eup %4923 }
  0xe8   :  { %v226_v51 = vcombine.high %v216_v42, %v216_v42  ;;  %v382_v52 = vrot.slane %v216_v42, %v5243_v0  ;;  %v386_v55 = vrot.slane %v224_v44, %v5243_v0  ;;  %v535_v56 = vmul.f32 %v378_v45, %v5274_v41  ;;  %v5354_v27 = vpop.eup %4925 }
  0xe9   :  { %v760_v5 = vcombine.high %v752_v46, %v752_v46  ;;  %v244_v7 = vcombine.high %v5284_v47, %v5284_v47  ;;  %v5328_v8 = vrot.slane %v5278_v43, %v5241_v63  ;;  %v5331_v9 = vrot.slane %v195_v50, %v5241_v63  ;;  %v5362_v34 = vpop.eup %4927  ;;  %v5377_v50 = vld [vmem:[%s7110_s2 + $0x28] sm:$0x1f] }
  0xea   :  { %v390_v61 = vrot.slane %v226_v51, %v5243_v0  ;;  %v536_v3 = vmul.f32 %v382_v52, %v5289_v48  ;;  %v537_v4 = vmul.f32 %v386_v55, %v5294_v49  ;;  %v745_v10 = vcombine.high %v5258_v29, %v5258_v29  ;;  %v5366_v42 = vpop.eup %4929 }
  0xeb   :  { %v394_v11 = vrot.slane %v209_v54, %v5243_v0  ;;  %v568_v13 = vsel %vm567_vm1, %v535_v56, 0.0  ;;  %v768_v16 = vrot.slane %v752_v46, %v5241_v63  ;;  %v5343_v18 = vrot.slane %v5284_v47, %v5241_v63 }
  0xec   :  { %v569_v14 = vsel %vm567_vm1, %v536_v3, 0.0  ;;  %v5346_v19 = vrot.slane %v243_v58, %v5241_v63  ;;  %v538_v21 = vmul.f32 %v390_v61, %v5318_v2  ;;  %v273_v28 = vcombine.high %v5305_v59, %v5305_v59 }
  0xed   :  { %v570_v25 = vadd.f32 %v569_v14, %v568_v13  ;;  %v410_v29 = vrot.slane %v5305_v59, %v5243_v0  ;;  %v571_v32 = vsel %vm567_vm1, %v537_v4, 0.0  ;;  %v782_v33 = vrot.slane %v760_v5, %v5241_v63  ;;  %v5381_v55 = vpop.eup %4931 }
  0xee   :  { %v759_v38 = vrot.slane %v745_v10, %v5241_v63  ;;  %v790_v39 = vcombine.high %v768_v16, %v768_v16  ;;  %v944_v40 = vrot.slane %v768_v16, %v5243_v0  ;;  %v225_v43 = vcombine.high %v209_v54, %v209_v54 }
  0xef   :  { %v572_v35 = vadd.f32 %v571_v32, %v570_v25  ;;  %v398_v44 = vrot.slane %v5331_v9, %v5243_v0  ;;  %v539_v45 = vmul.f32 %v394_v11, %v5351_v20  ;;  %v948_v46 = vrot.slane %v782_v33, %v5243_v0  ;;  %v5398_v11 = vld [vmem:[%s7110_s2 + $0x40] sm:$0x1f] }
  0xf0   :  { %v810_v47 = vcombine.high %v5308_v60, %v5308_v60  ;;  %v573_v51 = vsel %vm567_vm1, %v538_v21, 0.0  ;;  %v792_v52 = vcombine.high %v782_v33, %v782_v33  ;;  %v952_v54 = vrot.slane %v790_v39, %v5243_v0 }
  0xf1   :  { %v5385_v56 = vrot.slane %v5308_v60, %v5241_v63  ;;  %v5388_v58 = vrot.slane %v809_v1, %v5241_v63  ;;  %v574_v59 = vadd.f32 %v573_v51, %v572_v35  ;;  %v1101_v61 = vmul.f32 %v944_v40, %v5274_v41  ;;  %v5433_v51 = vld [vmem:[%s7110_s2 + $0x50] sm:$0x1f] }
  0xf2   :  { %v272_v3 = vrot.slane %v244_v7, %v5241_v63  ;;  %v227_v4 = vcombine.high %v5331_v9, %v5331_v9  ;;  %v761_v5 = vcombine.high %v759_v38, %v759_v38  ;;  %v1102_v10 = vmul.f32 %v948_v46, %v5289_v48  ;;  %v5404_v7 = vpop.eup %4933  ;;  %v5409_v9 = vld [vmem:[%s7110_s2 + $0x30] sm:$0x1f]  ;;  %v5428_v46 = vld [vmem:[%s7110_s2 + $0x48] sm:$0x1f]  ;;  %7158 = vst [vmem:[#allocation8_spill] sm:$0xff] %v5433_v51 }
  0xf3   :  { %v402_v60 = vrot.slane %v225_v43, %v5243_v0  ;;  %v540_v1 = vmul.f32 %v398_v44, %v5377_v50  ;;  %v575_v13 = vsel %vm567_vm1, %v539_v45, 0.0  ;;  %v775_v14 = vrot.slane %v759_v38, %v5241_v63  ;;  %7157 = vst [vmem:[#allocation7_spill] sm:$0xff] %v5404_v7 }
  0xf4   :  { %v956_v16 = vrot.slane %v792_v52, %v5243_v0  ;;  %v1103_v21 = vmul.f32 %v952_v54, %v5294_v49  ;;  %v1133_v25 = vsel %vm567_vm1, %v1101_v61, 0.0  ;;  %v1134_v32 = vsel %vm567_vm1, %v1102_v10, 0.0 }
  0xf5   :  { %v274_v33 = vcombine.high %v5343_v18, %v5343_v18  ;;  %v275_v35 = vcombine.high %v5346_v19, %v5346_v19  ;;  %v576_v38 = vadd.f32 %v575_v13, %v574_v59  ;;  %v1135_v39 = vadd.f32 %v1134_v32, %v1133_v25  ;;  %v5459_v32 = vld [vmem:[%s7110_s2 + $0x58] sm:$0x1f] }
  0xf6   :  { %v414_v40 = vrot.slane %v5346_v19, %v5243_v0  ;;  %v418_v43 = vrot.slane %v273_v28, %v5243_v0  ;;  %v426_v44 = vrot.slane %v5343_v18, %v5243_v0  ;;  %v543_v45 = vmul.f32 %v410_v29, %v5398_v11  ;;  %v5441_v18 = vld [vmem:[%s7110_s2 + $0x60] sm:$0x1f]  ;;  %v5446_v29 = vld [vmem:[%s7110_s2 + $0x38] sm:$0x1f]  ;;  %7160 = vst [vmem:[#allocation10_spill] sm:$0xff] %v5459_v32 }
  0xf7   :  { %v276_v52 = vcombine.high %v272_v3, %v272_v3  ;;  %v406_v19 = vrot.slane %v227_v4, %v5243_v0  ;;  %v541_v28 = vmul.f32 %v402_v60, %v5409_v9  ;;  %v577_v54 = vsel %vm567_vm1, %v540_v1, 0.0  ;;  %7159 = vst [vmem:[#allocation9_spill] sm:$0xff] %v5441_v18 }
  0xf8   :  { %v789_v59 = vrot.slane %v761_v5, %v5241_v63  ;;  %v960_v61 = vrot.slane %v775_v14, %v5243_v0  ;;  %v1104_v4 = vmul.f32 %v956_v16, %v5318_v2  ;;  %v1136_v10 = vsel %vm567_vm1, %v1103_v21, 0.0 }
  0xf9   :  { %v422_v60 = vrot.slane %v275_v35, %v5243_v0  ;;  %v5454_v1 = vrot.slane %v810_v47, %v5241_v63  ;;  %v578_v13 = vadd.f32 %v577_v54, %v576_v38  ;;  %v1137_v25 = vadd.f32 %v1136_v10, %v1135_v39  ;;  %v5468_v47 = vld [vmem:[%s7110_s2 + $0x68] sm:$0x1f]  ;;  %v5473_v35 = vld [vmem:[%s7110_s2 + $0x70] sm:$0x1f] }
  0xfa   :  { %v430_v5 = vrot.slane %v272_v3, %v5243_v0  ;;  %v434_v37 = vrot.slane %v274_v33, %v5243_v0  ;;  %v544_v16 = vmul.f32 %v414_v40, %v5428_v46  ;;  %v545_v21 = vmul.f32 %v418_v43, %v5433_v51  ;;  %7161 = vst [vmem:[#allocation11_spill] sm:$0xff] %v5468_v47  ;;  %v5482_v40 = vld [vmem:[%s7110_s2 + $0x78] sm:$0x1f] }
  0xfb   :  { %7162 = vst [vmem:[#allocation12_spill] sm:$0xff] %v5473_v35  ;;  %v438_v38 = vrot.slane %v276_v52, %v5243_v0  ;;  %v547_v3 = vmul.f32 %v426_v44, %v5441_v18  ;;  %v542_v33 = vmul.f32 %v406_v19, %v5446_v29  ;;  %v579_v39 = vsel %vm567_vm1, %v541_v28, 0.0  ;;  %7163 = vst [vmem:[#allocation13_spill] sm:$0xff] %v5482_v40 }
  0xfc   :  { %v791_v43 = vcombine.high %v775_v14, %v775_v14  ;;  %v964_v54 = vrot.slane %v789_v59, %v5243_v0  ;;  %v1105_v10 = vmul.f32 %v960_v61, %v5351_v20  ;;  %v1138_v7 = vsel %vm567_vm1, %v1104_v4, 0.0 }
  0xfd   :  { %v546_v52 = vmul.f32 %v422_v60, %v5459_v32  ;;  %v583_v44 = vsel %vm567_vm1, %v543_v45, 0.0  ;;  %v580_v36 = vadd.f32 %v579_v39, %v578_v13  ;;  %v1139_v19 = vadd.f32 %v1138_v7, %v1137_v25 }
  0xfe   :  { %v548_v28 = vmul.f32 %v430_v5, %v5468_v47  ;;  %v549_v2 = vmul.f32 %v434_v37, %v5473_v35  ;;  %v585_v49 = vsel %vm567_vm1, %v544_v16, 0.0  ;;  %v587_v14 = vsel %vm567_vm1, %v545_v21, 0.0 }
  0xff   :  { %v5494_v48 = vmul.f32 %v438_v38, %v5482_v40  ;;  %v5497_v61 = vsel %vm567_vm1, %v547_v3, 0.0  ;;  %v839_v4 = vcombine.high %v5328_v8, %v5328_v8  ;;  %v581_v45 = vsel %vm567_vm1, %v542_v33, 0.0 }
 0x100   :  { %v793_v7 = vcombine.high %v789_v59, %v789_v59  ;;  %v968_v60 = vrot.slane %v791_v43, %v5243_v0  ;;  %v1106_v37 = vmul.f32 %v964_v54, %v5377_v50  ;;  %v1140_v13 = vsel %vm567_vm1, %v1105_v10, 0.0 }
 0x101   :  { %v589_v25 = vsel %vm567_vm1, %v546_v52, 0.0  ;;  %v840_v5 = vcombine.high %v5385_v56, %v5385_v56  ;;  %v582_v16 = vadd.f32 %v581_v45, %v580_v36  ;;  %v1141_v21 = vadd.f32 %v1140_v13, %v1139_v19 }
 0x102   :  { %v841_v38 = vcombine.high %v5388_v58, %v5388_v58  ;;  %v842_v3 = vcombine.high %v5454_v1, %v5454_v1  ;;  %v976_v59 = vrot.slane %v5328_v8, %v5243_v0  ;;  %v170_v33 = vadd.f32 1.0, %v5297_v53 }
 0x103   :  { %v980_v39 = vrot.slane %v5388_v58, %v5243_v0  ;;  %v984_v43 = vrot.slane %v839_v4, %v5243_v0  ;;  %v992_v36 = vrot.slane %v5385_v56, %v5243_v0  ;;  %v996_v54 = vrot.slane %v5454_v1, %v5243_v0 }
 0x104   :  { %v972_v10 = vrot.slane %v793_v7, %v5243_v0  ;;  %v1107_v52 = vmul.f32 %v968_v60, %v5409_v9  ;;  %v1142_v19 = vsel %vm567_vm1, %v1106_v37, 0.0  ;;  %v169_v8 = vadd.f32 1.0, %v5311_v62 }
 0x105   :  { %v5527_v53 = vsel %vm567_vm1, %v548_v28, 0.0  ;;  %v584_v58 = vadd.f32 %v583_v44, %v582_v16  ;;  %v1143_v45 = vadd.f32 %v1142_v19, %v1141_v21  ;;  %v736_v4 = vadd.f32 1.0, %v5302_v57 }
 0x106   :  { %v988_v56 = vrot.slane %v841_v38, %v5243_v0  ;;  %v1000_v13 = vrot.slane %v840_v5, %v5243_v0  ;;  %v1004_v1 = vrot.slane %v842_v3, %v5243_v0  ;;  %v174_v7 = vmul.f32 %v170_v33, %v5245_v12 }
 0x107   :  { %v1109_v60 = vmul.f32 %v976_v59, %v5398_v11  ;;  %v1110_v37 = vmul.f32 %v980_v39, %v5428_v46  ;;  %v1111_v62 = vmul.f32 %v984_v43, %v5433_v51  ;;  %v1113_v28 = vmul.f32 %v992_v36, %v5441_v18 }
 0x108   :  { %v1114_v44 = vmul.f32 %v996_v54, %v5468_v47  ;;  %v1108_v57 = vmul.f32 %v972_v10, %v5446_v29  ;;  %v1144_v16 = vsel %vm567_vm1, %v1107_v52, 0.0  ;;  %v173_v5 = vmul.f32 %v169_v8, %v5250_v22 }
 0x109   :  { %v595_v21 = vsel %vm567_vm1, %v549_v2, 0.0  ;;  %v586_v38 = vadd.f32 %v585_v49, %v584_v58  ;;  %v1145_v12 = vadd.f32 %v1144_v16, %v1143_v45  ;;  %v740_v3 = vmul.f32 %v736_v4, %v5247_v15 }
 0x10a   :  { %v1112_v59 = vmul.f32 %v988_v56, %v5459_v32  ;;  %v1115_v33 = vmul.f32 %v1000_v13, %v5473_v35  ;;  %v5547_v39 = vmul.f32 %v1004_v1, %v5482_v40  ;;  %v326_v43 = vcombine.high %v174_v7, %v174_v7 }
 0x10b   :  { %v1148_v36 = vsel %vm567_vm1, %v1109_v60, 0.0  ;;  %v1150_v54 = vsel %vm567_vm1, %v1110_v37, 0.0  ;;  %v1152_v22 = vsel %vm567_vm1, %v1111_v62, 0.0  ;;  %v5553_v2 = vsel %vm567_vm1, %v1113_v28, 0.0 }
 0x10c   :  { %v5556_v49 = vsel %vm567_vm1, %v1114_v44, 0.0  ;;  %v1146_v15 = vsel %vm567_vm1, %v1108_v57, 0.0  ;;  %v333_v10 = vrot.slane %v174_v7, %v5241_v63  ;;  %v277_v52 = vcombine.high %v173_v5, %v173_v5 }
 0x10d   :  { %v1147_v19 = vadd.f32 %v1146_v15, %v1145_v12  ;;  %v892_v8 = vcombine.high %v740_v3, %v740_v3  ;;  %v284_v58 = vrot.slane %v173_v5, %v5241_v63  ;;  %v588_v45 = vadd.f32 %v587_v14, %v586_v38 }
 0x10e   :  { %v5562_v4 = vsel %vm567_vm1, %v1112_v59, 0.0  ;;  %v340_v56 = vrot.slane %v326_v43, %v5241_v63  ;;  %v5566_v13 = vrot.slane %v740_v3, %v5241_v63  ;;  %v735_v1 = vadd.f32 1.0, %v5322_v6 }
 0x10f   :  { %v291_v60 = vrot.slane %v277_v52, %v5241_v63  ;;  %v292_v37 = vcombine.high %v284_v58, %v284_v58  ;;  %v300_v7 = vrot.slane %v284_v58, %v5241_v63  ;;  %v590_v62 = vadd.f32 %v589_v25, %v588_v45  ;;  %v5606_v58 = vld [vmem:[%s7110_s2 + $0x88] sm:$0x1f] }
 0x110   :  { %v5572_v28 = vsel %vm567_vm1, %v1115_v33, 0.0  ;;  %v341_v14 = vcombine.high %v333_v10, %v333_v10  ;;  %v349_v44 = vrot.slane %v333_v10, %v5241_v63  ;;  %v597_v57 = vsel %vm567_vm1, %v5494_v48, 0.0 }
 0x111   :  { %v1149_v16 = vadd.f32 %v1148_v36, %v1147_v19  ;;  %v5578_v5 = vrot.slane %v892_v8, %v5241_v63  ;;  %v314_v6 = vrot.slane %v292_v37, %v5241_v63  ;;  %v592_v38 = vadd.f32 %v5497_v61, %v590_v62  ;;  %v5596_v61 = vld [vmem:[%s7110_s2 + $0x80] sm:$0x1f] }
 0x112   :  { %v322_v12 = vcombine.high %v300_v7, %v300_v7  ;;  %v442_v3 = vrot.slane %v300_v7, %v5243_v0  ;;  %v739_v59 = vmul.f32 %v735_v1, %v5252_v23  ;;  %v342_v33 = vcombine.high %v340_v56, %v340_v56 }
 0x113   :  { %v5587_v43 = vrot.slane %v340_v56, %v5241_v63  ;;  %v5591_v48 = vrot.slane %v5566_v13, %v5241_v63  ;;  %v293_v36 = vcombine.high %v291_v60, %v291_v60  ;;  %v5599_v15 = vrot.slane %v341_v14, %v5241_v63 }
 0x114   :  { %v371_v10 = vcombine.high %v349_v44, %v349_v44  ;;  %v324_v52 = vcombine.high %v314_v6, %v314_v6  ;;  %v446_v23 = vrot.slane %v314_v6, %v5243_v0  ;;  %v1151_v19 = vadd.f32 %v1150_v54, %v1149_v16 }
 0x115   :  { %v474_v8 = vrot.slane %v349_v44, %v5243_v0  ;;  %v307_v45 = vrot.slane %v291_v60, %v5241_v63  ;;  %v594_v56 = vadd.f32 %v5527_v53, %v592_v38  ;;  %v450_v37 = vrot.slane %v322_v12, %v5243_v0  ;;  %v5623_v60 = vld [vmem:[%s7110_s2 + $0x90] sm:$0x1f] }
 0x116   :  { %v551_v7 = vmul.f32 %v442_v3, %v5596_v61  ;;  %v850_v54 = vrot.slane %v739_v59, %v5241_v63  ;;  %v5616_v62 = vrot.slane %v342_v33, %v5241_v63  ;;  %v372_v14 = vcombine.high %v5587_v43, %v5587_v43  ;;  %v5635_v3 = vld [vmem:[%s7110_s2 + $0x98] sm:$0x1f] }
 0x117   :  { %v321_v53 = vrot.slane %v293_v36, %v5241_v63  ;;  %v596_v44 = vadd.f32 %v595_v21, %v594_v56  ;;  %v373_v16 = vcombine.high %v5599_v15, %v5599_v15  ;;  %v478_v6 = vrot.slane %v5599_v15, %v5243_v0  ;;  %7164 = vst [vmem:[#allocation14_spill] sm:$0xff] %v5635_v3  ;;  %v5640_v21 = vld [vmem:[%s7110_s2 + $0xc0] sm:$0x1f] }
 0x118   :  { %v454_v38 = vrot.slane %v324_v52, %v5243_v0  ;;  %v552_v12 = vmul.f32 %v446_v23, %v5606_v58  ;;  %v323_v33 = vcombine.high %v307_v45, %v307_v45  ;;  %v843_v25 = vcombine.high %v739_v59, %v739_v59 }
 0x119   :  { %v598_v1 = vadd.f32 %v597_v57, %v596_v44  ;;  %v1153_v36 = vadd.f32 %v1152_v22, %v1151_v19  ;;  %v458_v15 = vrot.slane %v307_v45, %v5243_v0  ;;  %v553_v52 = vmul.f32 %v450_v37, %v5623_v60  ;;  %v5651_v22 = vld [vmem:[%s7110_s2 + $0xa0] sm:$0x1f]  ;;  %v5661_v44 = vld [vmem:[%s7110_s2 + $0xa8] sm:$0x1f] }
 0x11a   :  { %v599_v23 = vsel %vm567_vm1, %v551_v7, 0.0  ;;  %v858_v56 = vcombine.high %v850_v54, %v850_v54  ;;  %v482_v40 = vrot.slane %v371_v10, %v5243_v0  ;;  %v325_v57 = vcombine.high %v321_v53, %v321_v53 }
 0x11b   :  { %v600_v59 = vadd.f32 %v599_v23, %v598_v1  ;;  %v462_v19 = vrot.slane %v321_v53, %v5243_v0  ;;  %v554_v45 = vmul.f32 %v454_v38, %v5635_v3  ;;  %v601_v37 = vsel %vm567_vm1, %v552_v12, 0.0  ;;  %v5668_v53 = vld [vmem:[%s7110_s2 + $0xb0] sm:$0x1f] }
 0x11c   :  { %v866_v7 = vrot.slane %v850_v54, %v5241_v63  ;;  %v559_v10 = vmul.f32 %v474_v8, %v5640_v21  ;;  %v466_v35 = vrot.slane %v323_v33, %v5243_v0  ;;  %v1155_v1 = vadd.f32 %v5562_v4, %v1153_v36 }
 0x11d   :  { %v602_v47 = vadd.f32 %v601_v37, %v600_v59  ;;  %v555_v38 = vmul.f32 %v458_v15, %v5651_v22  ;;  %v603_v54 = vsel %vm567_vm1, %v553_v52, 0.0  ;;  %v857_v8 = vrot.slane %v843_v25, %v5241_v63  ;;  %v5681_v59 = vld [vmem:[%s7110_s2 + $0xb8] sm:$0x1f] }
 0x11e   :  { %v880_v12 = vrot.slane %v858_v56, %v5241_v63  ;;  %v374_v23 = vcombine.high %v5616_v62, %v5616_v62  ;;  %v486_v33 = vrot.slane %v373_v16, %v5243_v0  ;;  %v470_v4 = vrot.slane %v325_v57, %v5243_v0  ;;  %v5693_v57 = vld [vmem:[%s7110_s2 + $0xc8] sm:$0x1f] }
 0x11f   :  { %v604_v36 = vadd.f32 %v603_v54, %v602_v47  ;;  %v556_v15 = vmul.f32 %v462_v19, %v5661_v44  ;;  %v605_v52 = vsel %vm567_vm1, %v554_v45, 0.0  ;;  %v888_v25 = vcombine.high %v866_v7, %v866_v7 }
 0x120   :  { %v1008_v56 = vrot.slane %v866_v7, %v5243_v0  ;;  %v494_v37 = vrot.slane %v5616_v62, %v5243_v0  ;;  %v557_v16 = vmul.f32 %v466_v35, %v5668_v53  ;;  %v1157_v47 = vadd.f32 %v5553_v2, %v1155_v1  ;;  %v5703_v2 = vld [vmem:[%s7110_s2 + $0xd0] sm:$0x1f] }
 0x121   :  { %v606_v18 = vadd.f32 %v605_v52, %v604_v36  ;;  %v607_v19 = vsel %vm567_vm1, %v555_v38, 0.0  ;;  %v859_v54 = vcombine.high %v857_v8, %v857_v8  ;;  %v890_v45 = vcombine.high %v880_v12, %v880_v12 }
 0x122   :  { %v1012_v32 = vrot.slane %v880_v12, %v5243_v0  ;;  %v498_v7 = vrot.slane %v372_v14, %v5243_v0  ;;  %v558_v62 = vmul.f32 %v470_v4, %v5681_v59  ;;  %v1159_v35 = vadd.f32 %v5556_v49, %v1157_v47  ;;  %v5716_v4 = vld [vmem:[%s7110_s2 + $0xe0] sm:$0x1f] }
 0x123   :  { %v608_v51 = vadd.f32 %v607_v19, %v606_v18  ;;  %v609_v1 = vsel %vm567_vm1, %v556_v15, 0.0  ;;  %v873_v38 = vrot.slane %v857_v8, %v5241_v63  ;;  %v1016_v36 = vrot.slane %v888_v25, %v5243_v0 }
 0x124   :  { %v1117_v12 = vmul.f32 %v1008_v56, %v5596_v61  ;;  %v560_v14 = vmul.f32 %v478_v6, %v5693_v57  ;;  %v1161_v18 = vadd.f32 %v5572_v28, %v1159_v35  ;;  %v1162_v49 = vsel %vm567_vm1, %v5547_v39, 0.0  ;;  %v5727_v39 = vld [vmem:[%s7110_s2 + $0xd8] sm:$0x1f] }
 0x125   :  { %v610_v52 = vadd.f32 %v609_v1, %v608_v51  ;;  %v611_v15 = vsel %vm567_vm1, %v557_v16, 0.0  ;;  %v887_v8 = vrot.slane %v859_v54, %v5241_v63  ;;  %v1020_v25 = vrot.slane %v890_v45, %v5243_v0 }
 0x126   :  { %v1118_v56 = vmul.f32 %v1012_v32, %v5606_v58  ;;  %v561_v51 = vmul.f32 %v482_v40, %v5703_v2  ;;  %v613_v28 = vsel %vm567_vm1, %v558_v62, 0.0  ;;  %v1163_v47 = vadd.f32 %v1162_v49, %v1161_v18 }
 0x127   :  { %v612_v6 = vadd.f32 %v611_v15, %v610_v52  ;;  %v889_v19 = vcombine.high %v873_v38, %v873_v38  ;;  %v1024_v16 = vrot.slane %v873_v38, %v5243_v0  ;;  %v1119_v54 = vmul.f32 %v1016_v36, %v5623_v60  ;;  %v5740_v52 = vld [vmem:[%s7110_s2 + $0xe8] sm:$0x1f] }
 0x128   :  { %v1164_v45 = vsel %vm567_vm1, %v1117_v12, 0.0  ;;  %v7165_v32 = vrot.slane %v5587_v43, %v5243_v0  ;;  %v615_v62 = vsel %vm567_vm1, %v559_v10, 0.0  ;;  %v891_v18 = vcombine.high %v887_v8, %v887_v8  ;;  %v5748_v43 = vld [vmem:[%s7110_s2 + $0xf0] sm:$0x1f] }
 0x129   :  { %v614_v35 = vadd.f32 %v613_v28, %v612_v6  ;;  %v1165_v1 = vadd.f32 %v1164_v45, %v1163_v47  ;;  %v1028_v38 = vrot.slane %v887_v8, %v5243_v0  ;;  %v1120_v36 = vmul.f32 %v1020_v25, %v5635_v3 }
 0x12a   :  { %v563_v40 = vmul.f32 %v7165_v32, %v5716_v4  ;;  %v1166_v12 = vsel %vm567_vm1, %v1118_v56, 0.0  ;;  %v502_v10 = vrot.slane %v374_v23, %v5243_v0  ;;  %v562_v49 = vmul.f32 %v486_v33, %v5727_v39  ;;  %v5764_v33 = vld [vmem:[%s7110_s2 + $0xf8] sm:$0x1f] }
 0x12b   :  { %v616_v15 = vadd.f32 %v615_v62, %v614_v35  ;;  %v1167_v6 = vadd.f32 %v1166_v12, %v1165_v1  ;;  %v617_v28 = vsel %vm567_vm1, %v560_v14, 0.0  ;;  %v1032_v47 = vrot.slane %v889_v19, %v5243_v0 }
 0x12c   :  { %v1121_v8 = vmul.f32 %v1024_v16, %v5651_v22  ;;  %v1168_v25 = vsel %vm567_vm1, %v1119_v54, 0.0  ;;  %v564_v56 = vmul.f32 %v494_v37, %v5740_v52  ;;  %v7166_v45 = vcombine.high %v5566_v13, %v5566_v13 }
 0x12d   :  { %v618_v23 = vadd.f32 %v617_v28, %v616_v15  ;;  %v1169_v3 = vadd.f32 %v1168_v25, %v1167_v6  ;;  %v565_v14 = vmul.f32 %v498_v7, %v5748_v43  ;;  %v1036_v19 = vrot.slane %v891_v18, %v5243_v0 }
 0x12e   :  { %v929_v32 = vrot.slane %v7166_v45, %v5241_v63  ;;  %v1122_v16 = vmul.f32 %v1028_v38, %v5661_v44  ;;  %v1170_v37 = vsel %vm567_vm1, %v1120_v36, 0.0  ;;  %v619_v54 = vsel %vm567_vm1, %v561_v51, 0.0 }
 0x12f   :  { %v922_v13 = vrot.slane %v5578_v5, %v5241_v63  ;;  %v7167_v62 = vcombine.high %v5578_v5, %v5578_v5  ;;  %v1171_v1 = vadd.f32 %v1170_v37, %v1169_v3  ;;  %v937_v7 = vcombine.high %v5591_v48, %v5591_v48 }
 0x130   :  { %v1040_v18 = vrot.slane %v5591_v48, %v5243_v0  ;;  %v1123_v38 = vmul.f32 %v1032_v47, %v5668_v53  ;;  %v1172_v36 = vsel %vm567_vm1, %v1121_v8, 0.0  ;;  %v566_v51 = vmul.f32 %v502_v10, %v5764_v33 }
 0x131   :  { %v936_v35 = vrot.slane %v7167_v62, %v5241_v63  ;;  %v939_v12 = vcombine.high %v929_v32, %v929_v32  ;;  %v620_v15 = vadd.f32 %v619_v54, %v618_v23  ;;  %v1173_v6 = vadd.f32 %v1172_v36, %v1171_v1 }
 0x132   :  { %v1044_v28 = vrot.slane %v929_v32, %v5243_v0  ;;  %v1124_v5 = vmul.f32 %v1036_v19, %v5681_v59  ;;  %v1174_v3 = vsel %vm567_vm1, %v1122_v16, 0.0  ;;  %v1298_v25 = vadd.f32 1.0, %v5362_v34 }
 0x133   :  { %v621_v45 = vsel %vm567_vm1, %v562_v49, 0.0  ;;  %v938_v48 = vcombine.high %v922_v13, %v922_v13  ;;  %v940_v37 = vcombine.high %v936_v35, %v936_v35  ;;  %v1175_v47 = vadd.f32 %v1174_v3, %v1173_v6 }
 0x134   :  { %v1048_v8 = vrot.slane %v937_v7, %v5243_v0  ;;  %v1056_v10 = vrot.slane %v922_v13, %v5243_v0  ;;  %v1125_v23 = vmul.f32 %v1040_v18, %v5640_v21  ;;  %v1176_v54 = vsel %vm567_vm1, %v1123_v38, 0.0 }
 0x135   :  { %v1060_v32 = vrot.slane %v936_v35, %v5243_v0  ;;  %v622_v19 = vadd.f32 %v621_v45, %v620_v15  ;;  %v1177_v62 = vadd.f32 %v1176_v54, %v1175_v47  ;;  %v1299_v16 = vadd.f32 1.0, %v5339_v17 }
 0x136   :  { %v1052_v34 = vrot.slane %v939_v12, %v5243_v0  ;;  %v1126_v49 = vmul.f32 %v1044_v28, %v5693_v57  ;;  %v1178_v1 = vsel %vm567_vm1, %v1124_v5, 0.0  ;;  %v1302_v7 = vmul.f32 %v1298_v25, %v5260_v30 }
 0x137   :  { %v623_v13 = vsel %vm567_vm1, %v563_v40, 0.0  ;;  %v1064_v18 = vrot.slane %v938_v48, %v5243_v0  ;;  %v1068_v38 = vrot.slane %v940_v37, %v5243_v0  ;;  %v1179_v36 = vadd.f32 %v1178_v1, %v1177_v62 }
 0x138   :  { %v625_v35 = vsel %vm567_vm1, %v564_v56, 0.0  ;;  %v627_v15 = vsel %vm567_vm1, %v565_v14, 0.0  ;;  %v1127_v17 = vmul.f32 %v1048_v8, %v5703_v2  ;;  %v1180_v12 = vsel %vm567_vm1, %v1125_v23, 0.0 }
 0x139   :  { %v1129_v6 = vmul.f32 %v1056_v10, %v5716_v4  ;;  %v624_v28 = vadd.f32 %v623_v13, %v622_v19  ;;  %v1181_v5 = vadd.f32 %v1180_v12, %v1179_v36  ;;  %v1303_v30 = vmul.f32 %v1299_v16, %v5254_v24 }
 0x13a   :  { %v1128_v40 = vmul.f32 %v1052_v34, %v5727_v39  ;;  %v1130_v3 = vmul.f32 %v1060_v32, %v5740_v52  ;;  %v1182_v25 = vsel %vm567_vm1, %v1126_v49, 0.0  ;;  %v1310_v45 = vcombine.high %v1302_v7, %v1302_v7 }
 0x13b   :  { %v1131_v56 = vmul.f32 %v1064_v18, %v5748_v43  ;;  %v1132_v14 = vmul.f32 %v1068_v38, %v5764_v33  ;;  %v1183_v48 = vadd.f32 %v1182_v25, %v1181_v5  ;;  %v1317_v37 = vrot.slane %v1302_v7, %v5241_v63 }
 0x13c   :  { %v629_v47 = vsel %vm567_vm1, %v566_v51, 0.0  ;;  %v1184_v8 = vsel %vm567_vm1, %v1127_v17, 0.0  ;;  %v1864_v24 = vadd.f32 1.0, %v5354_v27  ;;  %v1863_v10 = vadd.f32 1.0, %v5366_v42 }
 0x13d   :  { %v1188_v23 = vsel %vm567_vm1, %v1129_v6, 0.0  ;;  %v626_v54 = vadd.f32 %v625_v35, %v624_v28  ;;  %v1185_v32 = vadd.f32 %v1184_v8, %v1183_v48  ;;  %v1359_v19 = vcombine.high %v1303_v30, %v1303_v30 }
 0x13e   :  { %v1186_v62 = vsel %vm567_vm1, %v1128_v40, 0.0  ;;  %v1190_v16 = vsel %vm567_vm1, %v1130_v3, 0.0  ;;  %v1366_v34 = vrot.slane %v1303_v30, %v5241_v63  ;;  %v1324_v49 = vrot.slane %v1310_v45, %v5241_v63 }
 0x13f   :  { %v1192_v51 = vsel %vm567_vm1, %v1131_v56, 0.0  ;;  %v1194_v1 = vsel %vm567_vm1, %v1132_v14, 0.0  ;;  %v1187_v27 = vadd.f32 %v1186_v62, %v1185_v32  ;;  %v1325_v7 = vcombine.high %v1317_v37, %v1317_v37 }
 0x140   :  { %v5826_v42 = vmul.f32 %v1864_v24, %v5256_v26  ;;  %v1333_v13 = vrot.slane %v1317_v37, %v5241_v63  ;;  %v1867_v18 = vmul.f32 %v1863_v10, %v5262_v31  ;;  %v5831_v38 = vadd.f32 1.0, %v5381_v55  ;;  %v7169_v37 = vld [vmem:[#allocation4_spill] sm:$0xff]  ;;  %v7170_v10 = vld [vmem:[#allocation5_spill] sm:$0xff] }
 0x141   :  { %v628_v36 = vadd.f32 %v627_v15, %v626_v54  ;;  %v1189_v35 = vadd.f32 %v1188_v23, %v1187_v27  ;;  %v5834_v17 = vrot.slane %v1359_v19, %v5241_v63  ;;  %v1347_v12 = vrot.slane %v1325_v7, %v5241_v63 }
 0x142   :  { %v1374_v6 = vcombine.high %v1366_v34, %v1366_v34  ;;  %v1326_v28 = vcombine.high %v1324_v49, %v1324_v49  ;;  %v1355_v5 = vcombine.high %v1333_v13, %v1333_v13  ;;  %v1509_v26 = vrot.slane %v1333_v13, %v5243_v0 }
 0x143   :  { %v1191_v30 = vadd.f32 %v1190_v16, %v1189_v35  ;;  %v1340_v40 = vrot.slane %v1324_v49, %v5241_v63  ;;  %v1357_v3 = vcombine.high %v1347_v12, %v1347_v12  ;;  %v1513_v31 = vrot.slane %v1347_v12, %v5243_v0  ;;  %v7172_v49 = vld [vmem:[#allocation6_spill] sm:$0xff] }
 0x144   :  { %v5841_v55 = vrot.slane %v1366_v34, %v5241_v63  ;;  %v1924_v15 = vcombine.high %v5826_v42, %v5826_v42  ;;  %v1517_v25 = vrot.slane %v1355_v5, %v5243_v0  ;;  %v1666_v45 = vmul.f32 %v1509_v26, %v5274_v41 }
 0x145   :  { %v5847_v56 = vadd.f32 %v629_v47, %v628_v36  ;;  %v1193_v14 = vadd.f32 %v1192_v51, %v1191_v30  ;;  %v1521_v48 = vrot.slane %v1357_v3, %v5243_v0  ;;  %v1667_v8 = vmul.f32 %v1513_v31, %v7169_v37 }
 0x146   :  { %v5853_v24 = vrot.slane %v5826_v42, %v5241_v63  ;;  %v1668_v23 = vmul.f32 %v1517_v25, %v7170_v10  ;;  %v1875_v54 = vcombine.high %v1867_v18, %v1867_v18  ;;  %v1882_v32 = vrot.slane %v1867_v18, %v5241_v63 }
 0x147   :  { %7168 = vst [vmem:[#allocation15_spill] sm:$0xff] %v5847_v56  ;;  %v5857_v19 = vadd.f32 %v1194_v1, %v1193_v14  ;;  %v1375_v47 = vcombine.high %v5834_v17, %v5834_v17  ;;  %v1354_v62 = vrot.slane %v1326_v28, %v5241_v63  ;;  %v1525_v16 = vrot.slane %v1340_v40, %v5243_v0 }
 0x148   :  { %v5865_v34 = vrot.slane %v5834_v17, %v5241_v63  ;;  %v1669_v51 = vmul.f32 %v1521_v48, %v7172_v49  ;;  %v1698_v27 = vsel %vm567_vm1, %v1666_v45, 0.0  ;;  %v1699_v7 = vsel %vm567_vm1, %v1667_v8, 0.0 }
 0x149   :  { %7171 = vst [vmem:[#allocation4_spill] sm:$0xff] %v5857_v19  ;;  %v4586_v1 = vmax.f32 %v5847_v56, %v5857_v19  ;;  %v5873_v42 = vrot.slane %v1374_v6, %v5241_v63  ;;  %v1356_v13 = vcombine.high %v1340_v40, %v1340_v40  ;;  %v1700_v18 = vadd.f32 %v1699_v7, %v1698_v27 }
 0x14a   :  { %v1701_v36 = vsel %vm567_vm1, %v1668_v23, 0.0  ;;  %v1889_v35 = vrot.slane %v1875_v54, %v5241_v63  ;;  %v1890_v17 = vcombine.high %v1882_v32, %v1882_v32  ;;  %v1898_v12 = vrot.slane %v1882_v32, %v5241_v63 }
 0x14b   :  { %v1404_v28 = vcombine.high %v5841_v55, %v5841_v55  ;;  %v1529_v5 = vrot.slane %v1354_v62, %v5243_v0  ;;  %v1670_v26 = vmul.f32 %v1525_v16, %v5351_v20  ;;  %v1702_v30 = vadd.f32 %v1701_v36, %v1700_v18 }
 0x14c   :  { %v1703_v6 = vsel %vm567_vm1, %v1669_v51, 0.0  ;;  %v1891_v3 = vcombine.high %v1889_v35, %v1889_v35  ;;  %v1912_v40 = vrot.slane %v1890_v17, %v5241_v63  ;;  %v1920_v31 = vcombine.high %v1898_v12, %v1898_v12 }
 0x14d   :  { %v1541_v25 = vrot.slane %v5841_v55, %v5243_v0  ;;  %v1704_v45 = vadd.f32 %v1703_v6, %v1702_v30  ;;  %v1905_v14 = vrot.slane %v1889_v35, %v5241_v63  ;;  %v2074_v48 = vrot.slane %v1898_v12, %v5243_v0 }
 0x14e   :  { %v1358_v8 = vcombine.high %v1354_v62, %v1354_v62  ;;  %v1533_v23 = vrot.slane %v1356_v13, %v5243_v0  ;;  %v1922_v54 = vcombine.high %v1912_v40, %v1912_v40  ;;  %v2078_v32 = vrot.slane %v1912_v40, %v5243_v0 }
 0x14f   :  { %v1671_v16 = vmul.f32 %v1529_v5, %v5377_v50  ;;  %v1705_v51 = vsel %vm567_vm1, %v1670_v26, 0.0  ;;  %v2082_v27 = vrot.slane %v1920_v31, %v5243_v0  ;;  %v2231_v7 = vmul.f32 %v2074_v48, %v5274_v41 }
 0x150   :  { %v5895_v55 = vrot.slane %v1924_v15, %v5241_v63  ;;  %v1706_v18 = vadd.f32 %v1705_v51, %v1704_v45  ;;  %v1919_v36 = vrot.slane %v1891_v3, %v5241_v63  ;;  %v2086_v62 = vrot.slane %v1922_v54, %v5243_v0 }
 0x151   :  { %v1403_v13 = vrot.slane %v1375_v47, %v5241_v63  ;;  %v2090_v35 = vrot.slane %v1905_v14, %v5243_v0  ;;  %v2232_v17 = vmul.f32 %v2078_v32, %v7169_v37  ;;  %v2233_v12 = vmul.f32 %v2082_v27, %v7170_v10 }
 0x152   :  { %v1405_v5 = vcombine.high %v5865_v34, %v5865_v34  ;;  %v1406_v41 = vcombine.high %v5873_v42, %v5873_v42  ;;  %v1537_v15 = vrot.slane %v1358_v8, %v5243_v0  ;;  %v1672_v26 = vmul.f32 %v1533_v23, %v5409_v9 }
 0x153   :  { %v1707_v30 = vsel %vm567_vm1, %v1671_v16, 0.0  ;;  %v2234_v47 = vmul.f32 %v2086_v62, %v7172_v49  ;;  %v2263_v6 = vsel %vm567_vm1, %v2231_v7, 0.0  ;;  %v2264_v37 = vsel %vm567_vm1, %v2232_v17, 0.0 }
 0x154   :  { %v1708_v3 = vadd.f32 %v1707_v30, %v1706_v18  ;;  %v1921_v10 = vcombine.high %v1905_v14, %v1905_v14  ;;  %v2094_v40 = vrot.slane %v1919_v36, %v5243_v0  ;;  %v2265_v31 = vadd.f32 %v2264_v37, %v2263_v6 }
 0x155   :  { %v1545_v45 = vrot.slane %v5873_v42, %v5243_v0  ;;  %v1549_v48 = vrot.slane %v1404_v28, %v5243_v0  ;;  %v2235_v8 = vmul.f32 %v2090_v35, %v5351_v20  ;;  %v2266_v23 = vsel %vm567_vm1, %v2233_v12, 0.0 }
 0x156   :  { %v1407_v54 = vcombine.high %v1403_v13, %v1403_v13  ;;  %v1553_v49 = vrot.slane %v1406_v41, %v5243_v0  ;;  %v1557_v32 = vrot.slane %v5865_v34, %v5243_v0  ;;  %v2267_v16 = vadd.f32 %v2266_v23, %v2265_v31 }
 0x157   :  { %v1673_v14 = vmul.f32 %v1537_v15, %v5446_v29  ;;  %v1709_v51 = vsel %vm567_vm1, %v1672_v26, 0.0  ;;  %v1923_v27 = vcombine.high %v1919_v36, %v1919_v36  ;;  %v2268_v42 = vsel %vm567_vm1, %v2234_v47, 0.0  ;;  %v7173_v15 = vld [vmem:[#allocation2_spill] sm:$0xff] }
 0x158   :  { %v1710_v7 = vadd.f32 %v1709_v51, %v1708_v3  ;;  %v2098_v28 = vrot.slane %v1921_v10, %v5243_v0  ;;  %v2236_v20 = vmul.f32 %v2094_v40, %v5377_v50  ;;  %v2269_v18 = vadd.f32 %v2268_v42, %v2267_v16  ;;  %v7174_v3 = vld [vmem:[#allocation8_spill] sm:$0xff]  ;;  %v5952_v51 = vpop.f32.mrf.mxu0 }
 0x159   :  { %v1561_v62 = vrot.slane %v1403_v13, %v5243_v0  ;;  %v1565_v35 = vrot.slane %v1405_v5, %v5243_v0  ;;  %v1939_v34 = vcombine.high %v5853_v24, %v5853_v24  ;;  %v2270_v17 = vsel %vm567_vm1, %v2235_v8, 0.0  ;;  %v7176_v8 = vld [vmem:[#allocation9_spill] sm:$0xff] }
 0x15a   :  { %v1674_v12 = vmul.f32 %v1541_v25, %v5398_v11  ;;  %v1675_v36 = vmul.f32 %v1545_v45, %v5428_v46  ;;  %v2271_v41 = vadd.f32 %v2270_v17, %v2269_v18  ;;  %v1305_v26 = vmul.f32 %v5831_v38, %v7173_v15  ;;  %v7175_v38 = vld [vmem:[#allocation10_spill] sm:$0xff]  ;;  %v5961_v18 = vpop.f32.mrf.mxu1  ;;  %v7179_v17 = vld [vmem:[#allocation13_spill] sm:$0xff] }
 0x15b   :  { %v1569_v50 = vrot.slane %v1407_v54, %v5243_v0  ;;  %v1940_v13 = vcombine.high %v5895_v55, %v5895_v55  ;;  %v1947_v5 = vrot.slane %v5853_v24, %v5241_v63  ;;  %v1711_v30 = vsel %vm567_vm1, %v1673_v14, 0.0  ;;  %v7177_v54 = vld [vmem:[#allocation11_spill] sm:$0xff] }
 0x15c   :  { %v1712_v47 = vadd.f32 %v1711_v30, %v1710_v7  ;;  %v2102_v6 = vrot.slane %v1923_v27, %v5243_v0  ;;  %v2237_v25 = vmul.f32 %v2098_v28, %v5409_v9  ;;  %v2272_v37 = vsel %vm567_vm1, %v2236_v20, 0.0  ;;  %v7178_v9 = vld [vmem:[#allocation12_spill] sm:$0xff] }
 0x15d   :  { %v1676_v10 = vmul.f32 %v1549_v48, %v7174_v3  ;;  %v1677_v40 = vmul.f32 %v1553_v49, %v7175_v38  ;;  %v1961_v31 = vrot.slane %v1939_v34, %v5241_v63  ;;  %v2273_v45 = vadd.f32 %v2272_v37, %v2271_v41 }
 0x15e   :  { %v1678_v23 = vmul.f32 %v1557_v32, %v7176_v8  ;;  %v1679_v24 = vmul.f32 %v1561_v62, %v7177_v54  ;;  %v1954_v16 = vrot.slane %v5895_v55, %v5241_v63  ;;  %v1457_v14 = vcombine.high %v1305_v26, %v1305_v26 }
 0x15f   :  { %v1680_v27 = vmul.f32 %v1565_v35, %v7178_v9  ;;  %v1713_v42 = vsel %vm567_vm1, %v1674_v12, 0.0  ;;  %v1968_v48 = vrot.slane %v1940_v13, %v5241_v63  ;;  %v2106_v49 = vrot.slane %v1947_v5, %v5243_v0 }
 0x160   :  { %v1714_v7 = vadd.f32 %v1713_v42, %v1712_v47  ;;  %v2238_v28 = vmul.f32 %v2102_v6, %v5446_v29  ;;  %v2274_v32 = vsel %vm567_vm1, %v2237_v25, 0.0  ;;  %v1464_v20 = vrot.slane %v1305_v26, %v5241_v63 }
 0x161   :  { %v1969_v55 = vcombine.high %v1947_v5, %v1947_v5  ;;  %v1971_v62 = vcombine.high %v1961_v31, %v1961_v31  ;;  %v2275_v34 = vadd.f32 %v2274_v32, %v2273_v45  ;;  %v1292_v35 = vmul.f32 0.70710677, %v5952_v51 }
 0x162   :  { %v5965_v12 = vmul.f32 %v1569_v50, %v7179_v17  ;;  %v1715_v41 = vsel %vm567_vm1, %v1675_v36, 0.0  ;;  %v1970_v15 = vcombine.high %v1954_v16, %v1954_v16  ;;  %v1471_v13 = vrot.slane %v1457_v14, %v5241_v63 }
 0x163   :  { %v1972_v29 = vcombine.high %v1968_v48, %v1968_v48  ;;  %v2110_v30 = vrot.slane %v1961_v31, %v5243_v0  ;;  %4935 = verf.f32 %v1292_v35  ;;  %v1857_v26 = vmul.f32 0.70710677, %v5961_v18 }
 0x164   :  { %v2239_v5 = vmul.f32 %v2106_v49, %v5398_v11  ;;  %v1716_v47 = vadd.f32 %v1715_v41, %v1714_v7  ;;  %v2276_v6 = vsel %vm567_vm1, %v2238_v28, 0.0  ;;  %v1472_v25 = vcombine.high %v1464_v20, %v1464_v20 }
 0x165   :  { %v2114_v50 = vrot.slane %v1969_v55, %v5243_v0  ;;  %v2118_v37 = vrot.slane %v1971_v62, %v5243_v0  ;;  %v2277_v36 = vadd.f32 %v2276_v6, %v2275_v34  ;;  %4937 = verf.f32 %v1857_v26 }
 0x166   :  { %v1717_v45 = vsel %vm567_vm1, %v1676_v10, 0.0  ;;  %v1719_v14 = vsel %vm567_vm1, %v1677_v40, 0.0  ;;  %v2122_v31 = vrot.slane %v1954_v16, %v5243_v0  ;;  %v1473_v42 = vcombine.high %v1471_v13, %v1471_v13 }
 0x167   :  { %v2126_v32 = vrot.slane %v1968_v48, %v5243_v0  ;;  %v2130_v11 = vrot.slane %v1970_v15, %v5243_v0  ;;  %v2134_v49 = vrot.slane %v1972_v29, %v5243_v0  ;;  %v1480_v7 = vrot.slane %v1464_v20, %v5241_v63 }
 0x168   :  { %v2240_v28 = vmul.f32 %v2110_v30, %v5428_v46  ;;  %v2278_v55 = vsel %vm567_vm1, %v2239_v5, 0.0  ;;  %v1494_v62 = vrot.slane %v1472_v25, %v5241_v63  ;;  %v1718_v10 = vadd.f32 %v1717_v45, %v1716_v47 }
 0x169   :  { %v2241_v40 = vmul.f32 %v2114_v50, %v7174_v3  ;;  %v2242_v16 = vmul.f32 %v2118_v37, %v7175_v38  ;;  %v2279_v34 = vadd.f32 %v2278_v55, %v2277_v36  ;;  %v1487_v48 = vrot.slane %v1471_v13, %v5241_v63 }
 0x16a   :  { %v1721_v35 = vsel %vm567_vm1, %v1678_v23, 0.0  ;;  %v1723_v41 = vsel %vm567_vm1, %v1679_v24, 0.0  ;;  %v1725_v20 = vsel %vm567_vm1, %v1680_v27, 0.0  ;;  %v1501_v46 = vrot.slane %v1473_v42, %v5241_v63 }
 0x16b   :  { %v2243_v15 = vmul.f32 %v2122_v31, %v7176_v8  ;;  %v2244_v29 = vmul.f32 %v2126_v32, %v7177_v54  ;;  %v2245_v30 = vmul.f32 %v2130_v11, %v7178_v9  ;;  %v1502_v3 = vcombine.high %v1480_v7, %v1480_v7  ;;  %v7180_v9 = vld [vmem:[#allocation7_spill] sm:$0xff] }
 0x16c   :  { %v5996_v38 = vmul.f32 %v2134_v49, %v7179_v17  ;;  %v2280_v13 = vsel %vm567_vm1, %v2240_v28, 0.0  ;;  %v1504_v26 = vcombine.high %v1494_v62, %v1494_v62  ;;  %v1720_v23 = vadd.f32 %v1719_v14, %v1718_v10 }
 0x16d   :  { %v2282_v24 = vsel %vm567_vm1, %v2241_v40, 0.0  ;;  %v2284_v27 = vsel %vm567_vm1, %v2242_v16, 0.0  ;;  %v2281_v5 = vadd.f32 %v2280_v13, %v2279_v34  ;;  %v1503_v47 = vcombine.high %v1487_v48, %v1487_v48  ;;  %v7181_v16 = vld [vmem:[#allocation3_spill] sm:$0xff] }
 0x16e   :  { %v1505_v6 = vcombine.high %v1501_v46, %v1501_v46  ;;  %v1605_v8 = vrot.slane %v1480_v7, %v5243_v0  ;;  %v1609_v54 = vrot.slane %v1494_v62, %v5243_v0  ;;  %v1866_v25 = vadd.f32 1.0, %v7180_v9 }
 0x16f   :  { %v2286_v17 = vsel %vm567_vm1, %v2243_v15, 0.0  ;;  %v2288_v50 = vsel %vm567_vm1, %v2244_v29, 0.0  ;;  %v1613_v37 = vrot.slane %v1502_v3, %v5243_v0  ;;  %v1621_v36 = vrot.slane %v1487_v48, %v5243_v0 }
 0x170   :  { %v4936_v45 = vpop.eup %4935  ;;  %v6009_v14 = vsel %vm567_vm1, %v2245_v30, 0.0  ;;  %v1617_v31 = vrot.slane %v1504_v26, %v5243_v0  ;;  %v1625_v42 = vrot.slane %v1501_v46, %v5243_v0  ;;  %v1722_v32 = vadd.f32 %v1721_v35, %v1720_v23 }
 0x171   :  { %v1629_v11 = vrot.slane %v1503_v47, %v5243_v0  ;;  %v1288_v49 = vmul.f32 0.5, %v5952_v51  ;;  %v1300_v7 = vadd.f32 1.0, %v4936_v45  ;;  %v2283_v28 = vadd.f32 %v2282_v24, %v2281_v5 }
 0x172   :  { %v4938_v55 = vpop.eup %4937  ;;  %v1633_v62 = vrot.slane %v1505_v6, %v5243_v0  ;;  %v1690_v10 = vmul.f32 %v1605_v8, %v5640_v21  ;;  %v1691_v40 = vmul.f32 %v1609_v54, %v5693_v57  ;;  %v1870_v34 = vmul.f32 %v1866_v25, %v7181_v16 }
 0x173   :  { %v1692_v48 = vmul.f32 %v1613_v37, %v5703_v2  ;;  %v6021_v46 = vmul.f32 %v1621_v36, %v5716_v4  ;;  %v1304_v35 = vmul.f32 %v1300_v7, %v1288_v49  ;;  %v1865_v15 = vadd.f32 1.0, %v4938_v55 }
 0x174   :  { %v1693_v51 = vmul.f32 %v1617_v31, %v5727_v39  ;;  %v6025_v29 = vmul.f32 %v1625_v42, %v5740_v52  ;;  %v1724_v30 = vadd.f32 %v1723_v41, %v1722_v32  ;;  %v1853_v3 = vmul.f32 0.5, %v5961_v18 }
 0x175   :  { %v6029_v21 = vmul.f32 %v1629_v11, %v5748_v43  ;;  %v1408_v13 = vcombine.high %v1304_v35, %v1304_v35  ;;  %v1415_v26 = vrot.slane %v1304_v35, %v5241_v63  ;;  %v2285_v23 = vadd.f32 %v2284_v27, %v2283_v28  ;;  %v6058_v28 = vpop.f32.mrf.mxu0 }
 0x176   :  { %v6033_v24 = vmul.f32 %v1633_v62, %v5764_v33  ;;  %v6036_v5 = vsel %vm567_vm1, %v1690_v10, 0.0  ;;  %v6039_v47 = vsel %vm567_vm1, %v1691_v40, 0.0  ;;  %v1869_v6 = vmul.f32 %v1865_v15, %v1853_v3 }
 0x177   :  { %v2022_v41 = vcombine.high %v1870_v34, %v1870_v34  ;;  %v1422_v18 = vrot.slane %v1408_v13, %v5241_v63  ;;  %v1423_v8 = vcombine.high %v1415_v26, %v1415_v26  ;;  %v1431_v54 = vrot.slane %v1415_v26, %v5241_v63  ;;  %v6074_v26 = vpop.f32.mrf.mxu0 }
 0x178   :  { %v6044_v9 = vsel %vm567_vm1, %v1692_v48, 0.0  ;;  %v6047_v27 = vsel %vm567_vm1, %v1693_v51, 0.0  ;;  %v6050_v25 = vrot.slane %v1870_v34, %v5241_v63  ;;  %v1726_v37 = vadd.f32 %v1725_v20, %v1724_v30 }
 0x179   :  { %v1424_v36 = vcombine.high %v1422_v18, %v1422_v18  ;;  %v1445_v45 = vrot.slane %v1423_v8, %v5241_v63  ;;  %v1453_v31 = vcombine.high %v1431_v54, %v1431_v54  ;;  %v2287_v42 = vadd.f32 %v2286_v17, %v2285_v23 }
 0x17a   :  { %v1438_v32 = vrot.slane %v1422_v18, %v5241_v63  ;;  %v1573_v11 = vrot.slane %v1431_v54, %v5243_v0  ;;  %v1727_v49 = vsel %vm567_vm1, %v5965_v12, 0.0  ;;  %v1980_v7 = vrot.slane %v1869_v6, %v5241_v63 }
 0x17b   :  { %v6061_v55 = vrot.slane %v2022_v41, %v5241_v63  ;;  %v1455_v20 = vcombine.high %v1445_v45, %v1445_v45  ;;  %v1577_v62 = vrot.slane %v1445_v45, %v5243_v0  ;;  %v1973_v10 = vcombine.high %v1869_v6, %v1869_v6 }
 0x17c   :  { %v1452_v17 = vrot.slane %v1424_v36, %v5241_v63  ;;  %v1581_v40 = vrot.slane %v1453_v31, %v5243_v0  ;;  %v1682_v16 = vmul.f32 %v1573_v11, %v5596_v61  ;;  %v1728_v34 = vadd.f32 %v1727_v49, %v1726_v37  ;;  %v7182_v37 = vld [vmem:[#allocation14_spill] sm:$0xff] }
 0x17d   :  { %v2037_v12 = vcombine.high %v6050_v25, %v6050_v25  ;;  %v1585_v48 = vrot.slane %v1455_v20, %v5243_v0  ;;  %v2289_v35 = vadd.f32 %v2288_v50, %v2287_v42  ;;  %v2292_v15 = vsel %vm567_vm1, %v5996_v38, 0.0 }
 0x17e   :  { %v1454_v51 = vcombine.high %v1438_v32, %v1438_v32  ;;  %v1589_v30 = vrot.slane %v1438_v32, %v5243_v0  ;;  %v1683_v3 = vmul.f32 %v1577_v62, %v5606_v58  ;;  %v1988_v13 = vcombine.high %v1980_v7, %v1980_v7 }
 0x17f   :  { %v1684_v23 = vmul.f32 %v1581_v40, %v5623_v60  ;;  %v1729_v6 = vsel %vm567_vm1, %v1682_v16, 0.0  ;;  %v1987_v41 = vrot.slane %v1973_v10, %v5241_v63  ;;  %v1996_v18 = vrot.slane %v1980_v7, %v5241_v63 }
 0x180   :  { %v1456_v50 = vcombine.high %v1452_v17, %v1452_v17  ;;  %v1593_v8 = vrot.slane %v1452_v17, %v5243_v0  ;;  %v1730_v38 = vadd.f32 %v1729_v6, %v1728_v34  ;;  %v2421_v54 = vmul.f32 0.70710677, %v6058_v28 }
 0x181   :  { %v1685_v36 = vmul.f32 %v1585_v48, %v7182_v37  ;;  %v1731_v45 = vsel %vm567_vm1, %v1683_v3, 0.0  ;;  %v2291_v31 = vadd.f32 %v6009_v14, %v2289_v35  ;;  %v2420_v42 = vmul.f32 0.70710677, %v6074_v26  ;;  %v6097_v3 = vpop.f32.mrf.mxu1 }
 0x182   :  { %v1597_v32 = vrot.slane %v1454_v51, %v5243_v0  ;;  %v1686_v11 = vmul.f32 %v1589_v30, %v5651_v22  ;;  %v1732_v49 = vadd.f32 %v1731_v45, %v1730_v38  ;;  %v2010_v7 = vrot.slane %v1988_v13, %v5241_v63 }
 0x183   :  { %v1733_v20 = vsel %vm567_vm1, %v1684_v23, 0.0  ;;  %v1989_v62 = vcombine.high %v1987_v41, %v1987_v41  ;;  %v2018_v10 = vcombine.high %v1996_v18, %v1996_v18  ;;  %v2138_v17 = vrot.slane %v1996_v18, %v5243_v0 }
 0x184   :  { %v1601_v40 = vrot.slane %v1456_v50, %v5243_v0  ;;  %v1687_v16 = vmul.f32 %v1593_v8, %v5661_v44  ;;  %v1734_v14 = vadd.f32 %v1733_v20, %v1732_v49  ;;  %v2020_v34 = vcombine.high %v2010_v7, %v2010_v7 }
 0x185   :  { %v1735_v48 = vsel %vm567_vm1, %v1685_v36, 0.0  ;;  %v2003_v35 = vrot.slane %v1987_v41, %v5241_v63  ;;  %v2142_v51 = vrot.slane %v2010_v7, %v5243_v0  ;;  %v2146_v30 = vrot.slane %v2018_v10, %v5243_v0 }
 0x186   :  { %v1688_v13 = vmul.f32 %v1597_v32, %v5668_v53  ;;  %v1736_v23 = vadd.f32 %v1735_v48, %v1734_v14  ;;  %v1737_v6 = vsel %vm567_vm1, %v1686_v11, 0.0  ;;  %v2293_v18 = vadd.f32 %v2292_v15, %v2291_v31  ;;  %v6110_v31 = vpop.f32.mrf.mxu1 }
 0x187   :  { %v2017_v50 = vrot.slane %v1989_v62, %v5241_v63  ;;  %v2150_v8 = vrot.slane %v2020_v34, %v5243_v0  ;;  %v2247_v38 = vmul.f32 %v2138_v17, %v5596_v61  ;;  %v2248_v41 = vmul.f32 %v2142_v51, %v5606_v58 }
 0x188   :  { %v1689_v36 = vmul.f32 %v1601_v40, %v5681_v59  ;;  %v1738_v45 = vadd.f32 %v1737_v6, %v1736_v23  ;;  %v1739_v49 = vsel %vm567_vm1, %v1687_v16, 0.0  ;;  %4939 = verf.f32 %v2421_v54 }
 0x189   :  { %v2019_v7 = vcombine.high %v2003_v35, %v2003_v35  ;;  %v2154_v32 = vrot.slane %v2003_v35, %v5243_v0  ;;  %v2249_v11 = vmul.f32 %v2146_v30, %v5623_v60  ;;  %v2294_v15 = vsel %vm567_vm1, %v2247_v38, 0.0 }
 0x18a   :  { %v1740_v20 = vadd.f32 %v1739_v49, %v1738_v45  ;;  %v1741_v61 = vsel %vm567_vm1, %v1688_v13, 0.0  ;;  %v2295_v62 = vadd.f32 %v2294_v15, %v2293_v18  ;;  %4941 = verf.f32 %v2420_v42 }
 0x18b   :  { %v2021_v58 = vcombine.high %v2017_v50, %v2017_v50  ;;  %v2158_v10 = vrot.slane %v2017_v50, %v5243_v0  ;;  %v2250_v17 = vmul.f32 %v2150_v8, %v7182_v37  ;;  %v2296_v54 = vsel %vm567_vm1, %v2248_v41, 0.0 }
 0x18c   :  { %v2045_v40 = vrot.slane %v6050_v25, %v5241_v63  ;;  %v1742_v60 = vadd.f32 %v1741_v61, %v1740_v20  ;;  %v2297_v16 = vadd.f32 %v2296_v54, %v2295_v62  ;;  %v2985_v14 = vmul.f32 0.70710677, %v6110_v31 }
 0x18d   :  { %v1743_v34 = vsel %vm567_vm1, %v1689_v36, 0.0  ;;  %v2162_v48 = vrot.slane %v2019_v7, %v5243_v0  ;;  %v2251_v42 = vmul.f32 %v2154_v32, %v5651_v22  ;;  %v2298_v35 = vsel %vm567_vm1, %v2249_v11, 0.0 }
 0x18e   :  { %v2038_v37 = vcombine.high %v6061_v55, %v6061_v55  ;;  %v1744_v51 = vadd.f32 %v1743_v34, %v1742_v60  ;;  %v2299_v30 = vadd.f32 %v2298_v35, %v2297_v16  ;;  %v2986_v13 = vmul.f32 0.70710677, %v6097_v3 }
 0x18f   :  { %v2059_v23 = vrot.slane %v2037_v12, %v5241_v63  ;;  %v2166_v6 = vrot.slane %v2021_v58, %v5243_v0  ;;  %v2252_v18 = vmul.f32 %v2158_v10, %v5661_v44  ;;  %v2300_v22 = vsel %vm567_vm1, %v2250_v17, 0.0  ;;  %v6153_v58 = vld [vmem:[%s7110_s2 + $0xc0] sm:$0x1f] }
 0x190   :  { %v2052_v50 = vrot.slane %v6061_v55, %v5241_v63  ;;  %v2067_v8 = vcombine.high %v2045_v40, %v2045_v40  ;;  %v1746_v38 = vadd.f32 %v6036_v5, %v1744_v51  ;;  %v2301_v41 = vadd.f32 %v2300_v22, %v2299_v30 }
 0x191   :  { %v2170_v36 = vrot.slane %v2045_v40, %v5243_v0  ;;  %v2253_v45 = vmul.f32 %v2162_v48, %v5668_v53  ;;  %v2302_v25 = vsel %vm567_vm1, %v2251_v42, 0.0  ;;  %4943 = verf.f32 %v2985_v14 }
 0x192   :  { %v2066_v12 = vrot.slane %v2038_v37, %v5241_v63  ;;  %v1748_v44 = vadd.f32 %v6039_v47, %v1746_v38  ;;  %v2303_v49 = vadd.f32 %v2302_v25, %v2301_v41  ;;  %4945 = verf.f32 %v2986_v13 }
 0x193   :  { %v2069_v7 = vcombine.high %v2059_v23, %v2059_v23  ;;  %v2174_v55 = vrot.slane %v2059_v23, %v5243_v0  ;;  %v2254_v32 = vmul.f32 %v2166_v6, %v5681_v59  ;;  %v2304_v5 = vsel %vm567_vm1, %v2252_v18, 0.0 }
 0x194   :  { %v1753_v11 = vsel %vm567_vm1, %v6021_v46, 0.0  ;;  %v1755_v53 = vsel %vm567_vm1, %v6025_v29, 0.0  ;;  %v1750_v15 = vadd.f32 %v6044_v9, %v1748_v44  ;;  %v2305_v20 = vadd.f32 %v2304_v5, %v2303_v49  ;;  %v4863_v46 = vpop.f32.mrf.mxu0 }
 0x195   :  { %v4940_v61 = vpop.eup %4939  ;;  %v2068_v47 = vcombine.high %v2052_v50, %v2052_v50  ;;  %v2178_v62 = vrot.slane %v2067_v8, %v5243_v0  ;;  %v2255_v59 = vmul.f32 %v6153_v58, %v2170_v36  ;;  %v2306_v10 = vsel %vm567_vm1, %v2253_v45, 0.0 }
 0x196   :  { %v1757_v29 = vsel %vm567_vm1, %v6029_v21, 0.0  ;;  %v1759_v9 = vsel %vm567_vm1, %v6033_v24, 0.0  ;;  %v1752_v17 = vadd.f32 %v6047_v27, %v1750_v15  ;;  %v2307_v54 = vadd.f32 %v2306_v10, %v2305_v20  ;;  %v2407_v15 = vpop.f32.mrf.mxu0 }
 0x197   :  { %v4942_v40 = vpop.eup %4941  ;;  %v2070_v60 = vcombine.high %v2066_v12, %v2066_v12  ;;  %v2182_v16 = vrot.slane %v2069_v7, %v5243_v0  ;;  %v2256_v14 = vmul.f32 %v2174_v55, %v5693_v57  ;;  %v2308_v34 = vsel %vm567_vm1, %v2254_v32, 0.0 }
 0x198   :  { %v2186_v48 = vrot.slane %v2052_v50, %v5243_v0  ;;  %v1754_v42 = vadd.f32 %v1753_v11, %v1752_v17  ;;  %v2309_v35 = vadd.f32 %v2308_v34, %v2307_v54  ;;  %v2423_v37 = vmul.f32 0.70710677, %v4863_v46 }
 0x199   :  { %v2190_v21 = vrot.slane %v2066_v12, %v5243_v0  ;;  %v2194_v24 = vrot.slane %v2068_v47, %v5243_v0  ;;  %v2257_v27 = vmul.f32 %v2178_v62, %v5703_v2  ;;  %v2310_v51 = vsel %vm567_vm1, %v2255_v59, 0.0 }
 0x19a   :  { %v1756_v30 = vadd.f32 %v1755_v53, %v1754_v42  ;;  %v2311_v13 = vadd.f32 %v2310_v51, %v2309_v35  ;;  %v2429_v23 = vadd.f32 1.0, %v4940_v61  ;;  %v2428_v6 = vadd.f32 1.0, %v4942_v40 }
 0x19b   :  { %v2198_v57 = vrot.slane %v2070_v60, %v5243_v0  ;;  %v2258_v18 = vmul.f32 %v2182_v16, %v5727_v39  ;;  %v2312_v22 = vsel %vm567_vm1, %v2256_v14, 0.0  ;;  %v2417_v50 = vmul.f32 0.5, %v6058_v28  ;;  %v4877_v28 = vpop.f32.mrf.mxu1 }
 0x19c   :  { %v1758_v8 = vadd.f32 %v1757_v29, %v1756_v30  ;;  %v2313_v38 = vadd.f32 %v2312_v22, %v2311_v13  ;;  %v2416_v41 = vmul.f32 0.5, %v6074_v26  ;;  %4947 = verf.f32 %v2423_v37 }
 0x19d   :  { %v2259_v2 = vmul.f32 %v2186_v48, %v5716_v4  ;;  %v2260_v36 = vmul.f32 %v2190_v21, %v5740_v52  ;;  %v2261_v45 = vmul.f32 %v2194_v24, %v5748_v43  ;;  %v2314_v25 = vsel %vm567_vm1, %v2257_v27, 0.0  ;;  %v2972_v62 = vpop.f32.mrf.mxu1  ;;  %v6205_v48 = vpop.f32.mrf.mxu0 }
 0x19e   :  { %v4944_v12 = vpop.eup %4943  ;;  %v6179_v44 = vadd.f32 %v1759_v9, %v1758_v8  ;;  %v2315_v39 = vadd.f32 %v2314_v25, %v2313_v38  ;;  %v2433_v49 = vmul.f32 %v2429_v23, %v2417_v50  ;;  %v2432_v7 = vmul.f32 %v2428_v6, %v2416_v41 }
 0x19f   :  { %v4946_v55 = vpop.eup %4945  ;;  %v2262_v32 = vmul.f32 %v2198_v57, %v5764_v33  ;;  %v2316_v26 = vsel %vm567_vm1, %v2258_v18, 0.0  ;;  %v2318_v43 = vsel %vm567_vm1, %v2259_v2, 0.0  ;;  %v2320_v5 = vsel %vm567_vm1, %v2260_v36, 0.0 }
 0x1a0   :  { %7183 = vst [vmem:[#allocation5_spill] sm:$0xff] %v6179_v44  ;;  %v6187_v4 = vmax.f32 %v4586_v1, %v6179_v44  ;;  %v2317_v52 = vadd.f32 %v2316_v26, %v2315_v39  ;;  %v2322_v11 = vsel %vm567_vm1, %v2261_v45, 0.0  ;;  %v2993_v53 = vadd.f32 1.0, %v4944_v12  ;;  %v6234_v12 = vld [vmem:[%s7110_s2] sm:$0x1f] }
 0x1a1   :  { %v2489_v61 = vcombine.high %v2433_v49, %v2433_v49  ;;  %v2994_v33 = vadd.f32 1.0, %v4946_v55  ;;  %v2447_v47 = vrot.slane %v2432_v7, %v5241_v63  ;;  %v2324_v59 = vsel %vm567_vm1, %v2262_v32, 0.0  ;;  %v6245_v55 = vld [vmem:[%s7110_s2 + $0x8] sm:$0x1f] }
 0x1a2   :  { %v2319_v20 = vadd.f32 %v2318_v43, %v2317_v52  ;;  %v2496_v1 = vrot.slane %v2433_v49, %v5241_v63  ;;  %v2982_v10 = vmul.f32 0.5, %v6097_v3  ;;  %v2981_v29 = vmul.f32 0.5, %v6110_v31 }
 0x1a3   :  { %v6197_v17 = vmul.f32 0.5, %v4863_v46  ;;  %v6199_v54 = vmul.f32 0.5, %v4877_v28  ;;  %v2988_v40 = vmul.f32 0.70710677, %v4877_v28  ;;  %v6201_v16 = vmul.f32 0.5, %v2407_v15 }
 0x1a4   :  { %v2321_v9 = vadd.f32 %v2320_v5, %v2319_v20  ;;  %v2997_v60 = vmul.f32 %v2993_v53, %v2981_v29  ;;  %v2422_v14 = vmul.f32 0.70710677, %v2407_v15  ;;  %v6203_v34 = vmul.f32 0.5, %v2972_v62 }
 0x1a5   :  { %v2503_v35 = vrot.slane %v2489_v61, %v5241_v63  ;;  %v2998_v3 = vmul.f32 %v2994_v33, %v2982_v10  ;;  %v2455_v37 = vcombine.high %v2447_v47, %v2447_v47  ;;  %v2504_v31 = vcombine.high %v2496_v1, %v2496_v1 }
 0x1a6   :  { %v2323_v42 = vadd.f32 %v2322_v11, %v2321_v9  ;;  %v2440_v21 = vcombine.high %v2432_v7, %v2432_v7  ;;  %v2463_v46 = vrot.slane %v2447_v47, %v5241_v63  ;;  %v6209_v24 = vmul.f32 0.70710677, %v2972_v62  ;;  %v6265_v62 = vld [vmem:[%s7110_s2 + $0x10] sm:$0x1f] }
 0x1a7   :  { %v2477_v51 = vrot.slane %v2455_v37, %v5241_v63  ;;  %4949 = verf.f32 %v2988_v40  ;;  %v6215_v30 = vmul.f32 0.70710677, %v6205_v48  ;;  %v2512_v23 = vrot.slane %v2496_v1, %v5241_v63 }
 0x1a8   :  { %v6211_v27 = vadd.f32 %v2324_v59, %v2323_v42  ;;  %v2485_v6 = vcombine.high %v2463_v46, %v2463_v46  ;;  %v2639_v57 = vrot.slane %v2463_v46, %v5243_v0  ;;  %v3012_v18 = vrot.slane %v2997_v60, %v5241_v63 }
 0x1a9   :  { %v4948_v13 = vpop.eup %4947  ;;  %v2505_v50 = vcombine.high %v2503_v35, %v2503_v35  ;;  %v3054_v8 = vcombine.high %v2998_v3, %v2998_v3  ;;  %4951 = verf.f32 %v2422_v14  ;;  %v6223_v38 = vrot.slane %v2503_v35, %v5241_v63 }
 0x1aa   :  { %v6226_v41 = vrot.slane %v2504_v31, %v5241_v63  ;;  %v2454_v2 = vrot.slane %v2440_v21, %v5241_v63  ;;  %v2643_v36 = vrot.slane %v2477_v51, %v5243_v0  ;;  %v2487_v45 = vcombine.high %v2477_v51, %v2477_v51  ;;  %v6287_v51 = vld [vmem:[%s7110_s2 + $0x18] sm:$0x1f] }
 0x1ab   :  { %v2647_v25 = vrot.slane %v2485_v6, %v5243_v0  ;;  %v2796_v39 = vmul.f32 %v6234_v12, %v2639_v57  ;;  %v6237_v49 = vadd.f32 1.0, %v4948_v13  ;;  %v2534_v7 = vcombine.high %v2512_v23, %v2512_v23 }
 0x1ac   :  { %v6240_v28 = vrot.slane %v2998_v3, %v5241_v63  ;;  %v2797_v32 = vmul.f32 %v6245_v55, %v2643_v36  ;;  %v3020_v26 = vcombine.high %v3012_v18, %v3012_v18  ;;  %v6249_v52 = vrot.slane %v2505_v50, %v5241_v63 }
 0x1ad   :  { %v2671_v43 = vrot.slane %v2512_v23, %v5243_v0  ;;  %v6253_v5 = vrot.slane %v3054_v8, %v5241_v63  ;;  %v3005_v11 = vcombine.high %v2997_v60, %v2997_v60  ;;  %v2535_v53 = vcombine.high %v6223_v38, %v6223_v38 }
 0x1ae   :  { %v2536_v15 = vcombine.high %v6226_v41, %v6226_v41  ;;  %v2456_v20 = vcombine.high %v2454_v2, %v2454_v2  ;;  %v2829_v61 = vsel %vm567_vm1, %v2797_v32, 0.0  ;;  %v2470_v33 = vrot.slane %v2454_v2, %v5241_v63  ;;  %v6302_v2 = vld [vmem:[%s7110_s2 + $0x40] sm:$0x1f] }
 0x1af   :  { %v2651_v47 = vrot.slane %v2487_v45, %v5243_v0  ;;  %v2798_v59 = vmul.f32 %v6265_v62, %v2647_v25  ;;  %v2828_v1 = vsel %vm567_vm1, %v2796_v39, 0.0  ;;  %v2675_v10 = vrot.slane %v6226_v41, %v5243_v0  ;;  %7184 = vst [vmem:[#allocation6_spill] sm:$0xff] %v6302_v2 }
 0x1b0   :  { %v2830_v29 = vadd.f32 %v2829_v61, %v2828_v1  ;;  %v3028_v9 = vrot.slane %v3012_v18, %v5241_v63  ;;  %v3042_v40 = vrot.slane %v3020_v26, %v5241_v63  ;;  %v2537_v60 = vcombine.high %v6249_v52, %v6249_v52  ;;  %v6324_v61 = vld [vmem:[%s7110_s2 + $0x48] sm:$0x1f] }
 0x1b1   :  { %v2679_v14 = vrot.slane %v2534_v7, %v5243_v0  ;;  %v2687_v42 = vrot.slane %v6223_v38, %v5243_v0  ;;  %v3019_v35 = vrot.slane %v3005_v11, %v5241_v63  ;;  %v6280_v3 = vrot.slane %v2456_v20, %v5241_v63  ;;  %7185 = vst [vmem:[#allocation2_spill] sm:$0xff] %v6324_v61 }
 0x1b2   :  { %v3050_v37 = vcombine.high %v3028_v9, %v3028_v9  ;;  %v3052_v31 = vcombine.high %v3042_v40, %v3042_v40  ;;  %v3204_v21 = vrot.slane %v3028_v9, %v5243_v0  ;;  %v2655_v46 = vrot.slane %v2470_v33, %v5243_v0  ;;  %v6333_v9 = vld [vmem:[%s7110_s2 + $0x50] sm:$0x1f] }
 0x1b3   :  { %v2799_v13 = vmul.f32 %v6287_v51, %v2651_v47  ;;  %v2831_v23 = vsel %vm567_vm1, %v2798_v59, 0.0  ;;  %v3208_v6 = vrot.slane %v3042_v40, %v5243_v0  ;;  %v2683_v18 = vrot.slane %v2536_v15, %v5243_v0  ;;  %7186 = vst [vmem:[#allocation8_spill] sm:$0xff] %v6333_v9 }
 0x1b4   :  { %v6292_v57 = vpop.eup %4949  ;;  %v2691_v50 = vrot.slane %v6249_v52, %v5243_v0  ;;  %v2832_v8 = vadd.f32 %v2831_v23, %v2830_v29  ;;  %v3212_v38 = vrot.slane %v3050_v37, %v5243_v0  ;;  %v2695_v41 = vrot.slane %v2535_v53, %v5243_v0 }
 0x1b5   :  { %v2804_v36 = vmul.f32 %v6302_v2, %v2671_v43  ;;  %v3361_v45 = vmul.f32 %v6234_v12, %v3204_v21  ;;  %v3362_v25 = vmul.f32 %v6245_v55, %v3208_v6  ;;  %v3021_v7 = vcombine.high %v3019_v35, %v3019_v35  ;;  %v6317_v43 = vld [vmem:[%s7110_s2 + $0x20] sm:$0x1f]  ;;  %v6353_v6 = vld [vmem:[%s7110_s2 + $0x58] sm:$0x1f] }
 0x1b6   :  { %v6307_v39 = vpop.eup %4951  ;;  %v3035_v32 = vrot.slane %v3019_v35, %v5241_v63  ;;  %v3216_v26 = vrot.slane %v3052_v31, %v5243_v0  ;;  %v3363_v52 = vmul.f32 %v6265_v62, %v3212_v38  ;;  %v2486_v11 = vcombine.high %v2470_v33, %v2470_v33  ;;  %7187 = vst [vmem:[#allocation10_spill] sm:$0xff] %v6353_v6  ;;  %v6359_v38 = vld [vmem:[%s7110_s2 + $0x60] sm:$0x1f] }
 0x1b7   :  { %v2659_v53 = vrot.slane %v6280_v3, %v5243_v0  ;;  %v2800_v15 = vmul.f32 %v6317_v43, %v2655_v46  ;;  %v2833_v20 = vsel %vm567_vm1, %v2799_v13, 0.0  ;;  %v2805_v47 = vmul.f32 %v6324_v61, %v2675_v10  ;;  %v6346_v13 = vld [vmem:[%s7110_s2 + $0x28] sm:$0x1f]  ;;  %7188 = vst [vmem:[#allocation9_spill] sm:$0xff] %v6359_v38 }
 0x1b8   :  { %v2834_v33 = vadd.f32 %v2833_v20, %v2832_v8  ;;  %v3393_v59 = vsel %vm567_vm1, %v3361_v45, 0.0  ;;  %v3394_v1 = vsel %vm567_vm1, %v3362_v25, 0.0  ;;  %v2699_v29 = vrot.slane %v2537_v60, %v5243_v0  ;;  %v6365_v25 = vld [vmem:[%s7110_s2 + $0x68] sm:$0x1f] }
 0x1b9   :  { %v2806_v40 = vmul.f32 %v6333_v9, %v2679_v14  ;;  %v2488_v35 = vcombine.high %v6280_v3, %v6280_v3  ;;  %v3395_v37 = vadd.f32 %v3394_v1, %v3393_v59  ;;  %v3049_v10 = vrot.slane %v3021_v7, %v5241_v63  ;;  %7189 = vst [vmem:[#allocation11_spill] sm:$0xff] %v6365_v25  ;;  %v6392_v1 = vld [vmem:[%s7110_s2 + $0x30] sm:$0x1f] }
 0x1ba   :  { %v3220_v31 = vrot.slane %v3035_v32, %v5243_v0  ;;  %v3364_v21 = vmul.f32 %v6287_v51, %v3216_v26  ;;  %v3396_v46 = vsel %vm567_vm1, %v3363_v52, 0.0  ;;  %v2663_v60 = vrot.slane %v2486_v11, %v5243_v0  ;;  %v6371_v52 = vld [vmem:[%s7110_s2 + $0x70] sm:$0x1f]  ;;  %v6377_v11 = vld [vmem:[%s7110_s2 + $0x78] sm:$0x1f]  ;;  %7192 = vst [vmem:[#allocation7_spill] sm:$0xff] %v6392_v1 }
 0x1bb   :  { %v2801_v14 = vmul.f32 %v6346_v13, %v2659_v53  ;;  %v2835_v3 = vsel %vm567_vm1, %v2800_v15, 0.0  ;;  %v3397_v23 = vadd.f32 %v3396_v46, %v3395_v37  ;;  %v2807_v8 = vmul.f32 %v6353_v6, %v2683_v18  ;;  %7190 = vst [vmem:[#allocation12_spill] sm:$0xff] %v6371_v52  ;;  %7191 = vst [vmem:[#allocation13_spill] sm:$0xff] %v6377_v11 }
 0x1bc   :  { %v2808_v45 = vmul.f32 %v6359_v38, %v2687_v42  ;;  %v2809_v7 = vmul.f32 %v6365_v25, %v2691_v50  ;;  %v2836_v26 = vadd.f32 %v2835_v3, %v2834_v33  ;;  %v2810_v18 = vmul.f32 %v6371_v52, %v2695_v41 }
 0x1bd   :  { %v6380_v42 = vmul.f32 %v6377_v11, %v2699_v29  ;;  %v2843_v53 = vsel %vm567_vm1, %v2804_v36, 0.0  ;;  %v3069_v50 = vcombine.high %v6240_v28, %v6240_v28  ;;  %v3051_v15 = vcombine.high %v3035_v32, %v3035_v32 }
 0x1be   :  { %v3224_v20 = vrot.slane %v3049_v10, %v5243_v0  ;;  %v3365_v33 = vmul.f32 %v6317_v43, %v3220_v31  ;;  %v3398_v41 = vsel %vm567_vm1, %v3364_v21, 0.0  ;;  %v2667_v59 = vrot.slane %v2488_v35, %v5243_v0 }
 0x1bf   :  { %v2802_v29 = vmul.f32 %v6392_v1, %v2663_v60  ;;  %v2837_v36 = vsel %vm567_vm1, %v2801_v14, 0.0  ;;  %v3399_v37 = vadd.f32 %v3398_v41, %v3397_v23  ;;  %v6397_v32 = vsel %vm567_vm1, %v2805_v47, 0.0 }
 0x1c0   :  { %v3070_v31 = vcombine.high %v6253_v5, %v6253_v5  ;;  %v2838_v46 = vadd.f32 %v2837_v36, %v2836_v26  ;;  %v2435_v35 = vmul.f32 %v6237_v49, %v6197_v17  ;;  %v6404_v21 = vsel %vm567_vm1, %v2806_v40, 0.0  ;;  %v6420_v49 = vld [vmem:[%s7110_s2 + $0x38] sm:$0x1f] }
 0x1c1   :  { %v6407_v3 = vsel %vm567_vm1, %v2807_v8, 0.0  ;;  %v3077_v60 = vrot.slane %v6240_v28, %v5241_v63  ;;  %v3091_v14 = vrot.slane %v3069_v50, %v5241_v63  ;;  %v3053_v47 = vcombine.high %v3049_v10, %v3049_v10  ;;  %7193 = vst [vmem:[#allocation3_spill] sm:$0xff] %v6420_v49 }
 0x1c2   :  { %v3228_v23 = vrot.slane %v3051_v15, %v5243_v0  ;;  %v3366_v41 = vmul.f32 %v6346_v13, %v3224_v20  ;;  %v3400_v26 = vsel %vm567_vm1, %v3365_v33, 0.0  ;;  %v3084_v17 = vrot.slane %v6253_v5, %v5241_v63 }
 0x1c3   :  { %v2803_v40 = vmul.f32 %v6420_v49, %v2667_v59  ;;  %v2839_v28 = vsel %vm567_vm1, %v2802_v29, 0.0  ;;  %v3401_v8 = vadd.f32 %v3400_v26, %v3399_v37  ;;  %v6425_v10 = vsel %vm567_vm1, %v2808_v45, 0.0 }
 0x1c4   :  { %v3098_v50 = vrot.slane %v3070_v31, %v5241_v63  ;;  %v2840_v15 = vadd.f32 %v2839_v28, %v2838_v46  ;;  %v2587_v20 = vcombine.high %v2435_v35, %v2435_v35  ;;  %v6429_v33 = vsel %vm567_vm1, %v2809_v7, 0.0 }
 0x1c5   :  { %v6432_v5 = vsel %vm567_vm1, %v2810_v18, 0.0  ;;  %v3099_v36 = vcombine.high %v3077_v60, %v3077_v60  ;;  %v3101_v22 = vcombine.high %v3091_v14, %v3091_v14  ;;  %v3232_v59 = vrot.slane %v3053_v47, %v5243_v0 }
 0x1c6   :  { %v3367_v29 = vmul.f32 %v6392_v1, %v3228_v23  ;;  %v3402_v37 = vsel %vm567_vm1, %v3366_v41, 0.0  ;;  %v2430_v45 = vadd.f32 1.0, %v6307_v39  ;;  %v3100_v26 = vcombine.high %v3084_v17, %v3084_v17 }
 0x1c7   :  { %v2841_v31 = vsel %vm567_vm1, %v2803_v40, 0.0  ;;  %v3403_v46 = vadd.f32 %v3402_v37, %v3401_v8  ;;  %v2594_v7 = vrot.slane %v2435_v35, %v5241_v63  ;;  %v3102_v28 = vcombine.high %v3098_v50, %v3098_v50 }
 0x1c8   :  { %v3236_v18 = vrot.slane %v3077_v60, %v5243_v0  ;;  %v2842_v44 = vadd.f32 %v2841_v31, %v2840_v15  ;;  %v2601_v19 = vrot.slane %v2587_v20, %v5241_v63  ;;  %v3240_v47 = vrot.slane %v3091_v14, %v5243_v0 }
 0x1c9   :  { %v3244_v23 = vrot.slane %v3099_v36, %v5243_v0  ;;  %v3248_v41 = vrot.slane %v3101_v22, %v5243_v0  ;;  %v3252_v39 = vrot.slane %v3084_v17, %v5243_v0  ;;  %v3256_v56 = vrot.slane %v3098_v50, %v5243_v0 }
 0x1ca   :  { %v3368_v40 = vmul.f32 %v6420_v49, %v3232_v59  ;;  %v3404_v35 = vsel %vm567_vm1, %v3367_v29, 0.0  ;;  %v2434_v8 = vmul.f32 %v2430_v45, %v6201_v16  ;;  %v3260_v60 = vrot.slane %v3100_v26, %v5243_v0 }
 0x1cb   :  { %v3405_v15 = vadd.f32 %v3404_v35, %v3403_v46  ;;  %v2602_v20 = vcombine.high %v2594_v7, %v2594_v7  ;;  %4953 = verf.f32 %v6209_v24  ;;  %v3264_v14 = vrot.slane %v3102_v28, %v5243_v0 }
 0x1cc   :  { %v3369_v22 = vmul.f32 %v6302_v2, %v3236_v18  ;;  %v2844_v36 = vadd.f32 %v2843_v53, %v2842_v44  ;;  %v2603_v17 = vcombine.high %v2601_v19, %v2601_v19  ;;  %v3370_v50 = vmul.f32 %v6324_v61, %v3240_v47 }
 0x1cd   :  { %v3371_v59 = vmul.f32 %v6333_v9, %v3244_v23  ;;  %v3372_v29 = vmul.f32 %v6353_v6, %v3248_v41  ;;  %v2610_v16 = vrot.slane %v2594_v7, %v5241_v63  ;;  %v3373_v37 = vmul.f32 %v6359_v38, %v3252_v39  ;;  %v6617_v38 = vld [vmem:[%s7110_s2 + $0xa8] sm:$0x1f]  ;;  %v6630_v9 = vld [vmem:[%s7110_s2 + $0xb0] sm:$0x1f] }
 0x1ce   :  { %v3374_v45 = vmul.f32 %v6365_v25, %v3256_v56  ;;  %v3406_v24 = vsel %vm567_vm1, %v3368_v40, 0.0  ;;  %v2545_v26 = vrot.slane %v2434_v8, %v5241_v63  ;;  %v3375_v31 = vmul.f32 %v6371_v52, %v3260_v60  ;;  %v6596_v25 = vld [vmem:[%s7110_s2 + $0x98] sm:$0x1f] }
 0x1cf   :  { %v3407_v44 = vadd.f32 %v3406_v24, %v3405_v15  ;;  %v2617_v53 = vrot.slane %v2601_v19, %v5241_v63  ;;  %v2624_v46 = vrot.slane %v2602_v20, %v5241_v63  ;;  %v6466_v28 = vmul.f32 %v6377_v11, %v3264_v14 }
 0x1d0   :  { %v3408_v7 = vsel %vm567_vm1, %v3369_v22, 0.0  ;;  %v2846_v18 = vadd.f32 %v6397_v32, %v2844_v36  ;;  %v2631_v56 = vrot.slane %v2603_v17, %v5241_v63  ;;  %v3410_v47 = vsel %vm567_vm1, %v3370_v50, 0.0 }
 0x1d1   :  { %v3412_v23 = vsel %vm567_vm1, %v3371_v59, 0.0  ;;  %v3414_v41 = vsel %vm567_vm1, %v3372_v29, 0.0  ;;  %v2632_v39 = vcombine.high %v2610_v16, %v2610_v16  ;;  %v6475_v19 = vsel %vm567_vm1, %v3373_v37, 0.0 }
 0x1d2   :  { %v6478_v40 = vsel %vm567_vm1, %v3374_v45, 0.0  ;;  %v2538_v35 = vcombine.high %v2434_v8, %v2434_v8  ;;  %v2553_v60 = vcombine.high %v2545_v26, %v2545_v26  ;;  %v3409_v15 = vadd.f32 %v3408_v7, %v3407_v44 }
 0x1d3   :  { %v2633_v20 = vcombine.high %v2617_v53, %v2617_v53  ;;  %v2634_v32 = vcombine.high %v2624_v46, %v2624_v46  ;;  %v2996_v14 = vadd.f32 1.0, %v6292_v57  ;;  %v2635_v22 = vcombine.high %v2631_v56, %v2631_v56 }
 0x1d4   :  { %v2735_v36 = vrot.slane %v2610_v16, %v5243_v0  ;;  %v2561_v17 = vrot.slane %v2545_v26, %v5241_v63  ;;  %v2848_v50 = vadd.f32 %v6404_v21, %v2846_v18  ;;  %v6485_v59 = vsel %vm567_vm1, %v3375_v31, 0.0 }
 0x1d5   :  { %v2739_v29 = vrot.slane %v2624_v46, %v5243_v0  ;;  %v2743_v8 = vrot.slane %v2632_v39, %v5243_v0  ;;  %v2751_v37 = vrot.slane %v2617_v53, %v5243_v0  ;;  %v2755_v45 = vrot.slane %v2631_v56, %v5243_v0 }
 0x1d6   :  { %v2552_v57 = vrot.slane %v2538_v35, %v5241_v63  ;;  %v2575_v24 = vrot.slane %v2553_v60, %v5241_v63  ;;  %v2857_v16 = vsel %vm567_vm1, %v6380_v42, 0.0  ;;  %v3411_v26 = vadd.f32 %v3410_v47, %v3409_v15  ;;  %v6512_v42 = vld [vmem:[%s7110_s2 + $0xc8] sm:$0x1f] }
 0x1d7   :  { %v2747_v21 = vrot.slane %v2634_v32, %v5243_v0  ;;  %v6497_v31 = vrot.slane %v2633_v20, %v5243_v0  ;;  %v6500_v44 = vmul.f32 %v2996_v14, %v6199_v54  ;;  %v6503_v53 = vrot.slane %v2635_v22, %v5243_v0  ;;  %v6520_v54 = vld [vmem:[%s7110_s2 + $0xd0] sm:$0x1f]  ;;  %v6537_v15 = vld [vmem:[%s7110_s2 + $0xe8] sm:$0x1f] }
 0x1d8   :  { %v4954_v46 = vpop.eup %4953  ;;  %v6506_v7 = vmul.f32 %v6153_v58, %v2735_v36  ;;  %v2583_v18 = vcombine.high %v2561_v17, %v2561_v17  ;;  %v2850_v56 = vadd.f32 %v6407_v3, %v2848_v50  ;;  %v6515_v47 = vmul.f32 %v6512_v42, %v2739_v29  ;;  %v6528_v3 = vld [vmem:[%s7110_s2 + $0xe0] sm:$0x1f]  ;;  %v6546_v36 = vld [vmem:[%s7110_s2 + $0xd8] sm:$0x1f] }
 0x1d9   :  { %v6523_v39 = vmul.f32 %v6520_v54, %v2743_v8  ;;  %v6531_v35 = vmul.f32 %v6528_v3, %v2751_v37  ;;  %v2703_v60 = vrot.slane %v2561_v17, %v5243_v0  ;;  %v6540_v20 = vmul.f32 %v6537_v15, %v2755_v45 }
 0x1da   :  { %v2554_v32 = vcombine.high %v2552_v57, %v2552_v57  ;;  %v2585_v14 = vcombine.high %v2575_v24, %v2575_v24  ;;  %v2852_v22 = vadd.f32 %v6425_v10, %v2850_v56  ;;  %v6549_v50 = vmul.f32 %v6546_v36, %v2747_v21  ;;  %v6564_v21 = vld [vmem:[%s7110_s2 + $0x80] sm:$0x1f] }
 0x1db   :  { %v2707_v17 = vrot.slane %v2575_v24, %v5243_v0  ;;  %v2995_v29 = vadd.f32 1.0, %v4954_v46  ;;  %v3413_v8 = vadd.f32 %v3412_v23, %v3411_v26  ;;  %v2568_v45 = vrot.slane %v2552_v57, %v5241_v63  ;;  %7194 = vst [vmem:[#allocation14_spill] sm:$0xff] %v6564_v21 }
 0x1dc   :  { %v2711_v11 = vrot.slane %v2583_v18, %v5243_v0  ;;  %v2854_v10 = vadd.f32 %v6429_v33, %v2852_v22  ;;  %v6559_v56 = vrot.slane %v6500_v44, %v5241_v63  ;;  %v2812_v23 = vmul.f32 %v6564_v21, %v2703_v60  ;;  %v6576_v22 = vld [vmem:[%s7110_s2 + $0x88] sm:$0x1f] }
 0x1dd   :  { %v2999_v24 = vmul.f32 %v2995_v29, %v6203_v34  ;;  %v3415_v26 = vadd.f32 %v3414_v41, %v3413_v8  ;;  %v2582_v57 = vrot.slane %v2554_v32, %v5241_v63  ;;  %v2715_v46 = vrot.slane %v2585_v14, %v5243_v0  ;;  %7195 = vst [vmem:[#allocation16_spill] sm:$0xff] %v6576_v22 }
 0x1de   :  { %v2856_v33 = vadd.f32 %v6432_v5, %v2854_v10  ;;  %v3422_v18 = vsel %vm567_vm1, %v6466_v28, 0.0  ;;  %v2813_v37 = vmul.f32 %v6576_v22, %v2707_v17  ;;  %v2584_v32 = vcombine.high %v2568_v45, %v2568_v45  ;;  %v6585_v5 = vld [vmem:[%s7110_s2 + $0x90] sm:$0x1f] }
 0x1df   :  { %v3103_v60 = vcombine.high %v2999_v24, %v2999_v24  ;;  %v3110_v34 = vrot.slane %v2999_v24, %v5241_v63  ;;  %v3417_v41 = vadd.f32 %v6475_v19, %v3415_v26  ;;  %v2719_v14 = vrot.slane %v2568_v45, %v5243_v0 }
 0x1e0   :  { %v2814_v28 = vmul.f32 %v6585_v5, %v2711_v11  ;;  %v2858_v29 = vadd.f32 %v2857_v16, %v2856_v33  ;;  %v2859_v8 = vsel %vm567_vm1, %v2812_v23, 0.0  ;;  %v2586_v52 = vcombine.high %v2582_v57, %v2582_v57 }
 0x1e1   :  { %v3117_v17 = vrot.slane %v3103_v60, %v5241_v63  ;;  %v3118_v10 = vcombine.high %v3110_v34, %v3110_v34  ;;  %v3126_v24 = vrot.slane %v3110_v34, %v5241_v63  ;;  %v2723_v19 = vrot.slane %v2582_v57, %v5243_v0  ;;  %v6605_v57 = vld [vmem:[%s7110_s2 + $0xa0] sm:$0x1f] }
 0x1e2   :  { %v2860_v26 = vadd.f32 %v2859_v8, %v2858_v29  ;;  %v3419_v45 = vadd.f32 %v6478_v40, %v3417_v41  ;;  %v2815_v11 = vmul.f32 %v6596_v25, %v2715_v46  ;;  %v2861_v16 = vsel %vm567_vm1, %v2813_v37, 0.0 }
 0x1e3   :  { %v3140_v23 = vrot.slane %v3118_v10, %v5241_v63  ;;  %v3148_v33 = vcombine.high %v3126_v24, %v3126_v24  ;;  %v2727_v60 = vrot.slane %v2584_v32, %v5243_v0  ;;  %v2816_v40 = vmul.f32 %v6605_v57, %v2719_v14  ;;  %v6611_v10 = vpop.f32.mrf.mxu0 }
 0x1e4   :  { %v2862_v34 = vadd.f32 %v2861_v16, %v2860_v26  ;;  %v3268_v41 = vrot.slane %v3126_v24, %v5243_v0  ;;  %v2863_v29 = vsel %vm567_vm1, %v2814_v28, 0.0  ;;  %v3119_v46 = vcombine.high %v3117_v17, %v3117_v17 }
 0x1e5   :  { %v3150_v8 = vcombine.high %v3140_v23, %v3140_v23  ;;  %v3272_v37 = vrot.slane %v3140_v23, %v5243_v0  ;;  %v2731_v32 = vrot.slane %v2586_v52, %v5243_v0  ;;  %v2817_v14 = vmul.f32 %v6617_v38, %v2723_v19 }
 0x1e6   :  { %v2864_v26 = vadd.f32 %v2863_v29, %v2862_v34  ;;  %v3421_v24 = vadd.f32 %v6485_v59, %v3419_v45  ;;  %v2865_v28 = vsel %vm567_vm1, %v2815_v11, 0.0  ;;  %v3133_v16 = vrot.slane %v3117_v17, %v5241_v63  ;;  %v6643_v29 = vld [vmem:[%s7110_s2 + $0xb8] sm:$0x1f] }
 0x1e7   :  { %v3276_v23 = vrot.slane %v3148_v33, %v5243_v0  ;;  %v3377_v6 = vmul.f32 %v6564_v21, %v3268_v41  ;;  %v3167_v52 = vcombine.high %v6559_v56, %v6559_v56  ;;  %v2818_v19 = vmul.f32 %v6630_v9, %v2727_v60  ;;  %v6638_v41 = vpop.f32.mrf.mxu1 }
 0x1e8   :  { %v2866_v34 = vadd.f32 %v2865_v28, %v2864_v26  ;;  %v3550_v59 = vmul.f32 0.70710677, %v6611_v10  ;;  %v2867_v45 = vsel %vm567_vm1, %v2816_v40, 0.0  ;;  %v3147_v17 = vrot.slane %v3119_v46, %v5241_v63 }
 0x1e9   :  { %v3280_v11 = vrot.slane %v3150_v8, %v5243_v0  ;;  %v3378_v33 = vmul.f32 %v6576_v22, %v3272_v37  ;;  %v2819_v60 = vmul.f32 %v6643_v29, %v2731_v32  ;;  %v2869_v28 = vsel %vm567_vm1, %v2817_v14, 0.0 }
 0x1ea   :  { %v2868_v26 = vadd.f32 %v2867_v45, %v2866_v34  ;;  %v3423_v21 = vadd.f32 %v3422_v18, %v3421_v24  ;;  %v3149_v40 = vcombine.high %v3133_v16, %v3133_v16  ;;  %v3284_v46 = vrot.slane %v3133_v16, %v5243_v0  ;;  %v6654_v18 = vpop.f32.mrf.mxu1 }
 0x1eb   :  { %v3379_v8 = vmul.f32 %v6585_v5, %v3276_v23  ;;  %v3424_v37 = vsel %vm567_vm1, %v3377_v6, 0.0  ;;  %v2871_v61 = vsel %vm567_vm1, %v2818_v19, 0.0  ;;  %4955 = verf.f32 %v3550_v59 }
 0x1ec   :  { %v2870_v22 = vadd.f32 %v2869_v28, %v2868_v26  ;;  %v3425_v2 = vadd.f32 %v3424_v37, %v3423_v21  ;;  %v3151_v49 = vcombine.high %v3147_v17, %v3147_v17  ;;  %v3288_v1 = vrot.slane %v3147_v17, %v5243_v0 }
 0x1ed   :  { %v3380_v32 = vmul.f32 %v6596_v25, %v3280_v11  ;;  %v3426_v14 = vsel %vm567_vm1, %v3378_v33, 0.0  ;;  %v2875_v24 = vsel %vm567_vm1, %v6506_v7, 0.0  ;;  %v3175_v6 = vrot.slane %v6559_v56, %v5241_v63 }
 0x1ee   :  { %v2872_v16 = vadd.f32 %v2871_v61, %v2870_v22  ;;  %v3427_v23 = vadd.f32 %v3426_v14, %v3425_v2  ;;  %v2873_v21 = vsel %vm567_vm1, %v2819_v60, 0.0  ;;  %v3292_v19 = vrot.slane %v3149_v40, %v5243_v0 }
 0x1ef   :  { %v3381_v34 = vmul.f32 %v6605_v57, %v3284_v46  ;;  %v3428_v59 = vsel %vm567_vm1, %v3379_v8, 0.0  ;;  %v7196_v45 = vcombine.high %v6500_v44, %v6500_v44  ;;  %v4115_v33 = vmul.f32 0.70710677, %v6654_v18 }
 0x1f0   :  { %v2874_v11 = vadd.f32 %v2873_v21, %v2872_v16  ;;  %v3429_v7 = vadd.f32 %v3428_v59, %v3427_v23  ;;  %v3189_v61 = vrot.slane %v3167_v52, %v5241_v63  ;;  %v3296_v2 = vrot.slane %v3151_v49, %v5243_v0  ;;  %v6693_v59 = vld [vmem:[%s7110_s2 + $0xf0] sm:$0x1f] }
 0x1f1   :  { %v3166_v17 = vrot.slane %v7196_v45, %v5241_v63  ;;  %v3382_v56 = vmul.f32 %v6617_v38, %v3288_v1  ;;  %v3430_v22 = vsel %vm567_vm1, %v3380_v32, 0.0  ;;  %v2877_v60 = vsel %vm567_vm1, %v6515_v47, 0.0 }
 0x1f2   :  { %v2879_v26 = vsel %vm567_vm1, %v6523_v39, 0.0  ;;  %v2876_v44 = vadd.f32 %v2875_v24, %v2874_v11  ;;  %v3431_v28 = vadd.f32 %v3430_v22, %v3429_v7  ;;  %v3197_v40 = vcombine.high %v3175_v6, %v3175_v6 }
 0x1f3   :  { %v3300_v46 = vrot.slane %v3175_v6, %v5243_v0  ;;  %v3383_v8 = vmul.f32 %v6630_v9, %v3292_v19  ;;  %v3432_v52 = vsel %vm567_vm1, %v3381_v34, 0.0  ;;  %v3168_v49 = vcombine.high %v3166_v17, %v3166_v17 }
 0x1f4   :  { %v2878_v37 = vadd.f32 %v2877_v60, %v2876_v44  ;;  %v3433_v1 = vadd.f32 %v3432_v52, %v3431_v28  ;;  %4957 = verf.f32 %v4115_v33  ;;  %v3199_v32 = vcombine.high %v3189_v61, %v3189_v61 }
 0x1f5   :  { %v3304_v14 = vrot.slane %v3189_v61, %v5243_v0  ;;  %v3384_v47 = vmul.f32 %v6643_v29, %v3296_v2  ;;  %v3434_v39 = vsel %vm567_vm1, %v3382_v56, 0.0  ;;  %v2881_v24 = vsel %vm567_vm1, %v6549_v50, 0.0  ;;  %v6706_v2 = vld [vmem:[%s7110_s2 + $0xf8] sm:$0x1f] }
 0x1f6   :  { %v2880_v16 = vadd.f32 %v2879_v26, %v2878_v37  ;;  %v3435_v6 = vadd.f32 %v3434_v39, %v3433_v1  ;;  %4959 = verf.f32 %v6215_v30  ;;  %v3182_v23 = vrot.slane %v3166_v17, %v5241_v63 }
 0x1f7   :  { %v3308_v21 = vrot.slane %v3197_v40, %v5243_v0  ;;  %v3385_v19 = vmul.f32 %v6153_v58, %v3300_v46  ;;  %v3436_v34 = vsel %vm567_vm1, %v3383_v8, 0.0  ;;  %v2826_v50 = vmul.f32 %v6693_v59, %v6497_v31 }
 0x1f8   :  { %v3196_v45 = vrot.slane %v3168_v49, %v5241_v63  ;;  %v2882_v11 = vadd.f32 %v2881_v24, %v2880_v16  ;;  %v3437_v30 = vadd.f32 %v3436_v34, %v3435_v6  ;;  %v4956_v7 = vpop.eup %4955  ;;  %v2883_v17 = vsel %vm567_vm1, %v6531_v35, 0.0 }
 0x1f9   :  { %v3312_v58 = vrot.slane %v3199_v32, %v5243_v0  ;;  %v3386_v33 = vmul.f32 %v6512_v42, %v3304_v14  ;;  %v3438_v61 = vsel %vm567_vm1, %v3384_v47, 0.0  ;;  %v2827_v31 = vmul.f32 %v6706_v2, %v6503_v53 }
 0x1fa   :  { %v2885_v56 = vsel %vm567_vm1, %v6540_v20, 0.0  ;;  %v2884_v22 = vadd.f32 %v2883_v17, %v2882_v11  ;;  %v3439_v60 = vadd.f32 %v3438_v61, %v3437_v30  ;;  %v3198_v35 = vcombine.high %v3182_v23, %v3182_v23 }
 0x1fb   :  { %v3316_v26 = vrot.slane %v3182_v23, %v5243_v0  ;;  %v3387_v44 = vmul.f32 %v6520_v54, %v3308_v21  ;;  %v3440_v28 = vsel %vm567_vm1, %v3385_v19, 0.0  ;;  %v3200_v40 = vcombine.high %v3196_v45, %v3196_v45 }
 0x1fc   :  { %v2886_v46 = vadd.f32 %v2885_v56, %v2884_v22  ;;  %v3441_v8 = vadd.f32 %v3440_v28, %v3439_v60  ;;  %v3558_v52 = vadd.f32 1.0, %v4956_v7  ;;  %v2887_v49 = vsel %vm567_vm1, %v2826_v50, 0.0 }
 0x1fd   :  { %v3320_v53 = vrot.slane %v3196_v45, %v5243_v0  ;;  %v3388_v37 = vmul.f32 %v6546_v36, %v3312_v58  ;;  %v3442_v20 = vsel %vm567_vm1, %v3386_v33, 0.0  ;;  %v3546_v14 = vmul.f32 0.5, %v6611_v10 }
 0x1fe   :  { %v2888_v1 = vadd.f32 %v2887_v49, %v2886_v46  ;;  %v3443_v32 = vadd.f32 %v3442_v20, %v3441_v8  ;;  %v2889_v47 = vsel %vm567_vm1, %v2827_v31, 0.0  ;;  %v3324_v39 = vrot.slane %v3198_v35, %v5243_v0 }
 0x1ff   :  { %v3389_v24 = vmul.f32 %v6528_v3, %v3316_v26  ;;  %v3444_v16 = vsel %vm567_vm1, %v3387_v44, 0.0  ;;  %v3328_v6 = vrot.slane %v3200_v40, %v5243_v0  ;;  %v3562_v19 = vmul.f32 %v3558_v52, %v3546_v14 }
 0x200   :  { %v6725_v23 = vadd.f32 %v2889_v47, %v2888_v1  ;;  %v3445_v21 = vadd.f32 %v3444_v16, %v3443_v32  ;;  %v3390_v50 = vmul.f32 %v6537_v15, %v3320_v53  ;;  %v3446_v45 = vsel %vm567_vm1, %v3388_v37, 0.0 }
 0x201   :  { %v4958_v34 = vpop.eup %4957  ;;  %v7197_v10 = vmax.f32 %v6187_v4, %v6211_v27  ;;  %v3391_v17 = vmul.f32 %v6693_v59, %v3324_v39  ;;  %v3448_v58 = vsel %vm567_vm1, %v3389_v24, 0.0  ;;  %v3392_v33 = vmul.f32 %v6706_v2, %v3328_v6  ;;  %v4891_v4 = vpop.f32.mrf.mxu0 }
 0x202   :  { %v3447_v30 = vadd.f32 %v3446_v45, %v3445_v21  ;;  %v3570_v31 = vcombine.high %v3562_v19, %v3562_v19  ;;  %v4123_v56 = vadd.f32 1.0, %v4958_v34  ;;  %v3450_v15 = vsel %vm567_vm1, %v3390_v50, 0.0 }
 0x203   :  { %v6733_v11 = vmax.f32 %v7197_v10, %v6725_v23  ;;  %v4960_v7 = vpop.eup %4959  ;;  %v4116_v22 = vmul.f32 0.70710677, %v6638_v41  ;;  %v3577_v60 = vrot.slane %v3562_v19, %v5241_v63  ;;  %v4111_v44 = vmul.f32 0.5, %v6654_v18  ;;  %v3537_v18 = vpop.f32.mrf.mxu0 }
 0x204   :  { %v3449_v61 = vadd.f32 %v3448_v58, %v3447_v30  ;;  %v3559_v26 = vadd.f32 1.0, %v4960_v7  ;;  %v3452_v28 = vsel %vm567_vm1, %v3391_v17, 0.0  ;;  %v3547_v40 = vmul.f32 0.5, %v6205_v48 }
 0x205   :  { %v6745_v46 = vmul.f32 0.5, %v6638_v41  ;;  %v3454_v8 = vsel %vm567_vm1, %v3392_v33, 0.0  ;;  %v3584_v49 = vrot.slane %v3570_v31, %v5241_v63  ;;  %v6749_v53 = vmul.f32 %v4123_v56, %v4111_v44 }
 0x206   :  { %v3451_v35 = vadd.f32 %v3450_v15, %v3449_v61  ;;  %4961 = verf.f32 %v4116_v22  ;;  %v3585_v37 = vcombine.high %v3577_v60, %v3577_v60  ;;  %v3593_v20 = vrot.slane %v3577_v60, %v5241_v63  ;;  %v6774_v15 = vpop.f32.mrf.mxu1 }
 0x207   :  { %v3553_v1 = vmul.f32 0.70710677, %v4891_v4  ;;  %v3563_v14 = vmul.f32 %v3559_v26, %v3547_v40  ;;  %v3586_v48 = vcombine.high %v3584_v49, %v3584_v49  ;;  %v3600_v41 = vrot.slane %v3584_v49, %v5241_v63 }
 0x208   :  { %v3453_v52 = vadd.f32 %v3452_v28, %v3451_v35  ;;  %v3607_v47 = vrot.slane %v3585_v37, %v5241_v63  ;;  %v3615_v39 = vcombine.high %v3593_v20, %v3593_v20  ;;  %v3769_v24 = vrot.slane %v3593_v20, %v5243_v0 }
 0x209   :  { %v6757_v16 = vmul.f32 0.5, %v4891_v4  ;;  %v3614_v21 = vrot.slane %v3586_v48, %v5241_v63  ;;  %v4142_v19 = vrot.slane %v6749_v53, %v5241_v63  ;;  %v3552_v34 = vmul.f32 0.70710677, %v3537_v18  ;;  %v4102_v48 = vpop.f32.mrf.mxu1 }
 0x20a   :  { %v6752_v32 = vadd.f32 %v3454_v8, %v3453_v52  ;;  %v3617_v50 = vcombine.high %v3607_v47, %v3607_v47  ;;  %v3773_v45 = vrot.slane %v3607_v47, %v5243_v0  ;;  %v3777_v10 = vrot.slane %v3615_v39, %v5243_v0 }
 0x20b   :  { %v3926_v30 = vmul.f32 %v6234_v12, %v3769_v24  ;;  %v3626_v7 = vrot.slane %v3563_v14, %v5241_v63  ;;  %v3616_v17 = vcombine.high %v3600_v41, %v3600_v41  ;;  %4963 = verf.f32 %v3553_v1 }
 0x20c   :  { %v4590_v6 = vmax.f32 %v6733_v11, %v6752_v32  ;;  %v6768_v58 = vmul.f32 0.5, %v3537_v18  ;;  %v3781_v33 = vrot.slane %v3617_v50, %v5243_v0  ;;  %v3785_v61 = vrot.slane %v3600_v41, %v5243_v0 }
 0x20d   :  { %v3927_v31 = vmul.f32 %v6245_v55, %v3773_v45  ;;  %v3928_v56 = vmul.f32 %v6265_v62, %v3777_v10  ;;  %v3618_v22 = vcombine.high %v3614_v21, %v3614_v21  ;;  %v3789_v60 = vrot.slane %v3614_v21, %v5243_v0 }
 0x20e   :  { %4965 = verf.f32 %v3552_v34  ;;  %v6778_v4 = vmul.f32 0.70710677, %v6774_v15  ;;  %v3929_v35 = vmul.f32 %v6287_v51, %v3781_v33  ;;  %v3958_v26 = vsel %vm567_vm1, %v3926_v30, 0.0  ;;  %v7198_v33 = vld [vmem:[#allocation7_spill] sm:$0xff] }
 0x20f   :  { %v3959_v44 = vsel %vm567_vm1, %v3927_v31, 0.0  ;;  %v4150_v28 = vcombine.high %v4142_v19, %v4142_v19  ;;  %v3619_v40 = vcombine.high %v3563_v14, %v3563_v14  ;;  %v3634_v8 = vcombine.high %v3626_v7, %v3626_v7 }
 0x210   :  { %v3642_v52 = vrot.slane %v3626_v7, %v5241_v63  ;;  %v3960_v49 = vadd.f32 %v3959_v44, %v3958_v26  ;;  %v3793_v37 = vrot.slane %v3616_v17, %v5243_v0  ;;  %v3930_v20 = vmul.f32 %v6317_v43, %v3785_v61 }
 0x211   :  { %v3961_v1 = vsel %vm567_vm1, %v3928_v56, 0.0  ;;  %v4158_v18 = vrot.slane %v4142_v19, %v5241_v63  ;;  %v3797_v41 = vrot.slane %v3618_v22, %v5243_v0  ;;  %v4135_v39 = vcombine.high %v6749_v53, %v6749_v53  ;;  %v7199_v56 = vld [vmem:[#allocation3_spill] sm:$0xff] }
 0x212   :  { %v3962_v47 = vadd.f32 %v3961_v1, %v3960_v49  ;;  %v4172_v14 = vrot.slane %v4150_v28, %v5241_v63  ;;  %v3931_v24 = vmul.f32 %v6346_v13, %v3789_v60  ;;  %v3963_v21 = vsel %vm567_vm1, %v3929_v35, 0.0 }
 0x213   :  { %v4180_v34 = vcombine.high %v4158_v18, %v4158_v18  ;;  %v4334_v50 = vrot.slane %v4158_v18, %v5243_v0  ;;  %v4962_v45 = vpop.eup %4961  ;;  %v3633_v10 = vrot.slane %v3619_v40, %v5241_v63  ;;  %v4117_v7 = vmul.f32 0.70710677, %v4102_v48 }
 0x214   :  { %v3964_v19 = vadd.f32 %v3963_v21, %v3962_v47  ;;  %v4338_v30 = vrot.slane %v4172_v14, %v5243_v0  ;;  %v3656_v17 = vrot.slane %v3634_v8, %v5241_v63  ;;  %v3801_v53 = vrot.slane %v3642_v52, %v5243_v0  ;;  %v7200_v21 = vld [vmem:[#allocation6_spill] sm:$0xff] }
 0x215   :  { %v3932_v61 = vmul.f32 %v7198_v33, %v3793_v37  ;;  %v3965_v31 = vsel %vm567_vm1, %v3930_v20, 0.0  ;;  %v3933_v22 = vmul.f32 %v7199_v56, %v3797_v41  ;;  %v4149_v35 = vrot.slane %v4135_v39, %v5241_v63 }
 0x216   :  { %v3966_v60 = vadd.f32 %v3965_v31, %v3964_v19  ;;  %v4492_v26 = vmul.f32 %v6245_v55, %v4338_v30  ;;  %v3967_v44 = vsel %vm567_vm1, %v3931_v24, 0.0  ;;  %v4182_v28 = vcombine.high %v4172_v14, %v4172_v14 }
 0x217   :  { %v4342_v40 = vrot.slane %v4180_v34, %v5243_v0  ;;  %v4491_v8 = vmul.f32 %v6234_v12, %v4334_v50  ;;  %v3635_v49 = vcombine.high %v3633_v10, %v3633_v10  ;;  %v3649_v1 = vrot.slane %v3633_v10, %v5241_v63 }
 0x218   :  { %v4124_v37 = vadd.f32 1.0, %v4962_v45  ;;  %v3968_v18 = vadd.f32 %v3967_v44, %v3966_v60  ;;  %v4964_v20 = vpop.eup %4963  ;;  %v3664_v47 = vcombine.high %v3642_v52, %v3642_v52  ;;  %v3805_v41 = vrot.slane %v3656_v17, %v5243_v0 }
 0x219   :  { %v3969_v39 = vsel %vm567_vm1, %v3932_v61, 0.0  ;;  %v4524_v55 = vsel %vm567_vm1, %v4492_v26, 0.0  ;;  %v3934_v24 = vmul.f32 %v7200_v21, %v3801_v53  ;;  %v4151_v19 = vcombine.high %v4149_v35, %v4149_v35  ;;  %v7202_v21 = vld [vmem:[#allocation8_spill] sm:$0xff] }
 0x21a   :  { %v3970_v14 = vadd.f32 %v3969_v39, %v3968_v18  ;;  %v4165_v34 = vrot.slane %v4149_v35, %v5241_v63  ;;  %v3971_v50 = vsel %vm567_vm1, %v3933_v22, 0.0  ;;  %v4346_v45 = vrot.slane %v4182_v28, %v5243_v0  ;;  %v7201_v28 = vld [vmem:[#allocation2_spill] sm:$0xff] }
 0x21b   :  { %v4966_v12 = vpop.eup %4965  ;;  %v4493_v10 = vmul.f32 %v6265_v62, %v4342_v40  ;;  %v4523_v52 = vsel %vm567_vm1, %v4491_v8, 0.0  ;;  %v3666_v30 = vcombine.high %v3656_v17, %v3656_v17  ;;  %v6818_v61 = vmul.f32 %v4124_v37, %v6745_v46 }
 0x21c   :  { %v3972_v31 = vadd.f32 %v3971_v50, %v3970_v14  ;;  %v4525_v60 = vadd.f32 %v4524_v55, %v4523_v52  ;;  %v3663_v53 = vrot.slane %v3635_v49, %v5241_v63  ;;  %v3665_v26 = vcombine.high %v3649_v1, %v3649_v1  ;;  %v7203_v52 = vld [vmem:[#allocation10_spill] sm:$0xff] }
 0x21d   :  { %v6821_v44 = vadd.f32 1.0, %v4964_v20  ;;  %v6823_v35 = vmul.f32 0.5, %v4102_v48  ;;  %v3809_v22 = vrot.slane %v3664_v47, %v5243_v0  ;;  %v3935_v18 = vmul.f32 %v7201_v28, %v3805_v41  ;;  %v7205_v28 = vld [vmem:[#allocation11_spill] sm:$0xff] }
 0x21e   :  { %v3973_v62 = vsel %vm567_vm1, %v3934_v24, 0.0  ;;  %v4179_v17 = vrot.slane %v4151_v19, %v5241_v63  ;;  %v4350_v46 = vrot.slane %v4165_v34, %v5243_v0  ;;  %v4494_v8 = vmul.f32 %v6287_v51, %v4346_v45 }
 0x21f   :  { %v3974_v40 = vadd.f32 %v3973_v62, %v3972_v31  ;;  %v4526_v49 = vsel %vm567_vm1, %v4493_v10, 0.0  ;;  %v3813_v37 = vrot.slane %v3666_v30, %v5243_v0  ;;  %v4191_v48 = vrot.slane %v6818_v61, %v5241_v63 }
 0x220   :  { %v4527_v20 = vadd.f32 %v4526_v49, %v4525_v60  ;;  %4967 = verf.f32 %v4117_v7  ;;  %v3667_v47 = vcombine.high %v3663_v53, %v3663_v53  ;;  %v3817_v41 = vrot.slane %v3649_v1, %v5243_v0 }
 0x221   :  { %v3821_v39 = vrot.slane %v3663_v53, %v5243_v0  ;;  %v3825_v55 = vrot.slane %v3665_v26, %v5243_v0  ;;  %v3936_v24 = vmul.f32 %v7202_v21, %v3809_v22  ;;  %v3975_v51 = vsel %vm567_vm1, %v3935_v18, 0.0  ;;  %v7204_v26 = vld [vmem:[#allocation9_spill] sm:$0xff] }
 0x222   :  { %v4181_v14 = vcombine.high %v4165_v34, %v4165_v34  ;;  %v3560_v19 = vadd.f32 1.0, %v4966_v12  ;;  %v3976_v50 = vadd.f32 %v3975_v51, %v3974_v40  ;;  %v4354_v45 = vrot.slane %v4179_v17, %v5243_v0 }
 0x223   :  { %v4495_v10 = vmul.f32 %v6317_v43, %v4350_v46  ;;  %v4528_v7 = vsel %vm567_vm1, %v4494_v8, 0.0  ;;  %v3937_v30 = vmul.f32 %v7203_v52, %v3813_v37  ;;  %v4184_v1 = vcombine.high %v6818_v61, %v6818_v61  ;;  %v7206_v46 = vld [vmem:[#allocation12_spill] sm:$0xff] }
 0x224   :  { %v4199_v31 = vcombine.high %v4191_v48, %v4191_v48  ;;  %v4529_v60 = vadd.f32 %v4528_v7, %v4527_v20  ;;  %v3829_v53 = vrot.slane %v3667_v47, %v5243_v0  ;;  %v3938_v22 = vmul.f32 %v7204_v26, %v3817_v41  ;;  %v7207_v41 = vld [vmem:[#allocation13_spill] sm:$0xff] }
 0x225   :  { %v6849_v34 = vrot.slane %v4191_v48, %v5241_v63  ;;  %v4183_v12 = vcombine.high %v4179_v17, %v4179_v17  ;;  %v3939_v18 = vmul.f32 %v7205_v28, %v3821_v39  ;;  %v3977_v43 = vsel %vm567_vm1, %v3936_v24, 0.0 }
 0x226   :  { %v4358_v62 = vrot.slane %v4181_v14, %v5243_v0  ;;  %v3564_v40 = vmul.f32 %v3560_v19, %v6768_v58  ;;  %v3940_v61 = vmul.f32 %v7206_v46, %v3825_v55  ;;  %v4496_v8 = vmul.f32 %v6346_v13, %v4354_v45  ;;  %v7208_v46 = vld [vmem:[#allocation14_spill] sm:$0xff] }
 0x227   :  { %v4530_v49 = vsel %vm567_vm1, %v4495_v10, 0.0  ;;  %v3978_v37 = vadd.f32 %v3977_v43, %v3976_v50  ;;  %v3979_v20 = vsel %vm567_vm1, %v3937_v30, 0.0  ;;  %v3941_v39 = vmul.f32 %v7207_v41, %v3829_v53 }
 0x228   :  { %v4531_v48 = vadd.f32 %v4530_v49, %v4529_v60  ;;  %v3668_v47 = vcombine.high %v3564_v40, %v3564_v40  ;;  %v3675_v17 = vrot.slane %v3564_v40, %v5241_v63  ;;  %v3981_v21 = vsel %vm567_vm1, %v3938_v22, 0.0 }
 0x229   :  { %v4362_v24 = vrot.slane %v4183_v12, %v5243_v0  ;;  %v3980_v58 = vadd.f32 %v3979_v20, %v3978_v37  ;;  %v4497_v55 = vmul.f32 %v7198_v33, %v4358_v62  ;;  %v3983_v19 = vsel %vm567_vm1, %v3939_v18, 0.0 }
 0x22a   :  { %v3682_v13 = vrot.slane %v3668_v47, %v5241_v63  ;;  %v3683_v51 = vcombine.high %v3675_v17, %v3675_v17  ;;  %v3691_v14 = vrot.slane %v3675_v17, %v5241_v63  ;;  %v3985_v50 = vsel %vm567_vm1, %v3940_v61, 0.0  ;;  %v7209_v47 = vld [vmem:[#allocation16_spill] sm:$0xff] }
 0x22b   :  { %v4532_v45 = vsel %vm567_vm1, %v4496_v8, 0.0  ;;  %v3982_v10 = vadd.f32 %v3981_v21, %v3980_v58  ;;  %v4221_v7 = vrot.slane %v4199_v31, %v5241_v63  ;;  %v4366_v33 = vrot.slane %v6849_v34, %v5243_v0 }
 0x22c   :  { %v4533_v52 = vadd.f32 %v4532_v45, %v4531_v48  ;;  %v3705_v30 = vrot.slane %v3683_v51, %v5241_v63  ;;  %v3713_v60 = vcombine.high %v3691_v14, %v3691_v14  ;;  %v4498_v26 = vmul.f32 %v7199_v56, %v4362_v24 }
 0x22d   :  { %v4968_v53 = vpop.eup %4967  ;;  %v3833_v22 = vrot.slane %v3691_v14, %v5243_v0  ;;  %v3984_v12 = vadd.f32 %v3983_v19, %v3982_v10  ;;  %v4534_v28 = vsel %vm567_vm1, %v4497_v55, 0.0  ;;  %v3684_v18 = vcombine.high %v3682_v13, %v3682_v13 }
 0x22e   :  { %v3715_v43 = vcombine.high %v3705_v30, %v3705_v30  ;;  %v3837_v62 = vrot.slane %v3705_v30, %v5243_v0  ;;  %v3698_v31 = vrot.slane %v3682_v13, %v5241_v63  ;;  %v3841_v40 = vrot.slane %v3713_v60, %v5243_v0  ;;  %v5022_v30 = vld [vmem:[%s7110_s2 + $0x48] sm:$0x1f] }
 0x22f   :  { %v3942_v61 = vmul.f32 %v7208_v46, %v3833_v22  ;;  %v3986_v8 = vadd.f32 %v3985_v50, %v3984_v12  ;;  %v4198_v49 = vrot.slane %v4184_v1, %v5241_v63  ;;  %v4535_v37 = vadd.f32 %v4534_v28, %v4533_v52  ;;  %v5021_v1 = vld [vmem:[%s7110_s2 + $0x40] sm:$0x1f] }
 0x230   :  { %v3987_v56 = vsel %vm567_vm1, %v3941_v39, 0.0  ;;  %4969 = verf.f32 %v6778_v4  ;;  %v6885_v20 = vmul.f32 %v6821_v44, %v6757_v16  ;;  %v3845_v48 = vrot.slane %v3715_v43, %v5243_v0 }
 0x231   :  { %v3943_v17 = vmul.f32 %v7209_v47, %v3837_v62  ;;  %v3988_v41 = vadd.f32 %v3987_v56, %v3986_v8  ;;  %v4229_v21 = vcombine.high %v6849_v34, %v6849_v34  ;;  %v4370_v24 = vrot.slane %v4221_v7, %v5243_v0 }
 0x232   :  { %v4499_v39 = vmul.f32 %v5021_v1, %v4366_v33  ;;  %v4536_v4 = vsel %vm567_vm1, %v4498_v26, 0.0  ;;  %v3712_v16 = vrot.slane %v3684_v18, %v5241_v63  ;;  %v3849_v44 = vrot.slane %v3698_v31, %v5243_v0 }
 0x233   :  { %v3944_v58 = vmul.f32 %v6585_v5, %v3841_v40  ;;  %v3989_v55 = vsel %vm567_vm1, %v3942_v61, 0.0  ;;  %v4200_v13 = vcombine.high %v4198_v49, %v4198_v49  ;;  %v4214_v34 = vrot.slane %v4198_v49, %v5241_v63 }
 0x234   :  { %v4537_v51 = vadd.f32 %v4536_v4, %v4535_v37  ;;  %v3990_v14 = vadd.f32 %v3989_v55, %v3988_v41  ;;  %v4231_v19 = vcombine.high %v4221_v7, %v4221_v7  ;;  %v3945_v50 = vmul.f32 %v6596_v25, %v3845_v48 }
 0x235   :  { %v3991_v45 = vsel %vm567_vm1, %v3943_v17, 0.0  ;;  %v4125_v10 = vadd.f32 1.0, %v4968_v53  ;;  %v4374_v52 = vrot.slane %v4229_v21, %v5243_v0  ;;  %v4500_v60 = vmul.f32 %v5022_v30, %v4370_v24 }
 0x236   :  { %v4538_v33 = vsel %vm567_vm1, %v4499_v39, 0.0  ;;  %v3992_v26 = vadd.f32 %v3991_v45, %v3990_v14  ;;  %v3714_v22 = vcombine.high %v3698_v31, %v3698_v31  ;;  %v3853_v12 = vrot.slane %v3712_v16, %v5243_v0  ;;  %v5023_v31 = vld [vmem:[%s7110_s2 + $0x50] sm:$0x1f] }
 0x237   :  { %v3946_v7 = vmul.f32 %v6605_v57, %v3849_v44  ;;  %v3993_v28 = vsel %vm567_vm1, %v3944_v58, 0.0  ;;  %v4228_v18 = vrot.slane %v4200_v13, %v5241_v63  ;;  %v4539_v53 = vadd.f32 %v4538_v33, %v4537_v51 }
 0x238   :  { %v3994_v43 = vadd.f32 %v3993_v28, %v3992_v26  ;;  %v4230_v62 = vcombine.high %v4214_v34, %v4214_v34  ;;  %v4378_v40 = vrot.slane %v4231_v19, %v5243_v0  ;;  %v3995_v61 = vsel %vm567_vm1, %v3945_v50, 0.0 }
 0x239   :  { %v4129_v8 = vmul.f32 %v4125_v10, %v6823_v35  ;;  %v4501_v49 = vmul.f32 %v5023_v31, %v4374_v52  ;;  %v4540_v37 = vsel %vm567_vm1, %v4500_v60, 0.0  ;;  %v3724_v56 = vrot.slane %v6885_v20, %v5241_v63 }
 0x23a   :  { %v3996_v48 = vadd.f32 %v3995_v61, %v3994_v43  ;;  %v3716_v17 = vcombine.high %v3712_v16, %v3712_v16  ;;  %v3857_v41 = vrot.slane %v3714_v22, %v5243_v0  ;;  %v3947_v21 = vmul.f32 %v6617_v38, %v3853_v12  ;;  %v5024_v16 = vld [vmem:[%s7110_s2 + $0x58] sm:$0x1f]  ;;  %v5025_v22 = vld [vmem:[%s7110_s2 + $0x60] sm:$0x1f] }
 0x23b   :  { %v3997_v24 = vsel %vm567_vm1, %v3946_v7, 0.0  ;;  %v4541_v1 = vadd.f32 %v4540_v37, %v4539_v53  ;;  %v4232_v4 = vcombine.high %v4228_v18, %v4228_v18  ;;  %v4382_v44 = vrot.slane %v4214_v34, %v5243_v0 }
 0x23c   :  { %v3998_v35 = vadd.f32 %v3997_v24, %v3996_v48  ;;  %v4386_v58 = vrot.slane %v4228_v18, %v5243_v0  ;;  %v4240_v55 = vrot.slane %v4129_v8, %v5241_v63  ;;  %v4390_v13 = vrot.slane %v4230_v62, %v5243_v0  ;;  %v5026_v18 = vld [vmem:[%s7110_s2 + $0x68] sm:$0x1f] }
 0x23d   :  { %v4970_v39 = vpop.eup %4969  ;;  %v4502_v51 = vmul.f32 %v5024_v16, %v4378_v40  ;;  %v4542_v14 = vsel %vm567_vm1, %v4501_v49, 0.0  ;;  %v3732_v19 = vcombine.high %v3724_v56, %v3724_v56  ;;  %v3740_v50 = vrot.slane %v3724_v56, %v5241_v63 }
 0x23e   :  { %v3861_v45 = vrot.slane %v3716_v17, %v5243_v0  ;;  %v3948_v34 = vmul.f32 %v6630_v9, %v3857_v41  ;;  %v3999_v10 = vsel %vm567_vm1, %v3947_v21, 0.0  ;;  %v3717_v52 = vcombine.high %v6885_v20, %v6885_v20  ;;  %v5027_v20 = vld [vmem:[%s7110_s2 + $0x70] sm:$0x1f]  ;;  %v5028_v17 = vld [vmem:[%s7110_s2 + $0x78] sm:$0x1f] }
 0x23f   :  { %v4000_v30 = vadd.f32 %v3999_v10, %v3998_v35  ;;  %v4114_v60 = vmul.f32 0.5, %v6774_v15  ;;  %v4543_v33 = vadd.f32 %v4542_v14, %v4541_v1  ;;  %v4394_v26 = vrot.slane %v4232_v4, %v5243_v0 }
 0x240   :  { %v4503_v12 = vmul.f32 %v5025_v22, %v4382_v44  ;;  %v4233_v7 = vcombine.high %v4129_v8, %v4129_v8  ;;  %v4248_v28 = vcombine.high %v4240_v55, %v4240_v55  ;;  %v4504_v53 = vmul.f32 %v5026_v18, %v4386_v58 }
 0x241   :  { %v4505_v15 = vmul.f32 %v5027_v20, %v4390_v13  ;;  %v4544_v43 = vsel %vm567_vm1, %v4502_v51, 0.0  ;;  %v3754_v62 = vrot.slane %v3732_v19, %v5241_v63  ;;  %v3865_v40 = vrot.slane %v3740_v50, %v5243_v0 }
 0x242   :  { %v3949_v61 = vmul.f32 %v6643_v29, %v3861_v45  ;;  %v4001_v8 = vsel %vm567_vm1, %v3948_v34, 0.0  ;;  %v4256_v31 = vrot.slane %v4240_v55, %v5241_v63  ;;  %v3731_v49 = vrot.slane %v3717_v52, %v5241_v63 }
 0x243   :  { %v4002_v37 = vadd.f32 %v4001_v8, %v4000_v30  ;;  %v4126_v56 = vadd.f32 1.0, %v4970_v39  ;;  %v4545_v48 = vadd.f32 %v4544_v43, %v4543_v33  ;;  %v4506_v41 = vmul.f32 %v5028_v17, %v4394_v26  ;;  %v6968_v39 = vld [vmem:[%s7110_s2 + $0xc0] sm:$0x1f] }
 0x244   :  { %v4546_v21 = vsel %vm567_vm1, %v4503_v12, 0.0  ;;  %v4247_v24 = vrot.slane %v4233_v7, %v5241_v63  ;;  %v4270_v1 = vrot.slane %v4248_v28, %v5241_v63  ;;  %v4548_v35 = vsel %vm567_vm1, %v4504_v53, 0.0 }
 0x245   :  { %v4550_v4 = vsel %vm567_vm1, %v4505_v15, 0.0  ;;  %v3762_v44 = vcombine.high %v3740_v50, %v3740_v50  ;;  %v3869_v58 = vrot.slane %v3754_v62, %v5243_v0  ;;  %v3950_v55 = vmul.f32 %v6968_v39, %v3865_v40 }
 0x246   :  { %v4003_v13 = vsel %vm567_vm1, %v3949_v61, 0.0  ;;  %v4278_v16 = vcombine.high %v4256_v31, %v4256_v31  ;;  %v4398_v51 = vrot.slane %v4256_v31, %v5243_v0  ;;  %v3733_v14 = vcombine.high %v3731_v49, %v3731_v49 }
 0x247   :  { %v4004_v19 = vadd.f32 %v4003_v13, %v4002_v37  ;;  %v4130_v45 = vmul.f32 %v4126_v56, %v4114_v60  ;;  %v4547_v34 = vadd.f32 %v4546_v21, %v4545_v48  ;;  %v6974_v50 = vrot.slane %v3731_v49, %v5241_v63 }
 0x248   :  { %v4249_v10 = vcombine.high %v4247_v24, %v4247_v24  ;;  %v4280_v52 = vcombine.high %v4270_v1, %v4270_v1  ;;  %v4402_v30 = vrot.slane %v4270_v1, %v5243_v0  ;;  %v3764_v33 = vcombine.high %v3754_v62, %v3754_v62 }
 0x249   :  { %v3873_v26 = vrot.slane %v3762_v44, %v5243_v0  ;;  %v3951_v22 = vmul.f32 %v6512_v42, %v3869_v58  ;;  %v4549_v12 = vadd.f32 %v4548_v35, %v4547_v34  ;;  %v4005_v7 = vsel %vm567_vm1, %v3950_v55, 0.0 }
 0x24a   :  { %v4263_v28 = vrot.slane %v4247_v24, %v5241_v63  ;;  %v4406_v60 = vrot.slane %v4278_v16, %v5243_v0  ;;  %v4507_v18 = vmul.f32 %v7208_v46, %v4398_v51  ;;  %v6984_v53 = vrot.slane %v3733_v14, %v5241_v63 }
 0x24b   :  { %v4006_v20 = vadd.f32 %v4005_v7, %v4004_v19  ;;  %v4289_v15 = vrot.slane %v4130_v45, %v5241_v63  ;;  %v4551_v43 = vadd.f32 %v4550_v4, %v4549_v12  ;;  %v4277_v62 = vrot.slane %v4249_v10, %v5241_v63 }
 0x24c   :  { %v4410_v42 = vrot.slane %v4280_v52, %v5243_v0  ;;  %v4508_v40 = vmul.f32 %v7209_v47, %v4402_v30  ;;  %v4552_v61 = vsel %vm567_vm1, %v4506_v41, 0.0  ;;  %v3877_v8 = vrot.slane %v3764_v33, %v5243_v0 }
 0x24d   :  { %v3952_v31 = vmul.f32 %v6520_v54, %v3873_v26  ;;  %v4007_v46 = vsel %vm567_vm1, %v3951_v22, 0.0  ;;  %v4553_v49 = vadd.f32 %v4552_v61, %v4551_v43  ;;  %v4279_v37 = vcombine.high %v4263_v28, %v4263_v28 }
 0x24e   :  { %v4414_v56 = vrot.slane %v4263_v28, %v5243_v0  ;;  %v4509_v48 = vmul.f32 %v6585_v5, %v4406_v60  ;;  %v4554_v17 = vsel %vm567_vm1, %v4507_v18, 0.0  ;;  %v4008_v21 = vadd.f32 %v4007_v46, %v4006_v20 }
 0x24f   :  { %v4282_v24 = vcombine.high %v4130_v45, %v4130_v45  ;;  %v4297_v1 = vcombine.high %v4289_v15, %v4289_v15  ;;  %v4555_v47 = vadd.f32 %v4554_v17, %v4553_v49  ;;  %v4281_v35 = vcombine.high %v4277_v62, %v4277_v62  ;;  %v5031_v17 = vld [vmem:[%s7110_s2 + $0xc8] sm:$0x1f] }
 0x250   :  { %v4418_v41 = vrot.slane %v4277_v62, %v5243_v0  ;;  %v4510_v4 = vmul.f32 %v6596_v25, %v4410_v42  ;;  %v4556_v54 = vsel %vm567_vm1, %v4508_v40, 0.0  ;;  %v3881_v44 = vrot.slane %v6974_v50, %v5243_v0 }
 0x251   :  { %v3953_v58 = vmul.f32 %v6546_v36, %v3877_v8  ;;  %v4009_v5 = vsel %vm567_vm1, %v3952_v31, 0.0  ;;  %v4557_v55 = vadd.f32 %v4556_v54, %v4555_v47  ;;  %v4305_v13 = vrot.slane %v4289_v15, %v5241_v63 }
 0x252   :  { %v4422_v16 = vrot.slane %v4279_v37, %v5243_v0  ;;  %v4511_v51 = vmul.f32 %v6605_v57, %v4414_v56  ;;  %v4558_v14 = vsel %vm567_vm1, %v4509_v48, 0.0  ;;  %v3763_v25 = vcombine.high %v6974_v50, %v6974_v50 }
 0x253   :  { %v4010_v19 = vadd.f32 %v4009_v5, %v4008_v21  ;;  %v4296_v45 = vrot.slane %v4282_v24, %v5241_v63  ;;  %v4559_v34 = vadd.f32 %v4558_v14, %v4557_v55  ;;  %v4319_v36 = vrot.slane %v4297_v1, %v5241_v63 }
 0x254   :  { %v4426_v10 = vrot.slane %v4281_v35, %v5243_v0  ;;  %v4512_v52 = vmul.f32 %v6617_v38, %v4418_v41  ;;  %v4560_v30 = vsel %vm567_vm1, %v4510_v4, 0.0  ;;  %v3885_v57 = vrot.slane %v6984_v53, %v5243_v0 }
 0x255   :  { %v3954_v33 = vmul.f32 %v6528_v3, %v3881_v44  ;;  %v4011_v26 = vsel %vm567_vm1, %v3953_v58, 0.0  ;;  %v4561_v50 = vadd.f32 %v4560_v30, %v4559_v34  ;;  %v4327_v22 = vcombine.high %v4305_v13, %v4305_v13 }
 0x256   :  { %v4430_v12 = vrot.slane %v4305_v13, %v5243_v0  ;;  %v4513_v7 = vmul.f32 %v6630_v9, %v4422_v16  ;;  %v4562_v28 = vsel %vm567_vm1, %v4511_v51, 0.0  ;;  %v3765_v38 = vcombine.high %v6984_v53, %v6984_v53  ;;  %v5030_v9 = vld [vmem:[%s7110_s2 + $0xe8] sm:$0x1f]  ;;  %v5033_v16 = vld [vmem:[%s7110_s2 + $0xd8] sm:$0x1f] }
 0x257   :  { %v4012_v60 = vadd.f32 %v4011_v26, %v4010_v19  ;;  %v4298_v18 = vcombine.high %v4296_v45, %v4296_v45  ;;  %v4563_v20 = vadd.f32 %v4562_v28, %v4561_v50  ;;  %v4329_v15 = vcombine.high %v4319_v36, %v4319_v36 }
 0x258   :  { %v4434_v43 = vrot.slane %v4319_v36, %v5243_v0  ;;  %v4514_v3 = vmul.f32 %v6643_v29, %v4426_v10  ;;  %v4564_v62 = vsel %vm567_vm1, %v4512_v52, 0.0  ;;  %v3889_v42 = vrot.slane %v3763_v25, %v5243_v0  ;;  %v5034_v36 = vld [vmem:[%s7110_s2 + $0xe0] sm:$0x1f] }
 0x259   :  { %v3955_v40 = vmul.f32 %v5030_v9, %v3885_v57  ;;  %v4013_v61 = vsel %vm567_vm1, %v3954_v33, 0.0  ;;  %v4565_v53 = vadd.f32 %v4564_v62, %v4563_v20  ;;  %v4312_v8 = vrot.slane %v4296_v45, %v5241_v63 }
 0x25a   :  { %v4438_v31 = vrot.slane %v4327_v22, %v5243_v0  ;;  %v4515_v46 = vmul.f32 %v6968_v39, %v4430_v12  ;;  %v4566_v29 = vsel %vm567_vm1, %v4513_v7, 0.0  ;;  %v4014_v49 = vadd.f32 %v4013_v61, %v4012_v60  ;;  %v7211_v61 = vld [vmem:[#allocation4_spill] sm:$0xff] }
 0x25b   :  { %v4567_v37 = vadd.f32 %v4566_v29, %v4565_v53  ;;  %v4326_v56 = vrot.slane %v4298_v18, %v5241_v63  ;;  %v4442_v48 = vrot.slane %v4329_v15, %v5243_v0  ;;  %v4516_v21 = vmul.f32 %v5031_v17, %v4434_v43  ;;  %v5032_v63 = vld [vmem:[%s7110_s2 + $0xd0] sm:$0x1f] }
 0x25c   :  { %v4568_v24 = vsel %vm567_vm1, %v4514_v3, 0.0  ;;  %v3893_v1 = vrot.slane %v3765_v38, %v5243_v0  ;;  %v3956_v47 = vmul.f32 %v6693_v59, %v3889_v42  ;;  %v4015_v39 = vsel %vm567_vm1, %v3955_v40, 0.0 }
 0x25d   :  { %v4569_v35 = vadd.f32 %v4568_v24, %v4567_v37  ;;  %v4328_v41 = vcombine.high %v4312_v8, %v4312_v8  ;;  %v4446_v4 = vrot.slane %v4312_v8, %v5243_v0  ;;  %v4517_v54 = vmul.f32 %v5032_v63, %v4438_v31  ;;  %v7212_v8 = vld [vmem:[#allocation5_spill] sm:$0xff] }
 0x25e   :  { %v4570_v44 = vsel %vm567_vm1, %v4515_v46, 0.0  ;;  %v4016_v58 = vadd.f32 %v4015_v39, %v4014_v49  ;;  %v4330_v55 = vcombine.high %v4326_v56, %v4326_v56  ;;  %v4450_v13 = vrot.slane %v4326_v56, %v5243_v0 }
 0x25f   :  { %v4571_v5 = vadd.f32 %v4570_v44, %v4569_v35  ;;  %v4518_v51 = vmul.f32 %v5033_v16, %v4442_v48  ;;  %v4572_v14 = vsel %vm567_vm1, %v4516_v21, 0.0  ;;  %v3957_v25 = vmul.f32 %v6706_v2, %v3893_v1  ;;  %v4724_v35 = vld [vmem:[%s7111_s3 + $0x10] sm:$0x1f]  ;;  %v4725_v44 = vld [vmem:[%s7111_s3 + $0x18] sm:$0x1f] }
 0x260   :  { %v4017_v45 = vsel %vm567_vm1, %v3956_v47, 0.0  ;;  %v4454_v34 = vrot.slane %v4328_v41, %v5243_v0  ;;  %v4519_v10 = vmul.f32 %v5034_v36, %v4446_v4  ;;  %v4574_v52 = vsel %vm567_vm1, %v4517_v54, 0.0  ;;  %v4726_v16 = vld [vmem:[%s7111_s3 + $0x20] sm:$0x1f] }
 0x261   :  { %v4573_v19 = vadd.f32 %v4572_v14, %v4571_v5  ;;  %v4018_v30 = vadd.f32 %v4017_v45, %v4016_v58  ;;  %v4458_v33 = vrot.slane %v4330_v55, %v5243_v0  ;;  %v4520_v26 = vmul.f32 %v5030_v9, %v4450_v13  ;;  %v7210_v9 = vld [vmem:[#allocation15_spill] sm:$0xff] }
 0x262   :  { %v4576_v50 = vsel %vm567_vm1, %v4518_v51, 0.0  ;;  %v4019_v12 = vsel %vm567_vm1, %v3957_v25, 0.0  ;;  %v4521_v7 = vmul.f32 %v6693_v59, %v4454_v34  ;;  %v4578_v28 = vsel %vm567_vm1, %v4519_v10, 0.0  ;;  %v4727_v45 = vld [vmem:[%s7111_s3 + $0x28] sm:$0x1f] }
 0x263   :  { %v4575_v57 = vadd.f32 %v4574_v52, %v4573_v19  ;;  %v4020_v38 = vadd.f32 %v4019_v12, %v4018_v30  ;;  %v4522_v18 = vmul.f32 %v6706_v2, %v4458_v33  ;;  %v4580_v20 = vsel %vm567_vm1, %v4520_v26, 0.0  ;;  %v4728_v30 = vld [vmem:[%s7111_s3 + $0x30] sm:$0x1f] }
 0x264   :  { %v4582_v43 = vsel %vm567_vm1, %v4521_v7, 0.0 }
 0x265   :  { %v4577_v22 = vadd.f32 %v4576_v50, %v4575_v57  ;;  %v4591_v0 = vmax.f32 %v4590_v6, %v4020_v38  ;;  %v4584_v62 = vsel %vm567_vm1, %v4522_v18, 0.0 }
 0x267   :  { %v4579_v60 = vadd.f32 %v4578_v28, %v4577_v22  ;;  %v4729_v22 = vld [vmem:[%s7111_s3 + $0x38] sm:$0x1f] }
 0x269   :  { %v4581_v15 = vadd.f32 %v4580_v20, %v4579_v60 }
 0x26b   :  { %v4583_v3 = vadd.f32 %v4582_v43, %v4581_v15 }
 0x26d   :  { %v4585_v42 = vadd.f32 %v4584_v62, %v4583_v3 }
 0x26f   :  { %v4592_v59 = vmax.f32 %v4591_v0, %v4585_v42 }
 0x271   :  { %v4593_v40 = vsub.f32 %v7210_v9, %v4592_v59  ;;  %v4600_v53 = vsub.f32 %v7211_v61, %v4592_v59  ;;  %v4608_v2 = vsub.f32 %v7212_v8, %v4592_v59  ;;  %v4616_v31 = vsub.f32 %v6211_v27, %v4592_v59 }
 0x272   :  { %v4624_v46 = vsub.f32 %v6725_v23, %v4592_v59  ;;  %v4632_v29 = vsub.f32 %v6752_v32, %v4592_v59  ;;  %v4640_v48 = vsub.f32 %v4020_v38, %v4592_v59  ;;  %v4648_v21 = vsub.f32 %v4585_v42, %v4592_v59  ;;  %v4597_v23 = vld [vmem:[%s7111_s3] sm:$0x1f]  ;;  %v4723_v32 = vld [vmem:[%s7111_s3 + $0x8] sm:$0x1f] }
 0x273   :  { %v4594_v49 = vmul.f32 1.442695, %v4593_v40  ;;  %v4601_v11 = vmul.f32 1.442695, %v4600_v53  ;;  %v4609_v6 = vmul.f32 1.442695, %v4608_v2 }
 0x274   :  { %v4617_v37 = vmul.f32 1.442695, %v4616_v31  ;;  %v4625_v56 = vmul.f32 1.442695, %v4624_v46  ;;  %v4633_v17 = vmul.f32 1.442695, %v4632_v29 }
 0x275   :  { %4971 = vpow2.f32 %v4594_v49  ;;  %v4641_v24 = vmul.f32 1.442695, %v4640_v48  ;;  %v4649_v27 = vmul.f32 1.442695, %v4648_v21 }
 0x276   :  { %4973 = vpow2.f32 %v4601_v11 }
 0x277   :  { %4975 = vpow2.f32 %v4609_v6 }
 0x278   :  { %4977 = vpow2.f32 %v4617_v37 }
 0x279   :  { %4979 = vpow2.f32 %v4625_v56 }
 0x27a   :  { %4981 = vpow2.f32 %v4633_v17 }
 0x27b   :  { %4983 = vpow2.f32 %v4641_v24 }
 0x27c   :  { %4985 = vpow2.f32 %v4649_v27 }
 0x282   :  { %v4972_v1 = vpop.eup %4971 }
 0x283   :  { %v4974_v47 = vpop.eup %4973  ;;  %v4598_v39 = vmul.f32 %v4972_v1, %v4597_v23 }
 0x284   :  { %v4976_v41 = vpop.eup %4975  ;;  %v4603_v4 = vadd.f32 %v4974_v47, %v4972_v1  ;;  %v4606_v63 = vmul.f32 %v4974_v47, %v4723_v32 }
 0x285   :  { %v4978_v54 = vpop.eup %4977  ;;  %v4614_v55 = vmul.f32 %v4976_v41, %v4724_v35 }
 0x286   :  { %v4607_v58 = vadd.f32 %v4606_v63, %v4598_v39  ;;  %v4611_v5 = vadd.f32 %v4976_v41, %v4603_v4  ;;  %v4980_v13 = vpop.eup %4979  ;;  %v4622_v25 = vmul.f32 %v4978_v54, %v4725_v44 }
 0x287   :  { %v4982_v19 = vpop.eup %4981  ;;  %v4630_v10 = vmul.f32 %v4980_v13, %v4726_v16 }
 0x288   :  { %v4615_v51 = vadd.f32 %v4614_v55, %v4607_v58  ;;  %v4619_v14 = vadd.f32 %v4978_v54, %v4611_v5  ;;  %v4984_v52 = vpop.eup %4983  ;;  %v4638_v26 = vmul.f32 %v4982_v19, %v4727_v45 }
 0x289   :  { %v4986_v50 = vpop.eup %4985  ;;  %v4646_v28 = vmul.f32 %v4984_v52, %v4728_v30 }
 0x28a   :  { %v4623_v34 = vadd.f32 %v4622_v25, %v4615_v51  ;;  %v4627_v36 = vadd.f32 %v4980_v13, %v4619_v14  ;;  %v4654_v18 = vmul.f32 %v4986_v50, %v4729_v22 }
 0x28c   :  { %v4631_v57 = vadd.f32 %v4630_v10, %v4623_v34  ;;  %v4635_v33 = vadd.f32 %v4982_v19, %v4627_v36 }
 0x28e   :  { %v4639_v12 = vadd.f32 %v4638_v26, %v4631_v57  ;;  %v4643_v7 = vadd.f32 %v4984_v52, %v4635_v33 }
 0x290   :  { %v4647_v38 = vadd.f32 %v4646_v28, %v4639_v12  ;;  %v4651_v60 = vadd.f32 %v4986_v50, %v4643_v7 }
 0x292   :  { %v4655_v20 = vadd.f32 %v4654_v18, %v4647_v38  ;;  %4987 = vrcp.f32 %v4651_v60 }
 0x29f   :  { %v4988_v15 = vpop.eup %4987 }
 0x2a0   :  { %v4657_v43 = vmul.f32 %v4988_v15, %v4655_v20 }
 0x2a2   :  { %4658 = vst.msk [vmem:[%s7112_s4] sm:$0x1f] %vm567_vm1, %v4657_v43 }

</bundles_post_ra>
